<compile_context>
chip_gen: v5e
topology: v5e:2x2
jax: 0.10.0
libtpu: 0.0.40
codegen_flags: <defaults>
</compile_context>

<pallas_src>
import math

import jax
import jax.numpy as jnp
from jax.experimental import pallas as pl
from jax.experimental.pallas import tpu as pltpu

# Keep reference (plain-JAX) matmuls at f32 accuracy so the comparison with
# the in-kernel MXU matmuls is meaningful.
jax.config.update("jax_default_matmul_precision", "highest")

_DOT_KW = dict(preferred_element_type=jnp.float32,
               precision=jax.lax.Precision.HIGHEST)


# ---------------------------------------------------------------------------
# In-kernel math helpers
# ---------------------------------------------------------------------------
def _erf(x):
    # TODO(synk): lax.erf may not lower in Mosaic; exact-GELU's erf is
    # approximated with Abramowitz & Stegun 7.1.26 (max abs err ~1.5e-7).
    a1, a2, a3, a4, a5 = (0.254829592, -0.284496736, 1.421413741,
                          -1.453152027, 1.061405429)
    p = 0.3275911
    sgn = jnp.where(x >= 0.0, 1.0, -1.0)
    ax = jnp.abs(x)
    t = 1.0 / (1.0 + p * ax)
    poly = ((((a5 * t + a4) * t + a3) * t + a2) * t + a1) * t
    return sgn * (1.0 - poly * jnp.exp(-ax * ax))


def _gelu_exact(x):
    return 0.5 * x * (1.0 + _erf(x * (1.0 / math.sqrt(2.0))))


# ---------------------------------------------------------------------------
# Fused CMM kernel (one grid step = one batch element)
#   layout: rows = H*W, lanes = T*C0  (lane-dense; all weights block-diag in T)
# ---------------------------------------------------------------------------
def _make_cmm_kernel(hh, ww, tc):
    hw = hh * ww

    def kernel(x_ref, wq_ref, wk_ref, wv_ref, qt_ref, kt_ref,
               wa_ref, wb_ref, w2_ref, o_ref, pad_ref):
        x = x_ref[0]                                          # (H*W, T*C0)

        # qkv projection: block-diagonal weights keep the contraction dim at
        # T*C0 (>=128) while staying in the lane-dense layout.
        q = jnp.dot(x, wq_ref[...], **_DOT_KW)
        k = jnp.dot(x, wk_ref[...], **_DOT_KW)
        v = jnp.dot(x, wv_ref[...], **_DOT_KW)

        # Zero the padded conv scratch once; only the interior is rewritten
        # below, so the 1-pixel border stays zero for both convolutions.
        pad_ref[...] = jnp.zeros_like(pad_ref)

        def dwconv(val, taps_ref):
            v3 = val.reshape(hh, ww, tc)
            pad_ref[1:1 + hh, 1:1 + ww, :] = v3
            # seed with the center tap (reuses the value already in vregs)
            acc = v3 * taps_ref[4:5, :].reshape(1, 1, tc)
            for i in range(3):
                for j in range(3):
                    if i == 1 and j == 1:
                        continue
                    tap = taps_ref[i * 3 + j:i * 3 + j + 1, :].reshape(1, 1, tc)
                    acc = acc + pad_ref[i:i + hh, j:j + ww, :] * tap
            return acc.reshape(hw, tc)

        qc = dwconv(q, qt_ref)
        kc = dwconv(k, kt_ref)

        # Temporal diff (k[t+1]-q[t], zero frame at t=T-1) folded into fc1:
        # wa carries w1 on the (t+1, t) block-superdiagonal, wb carries -w1 on
        # the (t, t) diagonal blocks for t < T-1.  Block t=T-1 of hid is 0, so
        # sigmoid(fc2(gelu(0))) = 0.5 exactly as in the reference padding.
        hid = (jnp.dot(kc, wa_ref[...], **_DOT_KW)
               + jnp.dot(qc, wb_ref[...], **_DOT_KW))
        hid = _gelu_exact(hid)
        gate = jax.nn.sigmoid(jnp.dot(hid, w2_ref[...], **_DOT_KW))
        o_ref[0] = -(gate * v)

    return kernel


# ---------------------------------------------------------------------------
# Full CMM forward (wrapper: one transpose in, one transpose out)
# ---------------------------------------------------------------------------
def cmm_forward(x, params):
    """x: (B, T, C0, H, W) float32 -> (B, T, C0, H, W) float32."""
    wqkv, qw9, kw9, w1, w2 = params
    b, t, c0, hh, ww = x.shape
    tc = t * c0
    hw = hh * ww
    f32 = jnp.float32

    # ---- kernel-ready weights (tiny; built once per trace) -----------------
    eye_t = jnp.eye(t, dtype=f32)
    wq_blk = jnp.kron(eye_t, wqkv[:, :c0])
    wk_blk = jnp.kron(eye_t, wqkv[:, c0:2 * c0])
    wv_blk = jnp.kron(eye_t, wqkv[:, 2 * c0:])
    w2_blk = jnp.kron(eye_t, w2)
    shift = jnp.eye(t, k=-1, dtype=f32)                     # block (t+1, t)
    keep = jnp.diag(jnp.concatenate([jnp.ones((t - 1,), f32),
                                     jnp.zeros((1,), f32)]))
    wa = jnp.kron(shift, w1)                                # applied to kc
    wb = jnp.kron(keep, -w1)                                # applied to qc
    qtaps = jnp.tile(qw9, (1, t))                           # (9, T*C0)
    ktaps = jnp.tile(kw9, (1, t))

    # ---- lane-dense layout: (B, H*W, T*C0) ----------------------------------
    xl = jnp.transpose(x, (0, 3, 4, 1, 2)).reshape(b, hw, tc)

    row_spec = pl.BlockSpec((1, hw, tc), lambda i: (i, 0, 0))
    w_spec = pl.BlockSpec((tc, tc), lambda i: (0, 0))
    tap_spec = pl.BlockSpec((9, tc), lambda i: (0, 0))

    out = pl.pallas_call(
        _make_cmm_kernel(hh, ww, tc),
        out_shape=jax.ShapeDtypeStruct((b, hw, tc), jnp.float32),
        grid=(b,),
        in_specs=[row_spec, w_spec, w_spec, w_spec, tap_spec, tap_spec,
                  w_spec, w_spec, w_spec],
        out_specs=row_spec,
        scratch_shapes=[pltpu.VMEM((hh + 2, ww + 2, tc), jnp.float32)],
        compiler_params=pltpu.CompilerParams(
            dimension_semantics=("parallel",)),
    )(xl, wq_blk, wk_blk, wv_blk, qtaps, ktaps, wa, wb, w2_blk)

    out = out.reshape(b, hh, ww, t, c0)
    return jnp.transpose(out, (0, 3, 4, 1, 2))              # (B, T, C0, H, W)


# ---------------------------------------------------------------------------
# Deterministic parameter init (same shapes as the PyTorch module)
# ---------------------------------------------------------------------------
def init_params(key, c0, num_heads):
    assert c0 % num_heads == 0
    c = c0 // num_heads
    k1, k2, k3, k4, k5 = jax.random.split(key, 5)
    wqkv = 0.1 * jax.random.normal(k1, (c0, 3 * c0), jnp.float32)   # qkv.weight.T
    qconv_w = 0.2 * jax.random.normal(k2, (c, 3, 3), jnp.float32)   # Conv2d (C,1,3,3) squeezed
    kconv_w = 0.2 * jax.random.normal(k3, (c, 3, 3), jnp.float32)
    w1 = 0.1 * jax.random.normal(k4, (c0, c0), jnp.float32)         # mlp.fc1.weight.T
    w2 = 0.1 * jax.random.normal(k5, (c0, c0), jnp.float32)         # mlp.fc2.weight.T
    # Channel c0_idx = head*C + c uses depthwise weight[c0_idx % C]; pre-tile
    # to (9, C0) with row index (i*3 + j).
    qw9 = jnp.transpose(jnp.tile(qconv_w, (num_heads, 1, 1)), (1, 2, 0)).reshape(9, c0)
    kw9 = jnp.transpose(jnp.tile(kconv_w, (num_heads, 1, 1)), (1, 2, 0)).reshape(9, c0)
    return (wqkv, qw9, kw9, w1, w2), (qconv_w, kconv_w)


# ---------------------------------------------------------------------------
# Plain-JAX reference mirroring the PyTorch forward exactly
# ---------------------------------------------------------------------------
def cmm_reference(x, wqkv, qconv_w, kconv_w, w1, w2, num_heads):
    b, t, c0, hh, ww = x.shape
    c = c0 // num_heads
    xl = jnp.transpose(x, (0, 1, 3, 4, 2))
    qkv = xl @ wqkv
    qkv = qkv.reshape(b, t, hh, ww, 3, num_heads, c)
    q, k, v = qkv[..., 0, :, :], qkv[..., 1, :, :], qkv[..., 2, :, :]

    def dwconv_ref(a, w):
        ap = jnp.pad(a, ((0, 0), (0, 0), (1, 1), (1, 1), (0, 0), (0, 0)))
        out = jnp.zeros_like(a)
        for i in range(3):
            for j in range(3):
                out = out + ap[:, :, i:i + hh, j:j + ww, :, :] * \
                    w[:, i, j][None, None, None, None, None, :]
        return out

    qc = dwconv_ref(q, qconv_w)
    kc = dwconv_ref(k, kconv_w)
    rt = kc[:, 1:] - qc[:, :-1]
    r = jnp.concatenate(
        [rt, jnp.zeros((b, 1, hh, ww, num_heads, c), rt.dtype)], axis=1)
    r = r.reshape(b, t, hh, ww, c0)
    hid = jax.nn.gelu(r @ w1, approximate=False)
    gate = jax.nn.sigmoid(hid @ w2)
    out = -(gate * v.reshape(b, t, hh, ww, c0))
    return jnp.transpose(out, (0, 1, 4, 2, 3))


if __name__ == "__main__":
    B, T, C0, H, W = 2, 4, 32, 8, 8        # inp=32
    NUM_HEADS = 4                           # reduce_time; C = C0 // NUM_HEADS = 8

    key = jax.random.PRNGKey(0)
    kp, kx = jax.random.split(key)
    params, (qconv_w, kconv_w) = init_params(kp, C0, NUM_HEADS)
    x = jax.random.normal(kx, (B, T, C0, H, W), jnp.float32)

    out = jax.jit(cmm_forward)(x, params)
    out = jax.block_until_ready(out)

    ref = cmm_reference(x, params[0], qconv_w, kconv_w, params[3], params[4],
                        NUM_HEADS)
    ref = jax.block_until_ready(ref)

    assert out.shape == (B, T, C0, H, W), out.shape
    max_err = float(jnp.max(jnp.abs(out - ref)))
    if max_err < 1e-3:
        print("KERNEL_OK")
    else:
        raise SystemExit(f"mismatch: max_err={max_err}")
</pallas_src>

<mosaic_0001>
module attributes {stable_mosaic.version = 11 : i64} {
  func.func @kernel(%arg0: i32, %arg1: memref<1x64x128xf32, #tpu.memory_space<vmem>>, %arg2: memref<128x128xf32, #tpu.memory_space<vmem>>, %arg3: memref<128x128xf32, #tpu.memory_space<vmem>>, %arg4: memref<128x128xf32, #tpu.memory_space<vmem>>, %arg5: memref<9x128xf32, #tpu.memory_space<vmem>>, %arg6: memref<9x128xf32, #tpu.memory_space<vmem>>, %arg7: memref<128x128xf32, #tpu.memory_space<vmem>>, %arg8: memref<128x128xf32, #tpu.memory_space<vmem>>, %arg9: memref<128x128xf32, #tpu.memory_space<vmem>>, %arg10: memref<1x64x128xf32, #tpu.memory_space<vmem>>, %arg11: memref<10x10x128xf32, #tpu.memory_space<vmem>>) attributes {dimension_semantics = [#tpu.dimension_semantics<parallel>], iteration_bounds = array<i64: 2>, scalar_prefetch = 0 : i64, scratch_operands = 1 : i64, tpu.core_type = #tpu.core_type<tc>, window_params = [{transform_indices = @transform_0, window_bounds = array<i64: 1, 64, 128>}, {pipeline_mode = #tpu.pipeline_mode<synchronous>, transform_indices = @transform_1, window_bounds = array<i64: 128, 128>}, {pipeline_mode = #tpu.pipeline_mode<synchronous>, transform_indices = @transform_2, window_bounds = array<i64: 128, 128>}, {pipeline_mode = #tpu.pipeline_mode<synchronous>, transform_indices = @transform_3, window_bounds = array<i64: 128, 128>}, {pipeline_mode = #tpu.pipeline_mode<synchronous>, transform_indices = @transform_4, window_bounds = array<i64: 9, 128>}, {pipeline_mode = #tpu.pipeline_mode<synchronous>, transform_indices = @transform_5, window_bounds = array<i64: 9, 128>}, {pipeline_mode = #tpu.pipeline_mode<synchronous>, transform_indices = @transform_6, window_bounds = array<i64: 128, 128>}, {pipeline_mode = #tpu.pipeline_mode<synchronous>, transform_indices = @transform_7, window_bounds = array<i64: 128, 128>}, {pipeline_mode = #tpu.pipeline_mode<synchronous>, transform_indices = @transform_8, window_bounds = array<i64: 128, 128>}, {transform_indices = @transform_9, window_bounds = array<i64: 1, 64, 128>}]} {
    %c0 = arith.constant 0 : index
    %c0_0 = arith.constant 0 : index
    %c0_1 = arith.constant 0 : index
    %0 = vector.load %arg1[%c0, %c0_0, %c0_1] : memref<1x64x128xf32, #tpu.memory_space<vmem>>, vector<1x64x128xf32>
    %1 = vector.shape_cast %0 : vector<1x64x128xf32> to vector<64x128xf32>
    %c0_2 = arith.constant 0 : index
    %c0_3 = arith.constant 0 : index
    %2 = vector.load %arg2[%c0_2, %c0_3] : memref<128x128xf32, #tpu.memory_space<vmem>>, vector<128x128xf32>
    %cst = arith.constant dense<0.000000e+00> : vector<64x128xf32>
    %3 = tpu.matmul %1, %2, %cst {dimension_numbers = #tpu.dot_dimension_numbers<[1], [0], [0], [1], [0, 0, 1, 1], [], []>, precision = #tpu.contract_precision<fp32>} : vector<64x128xf32>, vector<128x128xf32>, vector<64x128xf32> -> vector<64x128xf32>
    %c0_4 = arith.constant 0 : index
    %c0_5 = arith.constant 0 : index
    %4 = vector.load %arg3[%c0_4, %c0_5] : memref<128x128xf32, #tpu.memory_space<vmem>>, vector<128x128xf32>
    %cst_6 = arith.constant dense<0.000000e+00> : vector<64x128xf32>
    %5 = tpu.matmul %1, %4, %cst_6 {dimension_numbers = #tpu.dot_dimension_numbers<[1], [0], [0], [1], [0, 0, 1, 1], [], []>, precision = #tpu.contract_precision<fp32>} : vector<64x128xf32>, vector<128x128xf32>, vector<64x128xf32> -> vector<64x128xf32>
    %c0_7 = arith.constant 0 : index
    %c0_8 = arith.constant 0 : index
    %6 = vector.load %arg4[%c0_7, %c0_8] : memref<128x128xf32, #tpu.memory_space<vmem>>, vector<128x128xf32>
    %cst_9 = arith.constant dense<0.000000e+00> : vector<64x128xf32>
    %7 = tpu.matmul %1, %6, %cst_9 {dimension_numbers = #tpu.dot_dimension_numbers<[1], [0], [0], [1], [0, 0, 1, 1], [], []>, precision = #tpu.contract_precision<fp32>} : vector<64x128xf32>, vector<128x128xf32>, vector<64x128xf32> -> vector<64x128xf32>
    %cst_10 = arith.constant 0.000000e+00 : f32
    %8 = vector.broadcast %cst_10 : f32 to vector<10x10x128xf32>
    %c0_11 = arith.constant 0 : index
    %c0_12 = arith.constant 0 : index
    %c0_13 = arith.constant 0 : index
    %9 = vector.load %arg11[%c0_11, %c0_12, %c0_13] : memref<10x10x128xf32, #tpu.memory_space<vmem>>, vector<10x10x128xf32>
    tpu.vector_store %arg11[%c0_11, %c0_12, %c0_13], %8 {strides = array<i32>} : memref<10x10x128xf32, #tpu.memory_space<vmem>>, vector<10x10x128xf32>,
    %10 = vector.shape_cast %3 : vector<64x128xf32> to vector<8x8x128xf32>
    %c1 = arith.constant 1 : index
    %c1_14 = arith.constant 1 : index
    %c0_15 = arith.constant 0 : index
    %11 = vector.load %arg11[%c1, %c1_14, %c0_15] : memref<10x10x128xf32, #tpu.memory_space<vmem>>, vector<8x8x128xf32>
    tpu.vector_store %arg11[%c1, %c1_14, %c0_15], %10 {strides = array<i32>} : memref<10x10x128xf32, #tpu.memory_space<vmem>>, vector<8x8x128xf32>,
    %c4 = arith.constant 4 : index
    %c0_16 = arith.constant 0 : index
    %12 = vector.load %arg5[%c4, %c0_16] : memref<9x128xf32, #tpu.memory_space<vmem>>, vector<1x128xf32>
    %13 = vector.shape_cast %12 : vector<1x128xf32> to vector<1x1x128xf32>
    %14 = vector.broadcast %13 : vector<1x1x128xf32> to vector<8x8x128xf32>
    %15 = arith.mulf %10, %14 : vector<8x8x128xf32>
    %c0_17 = arith.constant 0 : index
    %c0_18 = arith.constant 0 : index
    %16 = vector.load %arg5[%c0_17, %c0_18] : memref<9x128xf32, #tpu.memory_space<vmem>>, vector<1x128xf32>
    %17 = vector.shape_cast %16 : vector<1x128xf32> to vector<1x1x128xf32>
    %c0_19 = arith.constant 0 : index
    %c0_20 = arith.constant 0 : index
    %c0_21 = arith.constant 0 : index
    %18 = vector.load %arg11[%c0_19, %c0_20, %c0_21] : memref<10x10x128xf32, #tpu.memory_space<vmem>>, vector<8x8x128xf32>
    %19 = vector.broadcast %17 : vector<1x1x128xf32> to vector<8x8x128xf32>
    %20 = arith.mulf %18, %19 : vector<8x8x128xf32>
    %21 = arith.addf %15, %20 : vector<8x8x128xf32>
    %c1_22 = arith.constant 1 : index
    %c0_23 = arith.constant 0 : index
    %22 = vector.load %arg5[%c1_22, %c0_23] : memref<9x128xf32, #tpu.memory_space<vmem>>, vector<1x128xf32>
    %23 = vector.shape_cast %22 : vector<1x128xf32> to vector<1x1x128xf32>
    %c0_24 = arith.constant 0 : index
    %c1_25 = arith.constant 1 : index
    %c0_26 = arith.constant 0 : index
    %24 = vector.load %arg11[%c0_24, %c1_25, %c0_26] : memref<10x10x128xf32, #tpu.memory_space<vmem>>, vector<8x8x128xf32>
    %25 = vector.broadcast %23 : vector<1x1x128xf32> to vector<8x8x128xf32>
    %26 = arith.mulf %24, %25 : vector<8x8x128xf32>
    %27 = arith.addf %21, %26 : vector<8x8x128xf32>
    %c2 = arith.constant 2 : index
    %c0_27 = arith.constant 0 : index
    %28 = vector.load %arg5[%c2, %c0_27] : memref<9x128xf32, #tpu.memory_space<vmem>>, vector<1x128xf32>
    %29 = vector.shape_cast %28 : vector<1x128xf32> to vector<1x1x128xf32>
    %c0_28 = arith.constant 0 : index
    %c2_29 = arith.constant 2 : index
    %c0_30 = arith.constant 0 : index
    %30 = vector.load %arg11[%c0_28, %c2_29, %c0_30] : memref<10x10x128xf32, #tpu.memory_space<vmem>>, vector<8x8x128xf32>
    %31 = vector.broadcast %29 : vector<1x1x128xf32> to vector<8x8x128xf32>
    %32 = arith.mulf %30, %31 : vector<8x8x128xf32>
    %33 = arith.addf %27, %32 : vector<8x8x128xf32>
    %c3 = arith.constant 3 : index
    %c0_31 = arith.constant 0 : index
    %34 = vector.load %arg5[%c3, %c0_31] : memref<9x128xf32, #tpu.memory_space<vmem>>, vector<1x128xf32>
    %35 = vector.shape_cast %34 : vector<1x128xf32> to vector<1x1x128xf32>
    %c1_32 = arith.constant 1 : index
    %c0_33 = arith.constant 0 : index
    %c0_34 = arith.constant 0 : index
    %36 = vector.load %arg11[%c1_32, %c0_33, %c0_34] : memref<10x10x128xf32, #tpu.memory_space<vmem>>, vector<8x8x128xf32>
    %37 = vector.broadcast %35 : vector<1x1x128xf32> to vector<8x8x128xf32>
    %38 = arith.mulf %36, %37 : vector<8x8x128xf32>
    %39 = arith.addf %33, %38 : vector<8x8x128xf32>
    %c5 = arith.constant 5 : index
    %c0_35 = arith.constant 0 : index
    %40 = vector.load %arg5[%c5, %c0_35] : memref<9x128xf32, #tpu.memory_space<vmem>>, vector<1x128xf32>
    %41 = vector.shape_cast %40 : vector<1x128xf32> to vector<1x1x128xf32>
    %c1_36 = arith.constant 1 : index
    %c2_37 = arith.constant 2 : index
    %c0_38 = arith.constant 0 : index
    %42 = vector.load %arg11[%c1_36, %c2_37, %c0_38] : memref<10x10x128xf32, #tpu.memory_space<vmem>>, vector<8x8x128xf32>
    %43 = vector.broadcast %41 : vector<1x1x128xf32> to vector<8x8x128xf32>
    %44 = arith.mulf %42, %43 : vector<8x8x128xf32>
    %45 = arith.addf %39, %44 : vector<8x8x128xf32>
    %c6 = arith.constant 6 : index
    %c0_39 = arith.constant 0 : index
    %46 = vector.load %arg5[%c6, %c0_39] : memref<9x128xf32, #tpu.memory_space<vmem>>, vector<1x128xf32>
    %47 = vector.shape_cast %46 : vector<1x128xf32> to vector<1x1x128xf32>
    %c2_40 = arith.constant 2 : index
    %c0_41 = arith.constant 0 : index
    %c0_42 = arith.constant 0 : index
    %48 = vector.load %arg11[%c2_40, %c0_41, %c0_42] : memref<10x10x128xf32, #tpu.memory_space<vmem>>, vector<8x8x128xf32>
    %49 = vector.broadcast %47 : vector<1x1x128xf32> to vector<8x8x128xf32>
    %50 = arith.mulf %48, %49 : vector<8x8x128xf32>
    %51 = arith.addf %45, %50 : vector<8x8x128xf32>
    %c7 = arith.constant 7 : index
    %c0_43 = arith.constant 0 : index
    %52 = vector.load %arg5[%c7, %c0_43] : memref<9x128xf32, #tpu.memory_space<vmem>>, vector<1x128xf32>
    %53 = vector.shape_cast %52 : vector<1x128xf32> to vector<1x1x128xf32>
    %c2_44 = arith.constant 2 : index
    %c1_45 = arith.constant 1 : index
    %c0_46 = arith.constant 0 : index
    %54 = vector.load %arg11[%c2_44, %c1_45, %c0_46] : memref<10x10x128xf32, #tpu.memory_space<vmem>>, vector<8x8x128xf32>
    %55 = vector.broadcast %53 : vector<1x1x128xf32> to vector<8x8x128xf32>
    %56 = arith.mulf %54, %55 : vector<8x8x128xf32>
    %57 = arith.addf %51, %56 : vector<8x8x128xf32>
    %c8 = arith.constant 8 : index
    %c0_47 = arith.constant 0 : index
    %58 = vector.load %arg5[%c8, %c0_47] : memref<9x128xf32, #tpu.memory_space<vmem>>, vector<1x128xf32>
    %59 = vector.shape_cast %58 : vector<1x128xf32> to vector<1x1x128xf32>
    %c2_48 = arith.constant 2 : index
    %c2_49 = arith.constant 2 : index
    %c0_50 = arith.constant 0 : index
    %60 = vector.load %arg11[%c2_48, %c2_49, %c0_50] : memref<10x10x128xf32, #tpu.memory_space<vmem>>, vector<8x8x128xf32>
    %61 = vector.broadcast %59 : vector<1x1x128xf32> to vector<8x8x128xf32>
    %62 = arith.mulf %60, %61 : vector<8x8x128xf32>
    %63 = arith.addf %57, %62 : vector<8x8x128xf32>
    %64 = vector.shape_cast %63 : vector<8x8x128xf32> to vector<64x128xf32>
    %65 = vector.shape_cast %5 : vector<64x128xf32> to vector<8x8x128xf32>
    %c1_51 = arith.constant 1 : index
    %c1_52 = arith.constant 1 : index
    %c0_53 = arith.constant 0 : index
    %66 = vector.load %arg11[%c1_51, %c1_52, %c0_53] : memref<10x10x128xf32, #tpu.memory_space<vmem>>, vector<8x8x128xf32>
    tpu.vector_store %arg11[%c1_51, %c1_52, %c0_53], %65 {strides = array<i32>} : memref<10x10x128xf32, #tpu.memory_space<vmem>>, vector<8x8x128xf32>,
    %c4_54 = arith.constant 4 : index
    %c0_55 = arith.constant 0 : index
    %67 = vector.load %arg6[%c4_54, %c0_55] : memref<9x128xf32, #tpu.memory_space<vmem>>, vector<1x128xf32>
    %68 = vector.shape_cast %67 : vector<1x128xf32> to vector<1x1x128xf32>
    %69 = vector.broadcast %68 : vector<1x1x128xf32> to vector<8x8x128xf32>
    %70 = arith.mulf %65, %69 : vector<8x8x128xf32>
    %c0_56 = arith.constant 0 : index
    %c0_57 = arith.constant 0 : index
    %71 = vector.load %arg6[%c0_56, %c0_57] : memref<9x128xf32, #tpu.memory_space<vmem>>, vector<1x128xf32>
    %72 = vector.shape_cast %71 : vector<1x128xf32> to vector<1x1x128xf32>
    %c0_58 = arith.constant 0 : index
    %c0_59 = arith.constant 0 : index
    %c0_60 = arith.constant 0 : index
    %73 = vector.load %arg11[%c0_58, %c0_59, %c0_60] : memref<10x10x128xf32, #tpu.memory_space<vmem>>, vector<8x8x128xf32>
    %74 = vector.broadcast %72 : vector<1x1x128xf32> to vector<8x8x128xf32>
    %75 = arith.mulf %73, %74 : vector<8x8x128xf32>
    %76 = arith.addf %70, %75 : vector<8x8x128xf32>
    %c1_61 = arith.constant 1 : index
    %c0_62 = arith.constant 0 : index
    %77 = vector.load %arg6[%c1_61, %c0_62] : memref<9x128xf32, #tpu.memory_space<vmem>>, vector<1x128xf32>
    %78 = vector.shape_cast %77 : vector<1x128xf32> to vector<1x1x128xf32>
    %c0_63 = arith.constant 0 : index
    %c1_64 = arith.constant 1 : index
    %c0_65 = arith.constant 0 : index
    %79 = vector.load %arg11[%c0_63, %c1_64, %c0_65] : memref<10x10x128xf32, #tpu.memory_space<vmem>>, vector<8x8x128xf32>
    %80 = vector.broadcast %78 : vector<1x1x128xf32> to vector<8x8x128xf32>
    %81 = arith.mulf %79, %80 : vector<8x8x128xf32>
    %82 = arith.addf %76, %81 : vector<8x8x128xf32>
    %c2_66 = arith.constant 2 : index
    %c0_67 = arith.constant 0 : index
    %83 = vector.load %arg6[%c2_66, %c0_67] : memref<9x128xf32, #tpu.memory_space<vmem>>, vector<1x128xf32>
    %84 = vector.shape_cast %83 : vector<1x128xf32> to vector<1x1x128xf32>
    %c0_68 = arith.constant 0 : index
    %c2_69 = arith.constant 2 : index
    %c0_70 = arith.constant 0 : index
    %85 = vector.load %arg11[%c0_68, %c2_69, %c0_70] : memref<10x10x128xf32, #tpu.memory_space<vmem>>, vector<8x8x128xf32>
    %86 = vector.broadcast %84 : vector<1x1x128xf32> to vector<8x8x128xf32>
    %87 = arith.mulf %85, %86 : vector<8x8x128xf32>
    %88 = arith.addf %82, %87 : vector<8x8x128xf32>
    %c3_71 = arith.constant 3 : index
    %c0_72 = arith.constant 0 : index
    %89 = vector.load %arg6[%c3_71, %c0_72] : memref<9x128xf32, #tpu.memory_space<vmem>>, vector<1x128xf32>
    %90 = vector.shape_cast %89 : vector<1x128xf32> to vector<1x1x128xf32>
    %c1_73 = arith.constant 1 : index
    %c0_74 = arith.constant 0 : index
    %c0_75 = arith.constant 0 : index
    %91 = vector.load %arg11[%c1_73, %c0_74, %c0_75] : memref<10x10x128xf32, #tpu.memory_space<vmem>>, vector<8x8x128xf32>
    %92 = vector.broadcast %90 : vector<1x1x128xf32> to vector<8x8x128xf32>
    %93 = arith.mulf %91, %92 : vector<8x8x128xf32>
    %94 = arith.addf %88, %93 : vector<8x8x128xf32>
    %c5_76 = arith.constant 5 : index
    %c0_77 = arith.constant 0 : index
    %95 = vector.load %arg6[%c5_76, %c0_77] : memref<9x128xf32, #tpu.memory_space<vmem>>, vector<1x128xf32>
    %96 = vector.shape_cast %95 : vector<1x128xf32> to vector<1x1x128xf32>
    %c1_78 = arith.constant 1 : index
    %c2_79 = arith.constant 2 : index
    %c0_80 = arith.constant 0 : index
    %97 = vector.load %arg11[%c1_78, %c2_79, %c0_80] : memref<10x10x128xf32, #tpu.memory_space<vmem>>, vector<8x8x128xf32>
    %98 = vector.broadcast %96 : vector<1x1x128xf32> to vector<8x8x128xf32>
    %99 = arith.mulf %97, %98 : vector<8x8x128xf32>
    %100 = arith.addf %94, %99 : vector<8x8x128xf32>
    %c6_81 = arith.constant 6 : index
    %c0_82 = arith.constant 0 : index
    %101 = vector.load %arg6[%c6_81, %c0_82] : memref<9x128xf32, #tpu.memory_space<vmem>>, vector<1x128xf32>
    %102 = vector.shape_cast %101 : vector<1x128xf32> to vector<1x1x128xf32>
    %c2_83 = arith.constant 2 : index
    %c0_84 = arith.constant 0 : index
    %c0_85 = arith.constant 0 : index
    %103 = vector.load %arg11[%c2_83, %c0_84, %c0_85] : memref<10x10x128xf32, #tpu.memory_space<vmem>>, vector<8x8x128xf32>
    %104 = vector.broadcast %102 : vector<1x1x128xf32> to vector<8x8x128xf32>
    %105 = arith.mulf %103, %104 : vector<8x8x128xf32>
    %106 = arith.addf %100, %105 : vector<8x8x128xf32>
    %c7_86 = arith.constant 7 : index
    %c0_87 = arith.constant 0 : index
    %107 = vector.load %arg6[%c7_86, %c0_87] : memref<9x128xf32, #tpu.memory_space<vmem>>, vector<1x128xf32>
    %108 = vector.shape_cast %107 : vector<1x128xf32> to vector<1x1x128xf32>
    %c2_88 = arith.constant 2 : index
    %c1_89 = arith.constant 1 : index
    %c0_90 = arith.constant 0 : index
    %109 = vector.load %arg11[%c2_88, %c1_89, %c0_90] : memref<10x10x128xf32, #tpu.memory_space<vmem>>, vector<8x8x128xf32>
    %110 = vector.broadcast %108 : vector<1x1x128xf32> to vector<8x8x128xf32>
    %111 = arith.mulf %109, %110 : vector<8x8x128xf32>
    %112 = arith.addf %106, %111 : vector<8x8x128xf32>
    %c8_91 = arith.constant 8 : index
    %c0_92 = arith.constant 0 : index
    %113 = vector.load %arg6[%c8_91, %c0_92] : memref<9x128xf32, #tpu.memory_space<vmem>>, vector<1x128xf32>
    %114 = vector.shape_cast %113 : vector<1x128xf32> to vector<1x1x128xf32>
    %c2_93 = arith.constant 2 : index
    %c2_94 = arith.constant 2 : index
    %c0_95 = arith.constant 0 : index
    %115 = vector.load %arg11[%c2_93, %c2_94, %c0_95] : memref<10x10x128xf32, #tpu.memory_space<vmem>>, vector<8x8x128xf32>
    %116 = vector.broadcast %114 : vector<1x1x128xf32> to vector<8x8x128xf32>
    %117 = arith.mulf %115, %116 : vector<8x8x128xf32>
    %118 = arith.addf %112, %117 : vector<8x8x128xf32>
    %119 = vector.shape_cast %118 : vector<8x8x128xf32> to vector<64x128xf32>
    %c0_96 = arith.constant 0 : index
    %c0_97 = arith.constant 0 : index
    %120 = vector.load %arg7[%c0_96, %c0_97] : memref<128x128xf32, #tpu.memory_space<vmem>>, vector<128x128xf32>
    %cst_98 = arith.constant dense<0.000000e+00> : vector<64x128xf32>
    %121 = tpu.matmul %119, %120, %cst_98 {dimension_numbers = #tpu.dot_dimension_numbers<[1], [0], [0], [1], [0, 0, 1, 1], [], []>, precision = #tpu.contract_precision<fp32>} : vector<64x128xf32>, vector<128x128xf32>, vector<64x128xf32> -> vector<64x128xf32>
    %c0_99 = arith.constant 0 : index
    %c0_100 = arith.constant 0 : index
    %122 = vector.load %arg8[%c0_99, %c0_100] : memref<128x128xf32, #tpu.memory_space<vmem>>, vector<128x128xf32>
    %cst_101 = arith.constant dense<0.000000e+00> : vector<64x128xf32>
    %123 = tpu.matmul %64, %122, %cst_101 {dimension_numbers = #tpu.dot_dimension_numbers<[1], [0], [0], [1], [0, 0, 1, 1], [], []>, precision = #tpu.contract_precision<fp32>} : vector<64x128xf32>, vector<128x128xf32>, vector<64x128xf32> -> vector<64x128xf32>
    %124 = arith.addf %121, %123 : vector<64x128xf32>
    %cst_102 = arith.constant 5.000000e-01 : f32
    %125 = vector.broadcast %cst_102 : f32 to vector<64x128xf32>
    %126 = arith.mulf %125, %124 : vector<64x128xf32>
    %cst_103 = arith.constant 0.707106769 : f32
    %127 = vector.broadcast %cst_103 : f32 to vector<64x128xf32>
    %128 = arith.mulf %124, %127 : vector<64x128xf32>
    %cst_104 = arith.constant 0.000000e+00 : f32
    %129 = vector.broadcast %cst_104 : f32 to vector<64x128xf32>
    %130 = arith.cmpf oge, %128, %129 : vector<64x128xf32>
    %cst_105 = arith.constant 1.000000e+00 : f32
    %cst_106 = arith.constant -1.000000e+00 : f32
    %131 = vector.broadcast %cst_105 : f32 to vector<64x128xf32>
    %132 = vector.broadcast %cst_106 : f32 to vector<64x128xf32>
    %133 = arith.select %130, %131, %132 : vector<64x128xi1>, vector<64x128xf32>
    %134 = math.absf %128 : vector<64x128xf32>
    %cst_107 = arith.constant 0.327591091 : f32
    %135 = vector.broadcast %cst_107 : f32 to vector<64x128xf32>
    %136 = arith.mulf %135, %134 : vector<64x128xf32>
    %cst_108 = arith.constant 1.000000e+00 : f32
    %137 = vector.broadcast %cst_108 : f32 to vector<64x128xf32>
    %138 = arith.addf %137, %136 : vector<64x128xf32>
    %cst_109 = arith.constant 1.000000e+00 : f32
    %139 = vector.broadcast %cst_109 : f32 to vector<64x128xf32>
    %140 = arith.divf %139, %138 : vector<64x128xf32>
    %cst_110 = arith.constant 1.06140542 : f32
    %141 = vector.broadcast %cst_110 : f32 to vector<64x128xf32>
    %142 = arith.mulf %141, %140 : vector<64x128xf32>
    %cst_111 = arith.constant -1.45315206 : f32
    %143 = vector.broadcast %cst_111 : f32 to vector<64x128xf32>
    %144 = arith.addf %142, %143 : vector<64x128xf32>
    %145 = arith.mulf %144, %140 : vector<64x128xf32>
    %cst_112 = arith.constant 1.42141378 : f32
    %146 = vector.broadcast %cst_112 : f32 to vector<64x128xf32>
    %147 = arith.addf %145, %146 : vector<64x128xf32>
    %148 = arith.mulf %147, %140 : vector<64x128xf32>
    %cst_113 = arith.constant -0.284496725 : f32
    %149 = vector.broadcast %cst_113 : f32 to vector<64x128xf32>
    %150 = arith.addf %148, %149 : vector<64x128xf32>
    %151 = arith.mulf %150, %140 : vector<64x128xf32>
    %cst_114 = arith.constant 0.254829586 : f32
    %152 = vector.broadcast %cst_114 : f32 to vector<64x128xf32>
    %153 = arith.addf %151, %152 : vector<64x128xf32>
    %154 = arith.mulf %153, %140 : vector<64x128xf32>
    %cst_115 = arith.constant 0.000000e+00 : f32
    %155 = vector.broadcast %cst_115 : f32 to vector<64x128xf32>
    %156 = arith.subf %155, %134 : vector<64x128xf32>
    %157 = arith.mulf %156, %134 : vector<64x128xf32>
    %158 = math.exp %157 : vector<64x128xf32>
    %159 = arith.mulf %154, %158 : vector<64x128xf32>
    %cst_116 = arith.constant 1.000000e+00 : f32
    %160 = vector.broadcast %cst_116 : f32 to vector<64x128xf32>
    %161 = arith.subf %160, %159 : vector<64x128xf32>
    %162 = arith.mulf %133, %161 : vector<64x128xf32>
    %cst_117 = arith.constant 1.000000e+00 : f32
    %163 = vector.broadcast %cst_117 : f32 to vector<64x128xf32>
    %164 = arith.addf %163, %162 : vector<64x128xf32>
    %165 = arith.mulf %126, %164 : vector<64x128xf32>
    %c0_118 = arith.constant 0 : index
    %c0_119 = arith.constant 0 : index
    %166 = vector.load %arg9[%c0_118, %c0_119] : memref<128x128xf32, #tpu.memory_space<vmem>>, vector<128x128xf32>
    %cst_120 = arith.constant dense<0.000000e+00> : vector<64x128xf32>
    %167 = tpu.matmul %165, %166, %cst_120 {dimension_numbers = #tpu.dot_dimension_numbers<[1], [0], [0], [1], [0, 0, 1, 1], [], []>, precision = #tpu.contract_precision<fp32>} : vector<64x128xf32>, vector<128x128xf32>, vector<64x128xf32> -> vector<64x128xf32>
    %168 = arith.negf %167 : vector<64x128xf32>
    %169 = math.exp %168 : vector<64x128xf32>
    %cst_121 = arith.constant 1.000000e+00 : f32
    %170 = vector.broadcast %cst_121 : f32 to vector<64x128xf32>
    %171 = arith.addf %170, %169 : vector<64x128xf32>
    %172 = arith.divf %170, %171 : vector<64x128xf32>
    %173 = arith.mulf %172, %7 : vector<64x128xf32>
    %cst_122 = arith.constant 0.000000e+00 : f32
    %174 = vector.broadcast %cst_122 : f32 to vector<64x128xf32>
    %175 = arith.subf %174, %173 : vector<64x128xf32>
    %c0_123 = arith.constant 0 : index
    %c0_124 = arith.constant 0 : index
    %c0_125 = arith.constant 0 : index
    %176 = vector.load %arg10[%c0_123, %c0_124, %c0_125] : memref<1x64x128xf32, #tpu.memory_space<vmem>>, vector<1x64x128xf32>
    %177 = vector.shape_cast %176 : vector<1x64x128xf32> to vector<64x128xf32>
    %178 = vector.shape_cast %175 : vector<64x128xf32> to vector<1x64x128xf32>
    tpu.vector_store %arg10[%c0_123, %c0_124, %c0_125], %178 {strides = array<i32>} : memref<1x64x128xf32, #tpu.memory_space<vmem>>, vector<1x64x128xf32>,
    return
  }
  func.func @transform_0(%arg0: i32) -> (i32, i32, i32) {
    %c0_i32 = arith.constant 0 : i32
    %c0_i32_0 = arith.constant 0 : i32
    %c0_i32_1 = arith.constant 0 : i32
    return %arg0, %c0_i32, %c0_i32_0 : i32, i32, i32
  }
  func.func @transform_1(%arg0: i32) -> (i32, i32) {
    %c0_i32 = arith.constant 0 : i32
    %c0_i32_0 = arith.constant 0 : i32
    %c0_i32_1 = arith.constant 0 : i32
    return %c0_i32, %c0_i32_0 : i32, i32
  }
  func.func @transform_2(%arg0: i32) -> (i32, i32) {
    %c0_i32 = arith.constant 0 : i32
    %c0_i32_0 = arith.constant 0 : i32
    %c0_i32_1 = arith.constant 0 : i32
    return %c0_i32, %c0_i32_0 : i32, i32
  }
  func.func @transform_3(%arg0: i32) -> (i32, i32) {
    %c0_i32 = arith.constant 0 : i32
    %c0_i32_0 = arith.constant 0 : i32
    %c0_i32_1 = arith.constant 0 : i32
    return %c0_i32, %c0_i32_0 : i32, i32
  }
  func.func @transform_4(%arg0: i32) -> (i32, i32) {
    %c0_i32 = arith.constant 0 : i32
    %c0_i32_0 = arith.constant 0 : i32
    %c0_i32_1 = arith.constant 0 : i32
    return %c0_i32, %c0_i32_0 : i32, i32
  }
  func.func @transform_5(%arg0: i32) -> (i32, i32) {
    %c0_i32 = arith.constant 0 : i32
    %c0_i32_0 = arith.constant 0 : i32
    %c0_i32_1 = arith.constant 0 : i32
    return %c0_i32, %c0_i32_0 : i32, i32
  }
  func.func @transform_6(%arg0: i32) -> (i32, i32) {
    %c0_i32 = arith.constant 0 : i32
    %c0_i32_0 = arith.constant 0 : i32
    %c0_i32_1 = arith.constant 0 : i32
    return %c0_i32, %c0_i32_0 : i32, i32
  }
  func.func @transform_7(%arg0: i32) -> (i32, i32) {
    %c0_i32 = arith.constant 0 : i32
    %c0_i32_0 = arith.constant 0 : i32
    %c0_i32_1 = arith.constant 0 : i32
    return %c0_i32, %c0_i32_0 : i32, i32
  }
  func.func @transform_8(%arg0: i32) -> (i32, i32) {
    %c0_i32 = arith.constant 0 : i32
    %c0_i32_0 = arith.constant 0 : i32
    %c0_i32_1 = arith.constant 0 : i32
    return %c0_i32, %c0_i32_0 : i32, i32
  }
  func.func @transform_9(%arg0: i32) -> (i32, i32, i32) {
    %c0_i32 = arith.constant 0 : i32
    %c0_i32_0 = arith.constant 0 : i32
    %c0_i32_1 = arith.constant 0 : i32
    return %arg0, %c0_i32, %c0_i32_0 : i32, i32, i32
  }
}

</mosaic_0001>

<bundles_post_ra>
// kernel: neg.1
= control target key start
LH: loop header
LB: loop body
LE: loop exit
PB: predicated region body
PF: predicated region fallthrough
CT: control target
= control target key end

     0   :  { %s72_s0 = inlined_call_operand.vmem [shape: f32[32,32], index: 0, kind: input, shape index: {}]   ;;  %s73_s1 = inlined_call_operand.vmem [shape: f32[32,32], index: 1, kind: output, shape index: {}]  }
   0x1   :  { %v2_v0 = vld [vmem:[%s72_s0] sm:$0xff]  ;;  %v32_v1 = vld [vmem:[%s72_s0 + $0x8] sm:$0xff]  ;;  %v34_v2 = vld [vmem:[%s72_s0 + $0x10] sm:$0xff] }
   0x2   :  { %v5_v3 = vxor.u32 2147483648, %v2_v0  ;;  %v12_v4 = vxor.u32 2147483648, %v32_v1  ;;  %v20_v5 = vxor.u32 2147483648, %v34_v2  ;;  %v36_v6 = vld [vmem:[%s72_s0 + $0x18] sm:$0xff] }
   0x3   :  { %v28_v7 = vxor.u32 2147483648, %v36_v6 }
   0x4   :  { %7 = vst [vmem:[%s73_s1] sm:$0xff] %v5_v3 }
   0x5   :  { %33 = vst [vmem:[%s73_s1 + $0x8] sm:$0xff] %v12_v4 }
   0x6   :  { %35 = vst [vmem:[%s73_s1 + $0x10] sm:$0xff] %v20_v5 }
   0x7   :  { %37 = vst [vmem:[%s73_s1 + $0x18] sm:$0xff] %v28_v7 }

// kernel: tile.14
= control target key start
LH: loop header
LB: loop body
LE: loop exit
PB: predicated region body
PF: predicated region fallthrough
CT: control target
= control target key end

     0   :  { %vm40_vm0 = vcmask 1047556   ;;  %s116_s24 = smov 64   ;;  %s117_s25 = smov 32   ;;  %vm42_vm1 = vcmask 261120   ;;  %vm57_vm2 = vcmask 1048320   ;;  %vm74_vm3 = vcmask 785920   ;;  %s183_s0 = inlined_call_operand.vmem [shape: f32[9,4,32], index: 0, kind: input, shape index: {}]   ;;  %s184_s1 = inlined_call_operand.vmem [shape: f32[9,128], index: 1, kind: output, shape index: {}]  }
   0x1   :  { %v101_v0 = vld [vmem:[%s183_s0 + $0x1c] sm:$0xf]  ;;  %v102_v1 = vld [vmem:[%s183_s0 + $0x18] sm:$0xf]  ;;  %v103_v2 = vld [vmem:[%s183_s0 + $0x14] sm:$0xf] }
   0x2   :  { %11 = vst [vmem:[#allocation0 + $0x38] sm:$0xf] %v101_v0  ;;  %v104_v3 = vld [vmem:[%s183_s0 + $0x10] sm:$0xf]  ;;  %v105_v4 = vld [vmem:[%s183_s0 + $0xc] sm:$0xf] }
   0x3   :  { %15 = vst [vmem:[#allocation0 + $0x30] sm:$0xf] %v102_v1  ;;  %v106_v5 = vld [vmem:[%s183_s0 + $0x8] sm:$0xf]  ;;  %v107_v6 = vld [vmem:[%s183_s0 + $0x4] sm:$0xf] }
   0x4   :  { %19 = vst [vmem:[#allocation0 + $0x28] sm:$0xf] %v103_v2  ;;  %v36_v7 = vld [vmem:[%s183_s0] sm:$0xf]  ;;  %vm91_vm4 = vcmask 523520  }
   0x5   :  { %23 = vst [vmem:[#allocation0 + $0x20] sm:$0xf] %v104_v3  ;;  %v100_v8 = vld [vmem:[%s183_s0 + $0x20] sm:$0xf]  ;;  %s115_s0 = smov 96  }
   0x6   :  { %27 = vst [vmem:[#allocation0 + $0x18] sm:$0xf] %v105_v4 }
   0x7   :  { %31 = vst [vmem:[#allocation0 + $0x10] sm:$0xf] %v106_v5 }
   0x8   :  { %35 = vst [vmem:[#allocation0 + $0x8] sm:$0xf] %v107_v6 }
   0x9   :  { %37 = vst [vmem:[#allocation0] sm:$0xf] %v36_v7 }
   0xa   :  { %7 = vst [vmem:[#allocation0 + $0x40] sm:$0xf] %v100_v8 }
   0xc   :  { %v52_v9 = vld [vmem:[#allocation0 + $0x3] ss:$8 sm:$0xf0]   ;;  %v69_v10 = vld [vmem:[#allocation0 + $0x2] ss:$8 sm:$0xf0]  }
   0xd   :  { %v86_v11 = vld [vmem:[#allocation0 + $0x1] ss:$8 sm:$0xf0]   ;;  %v39_v22 = vld [vmem:[#allocation0] ss:$8 sm:$0xf0]  }
  0x10   :  { %v50_v12 = vld [vmem:[#allocation0 + $0x3] ss:$8 sm:$0xf]   ;;  %v67_v13 = vld [vmem:[#allocation0 + $0x2] ss:$8 sm:$0xf]  }
  0x11   :  { %v54_v14 = vsel %vm40_vm0, %v52_v9, %v50_v12  ;;  %v71_v15 = vsel %vm40_vm0, %v69_v10, %v67_v13  ;;  %v84_v16 = vld [vmem:[#allocation0 + $0x1] ss:$8 sm:$0xf]   ;;  %v60_v18 = vld [vmem:[#allocation0 + $0x43] sm:$0x1]  }
  0x12   :  { %55 = vrot.lane.b32.xlu0 %v54_v14, %s115_s0  ;;  %72 = vrot.lane.b32.xlu1 %v71_v15, %s116_s24  ;;  %v88_v17 = vsel %vm40_vm0, %v86_v11, %v84_v16  ;;  %v77_v19 = vld [vmem:[#allocation0 + $0x42] sm:$0x1]   ;;  %v94_v20 = vld [vmem:[#allocation0 + $0x41] sm:$0x1]   ;;  %v45_v24 = vld [vmem:[#allocation0 + $0x40] sm:$0x1]  }
  0x13   :  { %89 = vrot.lane.b32.xlu2 %v88_v17, %s117_s25  ;;  %v38_v21 = vld [vmem:[#allocation0] ss:$8 sm:$0xf]   ;;  %108 = vst.msk [vmem:[%s184_s1 + $0x8] sm:$0x1] %vm42_vm1, %v45_v24  }
  0x14   :  { %v41_v23 = vsel %vm40_vm0, %v39_v22, %v38_v21 }
  0x15   :  { %43 = vst.msk [vmem:[%s184_s1] sm:$0xff] %vm42_vm1, %v41_v23  }
  0x1a   :  { %61 = vrot.lane.b32.xlu0 %v60_v18, %s115_s0  ;;  %78 = vrot.lane.b32.xlu1 %v77_v19, %s116_s24 }
  0x1b   :  { %95 = vrot.lane.b32.xlu2 %v94_v20, %s117_s25 }
  0x6d   :  { %v90_v25 = vpop.permute.xlu2 %89  }
  0x75   :  { %v96_v26 = vpop.permute.xlu2 %95  }
  0x84   :  { %v56_v27 = vpop.permute.xlu0 %55   ;;  %v73_v28 = vpop.permute.xlu1 %72  }
  0x85   :  { %58 = vst.msk [vmem:[%s184_s1] sm:$0xff] %vm57_vm2, %v56_v27  }
  0x86   :  { %75 = vst.msk [vmem:[%s184_s1] sm:$0xff] %vm74_vm3, %v73_v28  }
  0x87   :  { %92 = vst.msk [vmem:[%s184_s1] sm:$0xff] %vm91_vm4, %v90_v25  }
  0x8c   :  { %v62_v29 = vpop.permute.xlu0 %61   ;;  %v79_v30 = vpop.permute.xlu1 %78  }
  0x8d   :  { %109 = vst.msk [vmem:[%s184_s1 + $0x8] sm:$0x1] %vm57_vm2, %v62_v29  }
  0x8e   :  { %110 = vst.msk [vmem:[%s184_s1 + $0x8] sm:$0x1] %vm74_vm3, %v79_v30  }
  0x8f   :  { %111 = vst.msk [vmem:[%s184_s1 + $0x8] sm:$0x1] %vm91_vm4, %v96_v26  }

// kernel: cmm_forward.1
= control target key start
LH: loop header
LB: loop body
LE: loop exit
PB: predicated region body
PF: predicated region fallthrough
CT: control target
= control target key end

     0   :  { %s4989_s30 = smov 0   ;;  %s8382_s0 = inlined_call_operand.vmem [shape: f32[2,64,128], index: 0, kind: input, shape index: {}]   ;;  %s8383_s1 = inlined_call_operand.vmem [shape: f32[128,128], index: 1, kind: input, shape index: {}]   ;;  %s8384_s2 = inlined_call_operand.vmem [shape: f32[128,128], index: 2, kind: input, shape index: {}]   ;;  %s8385_s3 = inlined_call_operand.vmem [shape: f32[128,128], index: 3, kind: input, shape index: {}]   ;;  %s8386_s4 = inlined_call_operand.vmem [shape: f32[9,128], index: 4, kind: input, shape index: {}]   ;;  %s8387_s5 = inlined_call_operand.vmem [shape: f32[9,128], index: 5, kind: input, shape index: {}]   ;;  %s8388_s6 = inlined_call_operand.vmem [shape: f32[128,128], index: 6, kind: input, shape index: {}]   ;;  %s8389_s7 = inlined_call_operand.vmem [shape: f32[128,128], index: 7, kind: input, shape index: {}]   ;;  %s8390_s8 = inlined_call_operand.vmem [shape: f32[128,128], index: 8, kind: input, shape index: {}]   ;;  %s8391_s9 = inlined_call_operand.vmem [shape: f32[2,64,128], index: 9, kind: output, shape index: {}]  }
   0x1 LB: > { %s4810_s10 = sadd.s32 4294967295, %s4935_s30   ;;  %p4814_p0 = scmp.ge.s32.totalorder %s4935_s30, 1  ;;  %s4935_s30 = sphi %s4989_s30, %s19_s30  }
   0x2   : > { %p287_p1 = scmp.lt.s32.totalorder %s4935_s30, 3 }
   0x4   : > { %p288_p2 = pnand %p4814_p0, %p287_p1 }
   0x6   : > { %291 = sbr.rel (%p288_p2) target bundleno = 1018 (0x3fa), region = 56 }
   0xb   : > { %v356_v0 = vld [vmem:[%s8383_s1 + $0x78] sm:$0xff]  ;;  %v355_v1 = vld [vmem:[%s8383_s1 + $0x70] sm:$0xff]  ;;  %v354_v2 = vld [vmem:[%s8383_s1 + $0x68] sm:$0xff]  ;;  %p5008_p3 = scmp.lt.s32.totalorder %s4810_s10, 1 }
   0xc   : > { %v5012_v3 = vand.u32 4294901760, %v356_v0  ;;  %v5014_v4 = vand.u32 4294901760, %v355_v1  ;;  %v5016_v5 = vand.u32 4294901760, %v354_v2  ;;  %v353_v6 = vld [vmem:[%s8383_s1 + $0x60] sm:$0xff]  ;;  %v352_v7 = vld [vmem:[%s8383_s1 + $0x58] sm:$0xff]  ;;  %v351_v8 = vld [vmem:[%s8383_s1 + $0x50] sm:$0xff] }
   0xd   : > { %v5027_v9 = vand.u32 4294901760, %v353_v6  ;;  %v5029_v10 = vand.u32 4294901760, %v352_v7  ;;  %v5031_v11 = vand.u32 4294901760, %v351_v8  ;;  %v350_v12 = vld [vmem:[%s8383_s1 + $0x48] sm:$0xff]  ;;  %v349_v13 = vld [vmem:[%s8383_s1 + $0x40] sm:$0xff]  ;;  %v348_v18 = vld [vmem:[%s8383_s1 + $0x38] sm:$0xff] }
   0xe   : > { %358 = vmatpush.msra.mxu0 %v5012_v3  ;;  %673 = vmatpush.msra.mxu3 %v5012_v3  ;;  %v5042_v14 = vsub.f32 %v356_v0, %v5012_v3  ;;  %v5045_v15 = vsub.f32 %v355_v1, %v5014_v4  ;;  %v5048_v16 = vsub.f32 %v354_v2, %v5016_v5  ;;  %v5050_v17 = vand.u32 4294901760, %v350_v12  ;;  %s8977_s10 = smov (!%p5008_p3, %s4810_s10), 1  ;;  %v347_v29 = vld [vmem:[%s8383_s1 + $0x30] sm:$0xff]  ;;  %v346_v34 = vld [vmem:[%s8383_s1 + $0x28] sm:$0xff]  ;;  %v345_v42 = vld [vmem:[%s8383_s1 + $0x20] sm:$0xff] }
   0xf   : > { %v5056_v19 = vsub.f32 %v353_v6, %v5027_v9  ;;  %v5059_v20 = vsub.f32 %v352_v7, %v5029_v10  ;;  %v5062_v21 = vsub.f32 %v351_v8, %v5031_v11  ;;  %v5075_v25 = vand.u32 4294901760, %v349_v13  ;;  %s4829_s15 = sshll.u32 %s8977_s10, 6  ;;  %v344_v49 = vld [vmem:[%s8383_s1 + $0x18] sm:$0xff]  ;;  %v343_v53 = vld [vmem:[%s8383_s1 + $0x10] sm:$0xff]  ;;  %v342_v0 = vld [vmem:[%s8383_s1 + $0x8] sm:$0xff] }
  0x10   : > { %360 = vmatpush.msra.mxu0 %v5014_v4  ;;  %585 = vmatpush.msra.mxu2 %v5042_v14  ;;  %v8408_v22 = vand.u32 4294901760, %v5042_v14  ;;  %v8407_v23 = vand.u32 4294901760, %v5045_v15  ;;  %v8405_v24 = vand.u32 4294901760, %v5048_v16  ;;  %v5080_v27 = vsub.f32 %v350_v12, %v5050_v17  ;;  %s5134_s20 = scalar_lea.vmem %s8382_s0, %s4829_s15  ;;  %v341_v12 = vld [vmem:[%s8383_s1] sm:$0xff]  ;;  %s8333_s11 = scalar_lea.vmem %s8391_s9, %s4829_s15 }
  0x11   : > { %675 = vmatpush.msra.mxu3 %v5014_v4  ;;  %v8403_v26 = vand.u32 4294901760, %v5056_v19  ;;  %v5082_v28 = vand.u32 4294901760, %v348_v18  ;;  %v8401_v33 = vand.u32 4294901760, %v5059_v20  ;;  %v8400_v36 = vand.u32 4294901760, %v5062_v21  ;;  %v333_v54 = vld [vmem:[%s5134_s20] sm:$0xff] }
  0x12   : > { %362 = vmatpush.msra.mxu0 %v5016_v5  ;;  %588 = vmatpush.msra.mxu2 %v5045_v15  ;;  %v457_v30 = vsub.f32 %v5042_v14, %v8408_v22  ;;  %v463_v31 = vsub.f32 %v5045_v15, %v8407_v23  ;;  %v469_v32 = vsub.f32 %v5048_v16, %v8405_v24  ;;  %v5113_v40 = vand.u32 4294901760, %v347_v29 }
  0x13   : > { %677 = vmatpush.msra.mxu3 %v5016_v5  ;;  %v475_v35 = vsub.f32 %v5056_v19, %v8403_v26  ;;  %v5111_v39 = vsub.f32 %v349_v13, %v5075_v25  ;;  %v481_v43 = vsub.f32 %v5059_v20, %v8401_v33  ;;  %v5124_v44 = vsub.f32 %v348_v18, %v5082_v28  ;;  %v334_v18 = vld [vmem:[%s5134_s20 + $0x8] sm:$0xff] }
  0x14   : > { %364 = vmatpush.msra.mxu0 %v5027_v9  ;;  %591 = vmatpush.msra.mxu2 %v5048_v16  ;;  %v458_v37 = vand.u32 4294901760, %v457_v30  ;;  %v464_v38 = vand.u32 4294901760, %v463_v31  ;;  %v470_v41 = vand.u32 4294901760, %v469_v32  ;;  %v5126_v45 = vand.u32 4294901760, %v346_v34 }
  0x15   : > { %679 = vmatpush.msra.mxu3 %v5027_v9  ;;  %v8399_v46 = vand.u32 4294901760, %v5080_v27  ;;  %v476_v47 = vand.u32 4294901760, %v475_v35  ;;  %v487_v48 = vsub.f32 %v5062_v21, %v8400_v36  ;;  %v5146_v50 = vsub.f32 %v347_v29, %v5113_v40 }
  0x16   : > { %366 = vmatpush.msra.mxu0 %v5029_v10  ;;  %459 = vmatpush.msra.mxu1 %v458_v37  ;;  %v5148_v51 = vand.u32 4294901760, %v345_v42  ;;  %v8398_v52 = vand.u32 4294901760, %v5111_v39  ;;  %v482_v55 = vand.u32 4294901760, %v481_v43  ;;  %v5162_v57 = vsub.f32 %v346_v34, %v5126_v45 }
  0x17   : > { %594 = vmatpush.msra.mxu2 %v5056_v19  ;;  %681 = vmatpush.msra.mxu3 %v5029_v10  ;;  %v493_v56 = vsub.f32 %v5080_v27, %v8399_v46  ;;  %v8397_v58 = vand.u32 4294901760, %v5124_v44  ;;  %v488_v59 = vand.u32 4294901760, %v487_v48  ;;  %v5167_v60 = vand.u32 4294901760, %v344_v49 }
  0x18   : > { %368 = vmatpush.msra.mxu0 %v5031_v11  ;;  %465 = vmatpush.msra.mxu1 %v464_v38  ;;  %v499_v61 = vsub.f32 %v5111_v39, %v8398_v52  ;;  %v5174_v62 = vsub.f32 %v345_v42, %v5148_v51  ;;  %v8395_v63 = vand.u32 4294901760, %v5146_v50  ;;  %v5180_v1 = vand.u32 4294901760, %v333_v54 }
  0x19   : > { %597 = vmatpush.msra.mxu2 %v5059_v20  ;;  %683 = vmatpush.msra.mxu3 %v5031_v11  ;;  %v5184_v2 = vand.u32 4294901760, %v343_v53  ;;  %v494_v6 = vand.u32 4294901760, %v493_v56  ;;  %v505_v7 = vsub.f32 %v5124_v44, %v8397_v58  ;;  %v8394_v8 = vand.u32 4294901760, %v5162_v57 }
  0x1a   : > { %370 = vmatpush.msra.mxu0 %v5050_v17  ;;  %471 = vmatpush.msra.mxu1 %v470_v41  ;;  %8588 = vst [vmem:[#allocation3_spill] sm:$0xff] %v5180_v1  ;;  %v5195_v13 = vsub.f32 %v333_v54, %v5180_v1  ;;  %v5201_v29 = vsub.f32 %v344_v49, %v5167_v60  ;;  %v5203_v30 = vand.u32 4294901760, %v342_v0  ;;  %v500_v31 = vand.u32 4294901760, %v499_v61 }
  0x1b   : > { %600 = vmatpush.msra.mxu2 %v5062_v21  ;;  %685 = vmatpush.msra.mxu3 %v5050_v17  ;;  %v511_v32 = vsub.f32 %v5146_v50, %v8395_v63  ;;  %v8393_v34 = vand.u32 4294901760, %v5174_v62  ;;  %v5213_v35 = vsub.f32 %v343_v53, %v5184_v2  ;;  %v5215_v37 = vand.u32 4294901760, %v341_v12 }
  0x1c   : > { %372 = vmatpush.msra.mxu0 %v5075_v25  ;;  %477 = vmatpush.msra.mxu1 %v476_v47  ;;  %8589 = vst [vmem:[#allocation4_spill] sm:$0xff] %v5195_v13  ;;  %v5217_v38 = vand.u32 4294901760, %v334_v18  ;;  %v506_v41 = vand.u32 4294901760, %v505_v7  ;;  %v517_v42 = vsub.f32 %v5162_v57, %v8394_v8  ;;  %v5224_v43 = vand.u32 4294901760, %v5195_v13 }
  0x1d   : > { %603 = vmatpush.msra.mxu2 %v5080_v27  ;;  %687 = vmatpush.msra.mxu3 %v5075_v25  ;;  %8590 = vst [vmem:[#allocation5_spill] sm:$0xff] %v5215_v37  ;;  %v5229_v47 = vsub.f32 %v342_v0, %v5203_v30  ;;  %v8392_v48 = vand.u32 4294901760, %v5201_v29  ;;  %v512_v49 = vand.u32 4294901760, %v511_v32  ;;  %v523_v53 = vsub.f32 %v5174_v62, %v8393_v34 }
  0x1e   : > { %374 = vmatpush.msra.mxu0 %v5082_v28  ;;  %483 = vmatpush.msra.mxu1 %v482_v55  ;;  %8591 = vst [vmem:[#allocation6_spill] sm:$0xff] %v5217_v38  ;;  %v5239_v54 = vsub.f32 %v341_v12, %v5215_v37  ;;  %v8396_v55 = vand.u32 4294901760, %v5213_v35  ;;  %v5243_v56 = vsub.f32 %v334_v18, %v5217_v38  ;;  %v518_v61 = vand.u32 4294901760, %v517_v42 }
  0x1f   : > { %606 = vmatpush.msra.mxu2 %v5111_v39  ;;  %689 = vmatpush.msra.mxu3 %v5082_v28  ;;  %8592 = vst [vmem:[#allocation7_spill] sm:$0xff] %v5224_v43  ;;  %v392_v0 = vsub.f32 %v5195_v13, %v5224_v43  ;;  %v529_v12 = vsub.f32 %v5201_v29, %v8392_v48  ;;  %v8402_v18 = vand.u32 4294901760, %v5229_v47  ;;  %v524_v32 = vand.u32 4294901760, %v523_v53  ;;  %v928_v53 = vld [vmem:[%s8384_s2 + $0x68] sm:$0xff] }
  0x20   : > { %376 = vmatpush.msra.mxu0 %v5113_v40  ;;  %489 = vmatpush.msra.mxu1 %v488_v59  ;;  %8593 = vst [vmem:[#allocation8_spill] sm:$0xff] %v5243_v56  ;;  %v930_v59 = vld [vmem:[%s8384_s2 + $0x78] sm:$0xff]  ;;  %v535_v48 = vsub.f32 %v5213_v35, %v8396_v55  ;;  %v8406_v34 = vand.u32 4294901760, %v5239_v54  ;;  %v5276_v8 = vand.u32 4294901760, %v5243_v56  ;;  %v5290_v58 = vand.u32 4294901760, %v928_v53 }
  0x21   : > { %609 = vmatpush.msra.mxu2 %v5124_v44  ;;  %691 = vmatpush.msra.mxu3 %v5113_v40  ;;  %v5252_v7 = vand.u32 4294901760, %v930_v59  ;;  %v530_v52 = vand.u32 4294901760, %v529_v12  ;;  %v541_v46 = vsub.f32 %v5229_v47, %v8402_v18 }
  0x22   : > { %378 = vmatpush.msra.mxu0 %v5126_v45  ;;  %495 = vmatpush.msra.mxu1 %v494_v6  ;;  %v335_v6 = vld [vmem:[%s5134_s20 + $0x10] sm:$0xff]  ;;  %8595 = vst [vmem:[#allocation10_spill] sm:$0xff] %v5276_v8  ;;  %v5307_v12 = vsub.f32 %v928_v53, %v5290_v58  ;;  %v536_v18 = vand.u32 4294901760, %v535_v48  ;;  %v400_v26 = vsub.f32 %v5243_v56, %v5276_v8  ;;  %v926_v53 = vld [vmem:[%s8384_s2 + $0x58] sm:$0xff] }
  0x23   : > { %612 = vmatpush.msra.mxu2 %v5146_v50  ;;  %693 = vmatpush.msra.mxu3 %v5126_v45 }
  0x24   : > { %380 = vmatpush.msra.mxu0 %v5148_v51  ;;  %501 = vmatpush.msra.mxu1 %v500_v31  ;;  %v929_v31 = vld [vmem:[%s8384_s2 + $0x70] sm:$0xff] }
  0x25   : > { %615 = vmatpush.msra.mxu2 %v5162_v57  ;;  %695 = vmatpush.msra.mxu3 %v5148_v51  ;;  %v5267_v42 = vand.u32 4294901760, %v929_v31 }
  0x26   : > { %382 = vmatpush.msra.mxu0 %v5167_v60  ;;  %507 = vmatpush.msra.mxu1 %v506_v41  ;;  %v5265_v41 = vsub.f32 %v930_v59, %v5252_v7  ;;  %v5284_v59 = vand.u32 4294901760, %v392_v0  ;;  %v336_v0 = vld [vmem:[%s5134_s20 + $0x18] sm:$0xff] }
  0x27   : > { %618 = vmatpush.msra.mxu2 %v5174_v62  ;;  %697 = vmatpush.msra.mxu3 %v5167_v60  ;;  %v5288_v55 = vsub.f32 %v929_v31, %v5267_v42  ;;  %v5334_v22 = vand.u32 4294901760, %v336_v0 }
  0x28   : > { %384 = vmatpush.msra.mxu0 %v5184_v2  ;;  %513 = vmatpush.msra.mxu1 %v512_v49  ;;  %8594 = vst [vmem:[#allocation9_spill] sm:$0xff] %v5265_v41  ;;  %v5278_v49 = vand.u32 4294901760, %v335_v6  ;;  %v8404_v63 = vand.u32 4294901760, %v5265_v41 }
  0x29   : > { %621 = vmatpush.msra.mxu2 %v5201_v29  ;;  %699 = vmatpush.msra.mxu3 %v5184_v2  ;;  %8597 = vst [vmem:[#allocation12_spill] sm:$0xff] %v5284_v59  ;;  %v8411_v36 = vand.u32 4294901760, %v5288_v55 }
  0x2a   : > { %8596 = vst [vmem:[#allocation11_spill] sm:$0xff] %v5278_v49  ;;  %386 = vmatpush.msra.mxu0 %v5203_v30  ;;  %519 = vmatpush.msra.mxu1 %v518_v61  ;;  %v927_v61 = vld [vmem:[%s8384_s2 + $0x60] sm:$0xff]  ;;  %v1031_v31 = vsub.f32 %v5265_v41, %v8404_v63  ;;  %v5319_v63 = vsub.f32 %v335_v6, %v5278_v49  ;;  %v542_v6 = vand.u32 4294901760, %v541_v46  ;;  %v5336_v41 = vand.u32 4294901760, %v926_v53 }
  0x2b   : > { %8598 = vst [vmem:[#allocation13_spill] sm:$0xff] %v5288_v55  ;;  %624 = vmatpush.msra.mxu2 %v5213_v35  ;;  %701 = vmatpush.msra.mxu3 %v5203_v30  ;;  %v5309_v33 = vand.u32 4294901760, %v927_v61  ;;  %v1037_v48 = vsub.f32 %v5288_v55, %v8411_v36  ;;  %v8601_v36 = vand.u32 4294901760, %v5042_v14  ;;  %v5350_v55 = vand.u32 4294901760, %v400_v26 }
  0x2c   : > { %388 = vmatpush.msra.mxu0 %v5215_v37  ;;  %525 = vmatpush.msra.mxu1 %v524_v32  ;;  %v547_v32 = vsub.f32 %v5239_v54, %v8406_v34  ;;  %8599 = vst [vmem:[#allocation14_spill] sm:$0xff] %v5319_v63  ;;  %v1032_v24 = vand.u32 4294901760, %v1031_v31  ;;  %v925_v31 = vld [vmem:[%s8384_s2 + $0x50] sm:$0xff]  ;;  %v5356_v14 = vsub.f32 %v926_v53, %v5336_v41 }
  0x2d   : > { %627 = vmatpush.msra.mxu2 %v5229_v47  ;;  %703 = vmatpush.msra.mxu3 %v5215_v37  ;;  %v5331_v23 = vsub.f32 %v927_v61, %v5309_v33  ;;  %8600 = vst [vmem:[#allocation15_spill] sm:$0xff] %v5334_v22  ;;  %v1038_v34 = vand.u32 4294901760, %v1037_v48  ;;  %v8602_v61 = vand.u32 4294901760, %v5307_v12  ;;  %v5353_v37 = vand.u32 4294901760, %v5319_v63 }
  0x2e   : > { %394 = vmatmul.f32.vlgmr.msra.gmra.mxu0 %v5284_v59  ;;  %707 = vmatmul.f32.vlgmr.msra.gmra.mxu3 %v5224_v43  ;;  %v5348_v43 = vand.u32 4294901760, %v925_v31  ;;  %v548_v59 = vand.u32 4294901760, %v547_v32  ;;  %8603 = vst [vmem:[#allocation16_spill] sm:$0xff] %v5350_v55  ;;  %v8605_v48 = vand.u32 4294901760, %v5045_v15  ;;  %v8419_v53 = vand.u32 4294901760, %v5356_v14  ;;  %v923_v15 = vld [vmem:[%s8384_s2 + $0x40] sm:$0xff] }
  0x2f   : > { %531 = vmatpush.msra.mxu1 %v530_v52  ;;  %630 = vmatpush.msra.mxu2 %v5239_v54  ;;  %v1043_v52 = vsub.f32 %v5307_v12, %v8602_v61  ;;  %v8420_v46 = vand.u32 4294901760, %v5331_v23  ;;  %8604 = vst [vmem:[#allocation17_spill] sm:$0xff] %v5353_v37  ;;  %v8606_v61 = vand.u32 4294901760, %v5048_v16  ;;  %v922_v16 = vld [vmem:[%s8384_s2 + $0x38] sm:$0xff] }
  0x30   : > { %633 = vmatmul.f32.vlgmr.msra.gmra.mxu2 %v5195_v13  ;;  %756 = vmatpush.msrb.mxu0 %v8601_v36  ;;  %v924_v36 = vld [vmem:[%s8384_s2 + $0x48] sm:$0xff]  ;;  %v5368_v32 = vsub.f32 %v925_v31, %v5348_v43  ;;  %v5382_v31 = vand.u32 4294901760, %v923_v15 }
  0x31   : > { %537 = vmatpush.msra.mxu1 %v536_v18  ;;  %1033 = vmatpush.msrb.mxu3 %v1032_v24  ;;  %v1044_v18 = vand.u32 4294901760, %v1043_v52  ;;  %v1049_v26 = vsub.f32 %v5331_v23, %v8420_v46  ;;  %v5370_v24 = vand.u32 4294901760, %v924_v36  ;;  %v921_v46 = vld [vmem:[%s8384_s2 + $0x30] sm:$0xff] }
  0x32   : > { %760 = vmatpush.msrb.mxu0 %v8605_v48  ;;  %932 = vmatpush.msrb.mxu2 %v5252_v7  ;;  %v8608_v48 = vand.u32 4294901760, %v5056_v19  ;;  %v5421_v13 = vand.u32 4294901760, %v921_v46  ;;  %v920_v19 = vld [vmem:[%s8384_s2 + $0x28] sm:$0xff] }
  0x33   : > { %543 = vmatpush.msra.mxu1 %v542_v6  ;;  %1039 = vmatpush.msrb.mxu3 %v1038_v34  ;;  %v5380_v52 = vsub.f32 %v924_v36, %v5370_v24  ;;  %v5385_v34 = vsub.f32 %v336_v0, %v5334_v22  ;;  %v1055_v6 = vsub.f32 %v5356_v14, %v8419_v53  ;;  %v337_v0 = vld [vmem:[%s5134_s20 + $0x20] sm:$0xff]  ;;  %v1050_v36 = vand.u32 4294901760, %v1049_v26 }
  0x34   : > { %764 = vmatpush.msrb.mxu0 %v8606_v61  ;;  %934 = vmatpush.msrb.mxu2 %v5267_v42  ;;  %v5402_v61 = vand.u32 4294901760, %v922_v16 }
  0x35   : > { %549 = vmatpush.msra.mxu1 %v548_v59  ;;  %8607 = vst [vmem:[#allocation18_spill] sm:$0xff] %v5385_v34  ;;  %1045 = vmatpush.msrb.mxu3 %v1044_v18  ;;  %v408_v59 = vsub.f32 %v5319_v63, %v5353_v37  ;;  %v5400_v18 = vsub.f32 %v923_v15, %v5382_v31  ;;  %v1056_v26 = vand.u32 4294901760, %v1055_v6  ;;  %v5414_v15 = vand.u32 4294901760, %v337_v0 }
  0x36   : > { %402 = vmatmul.f32.gmra.mxu0 %v5350_v55  ;;  %551 = vmatmul.f32.vlgmr.msra.gmra.mxu1 %v5180_v1  ;;  %v5431_v6 = vand.u32 4294901760, %v5385_v34 }
  0x37   : > { %713 = vmatmul.f32.gmra.mxu3 %v5276_v8  ;;  %851 = vmatpush.msrb.mxu1 %v5012_v3  ;;  %8609 = vst [vmem:[#allocation19_spill] sm:$0xff] %v5414_v15  ;;  %v8610_v3 = vand.u32 4294901760, %v5368_v32 }
  0x38   : > { %638 = vmatmul.f32.gmra.mxu2 %v5243_v56  ;;  %768 = vmatpush.msrb.mxu0 %v8608_v48  ;;  %v5426_v48 = vand.u32 4294901760, %v408_v59  ;;  %8613 = vst [vmem:[#allocation21_spill] sm:$0xff] %v5431_v6  ;;  %v5434_v56 = vsub.f32 %v922_v16, %v5402_v61  ;;  %v5441_v59 = vand.u32 4294901760, %v920_v19  ;;  %v5449_v16 = vsub.f32 %v921_v46, %v5421_v13 }
  0x39   : > { %853 = vmatpush.msrb.mxu1 %v5014_v4  ;;  %936 = vmatpush.msrb.mxu2 %v5290_v58  ;;  %v1061_v53 = vsub.f32 %v5368_v32, %v8610_v3  ;;  %v8612_v4 = vand.u32 4294901760, %v5059_v20  ;;  %v8614_v3 = vand.u32 4294901760, %v5380_v52  ;;  %v919_v20 = vld [vmem:[%s8384_s2 + $0x20] sm:$0xff] }
  0x3a   : > { %8611 = vst [vmem:[#allocation20_spill] sm:$0xff] %v5426_v48  ;;  %1051 = vmatpush.msrb.mxu3 %v1050_v36 }
  0x3b   : > { %772 = vmatpush.msrb.mxu0 %v8612_v4  ;;  %855 = vmatpush.msrb.mxu1 %v5016_v5  ;;  %v1067_v8 = vsub.f32 %v5380_v52, %v8614_v3  ;;  %v8615_v4 = vand.u32 4294901760, %v5062_v21  ;;  %v5453_v5 = vsub.f32 %v337_v0, %v5414_v15  ;;  %v1062_v36 = vand.u32 4294901760, %v1061_v53  ;;  %v918_v21 = vld [vmem:[%s8384_s2 + $0x18] sm:$0xff]  ;;  %v338_v53 = vld [vmem:[%s5134_s20 + $0x28] sm:$0xff] }
  0x3c   : > { %938 = vmatpush.msrb.mxu2 %v5309_v33  ;;  %1057 = vmatpush.msrb.mxu3 %v1056_v26  ;;  %v8617_v3 = vand.u32 4294901760, %v5400_v18  ;;  %v5467_v0 = vand.u32 4294901760, %v919_v20 }
  0x3d   : > { %776 = vmatpush.msrb.mxu0 %v8615_v4  ;;  %857 = vmatpush.msrb.mxu1 %v5027_v9  ;;  %8616 = vst [vmem:[#allocation22_spill] sm:$0xff] %v5453_v5  ;;  %v416_v9 = vsub.f32 %v5385_v34, %v5431_v6  ;;  %v1068_v26 = vand.u32 4294901760, %v1067_v8  ;;  %v5473_v4 = vsub.f32 %v920_v19, %v5441_v59  ;;  %v5483_v46 = vand.u32 4294901760, %v5453_v5  ;;  %v917_v8 = vld [vmem:[%s8384_s2 + $0x10] sm:$0xff] }
  0x3e   : > { %940 = vmatpush.msrb.mxu2 %v5336_v41  ;;  %v1073_v55 = vsub.f32 %v5400_v18, %v8617_v3  ;;  %410 = vmatmul.f32.gmra.mxu0 %v5426_v48  ;;  %v8618_v3 = vand.u32 4294901760, %v5080_v27  ;;  %v8620_v27 = vand.u32 4294901760, %v5111_v39  ;;  %v916_v39 = vld [vmem:[%s8384_s2 + $0x8] sm:$0xff] }
  0x3f   : > { %555 = vmatmul.f32.gmra.mxu1 %v5217_v38  ;;  %719 = vmatmul.f32.gmra.mxu3 %v5353_v37  ;;  %v5479_v38 = vand.u32 4294901760, %v918_v21  ;;  %v5488_v19 = vand.u32 4294901760, %v416_v9  ;;  %v8623_v9 = vand.u32 4294901760, %v5124_v44  ;;  %v915_v44 = vld [vmem:[%s8384_s2] sm:$0xff] }
  0x40   : > { %859 = vmatpush.msrb.mxu1 %v5029_v10  ;;  %643 = vmatmul.f32.gmra.mxu2 %v5319_v63  ;;  %v1074_v10 = vand.u32 4294901760, %v1073_v55  ;;  %v5529_v55 = vand.u32 4294901760, %v916_v39  ;;  %v8626_v63 = vand.u32 4294901760, %v5146_v50  ;;  %v8628_v50 = vand.u32 4294901760, %v5162_v57 }
  0x41   : > { %780 = vmatpush.msrb.mxu0 %v8618_v3  ;;  %1063 = vmatpush.msrb.mxu3 %v1062_v36  ;;  %8619 = vst [vmem:[#allocation23_spill] sm:$0xff] %v5488_v19  ;;  %v5492_v3 = vand.u32 4294901760, %v338_v53  ;;  %v5499_v36 = vsub.f32 %v919_v20, %v5467_v0 }
  0x42   : > { %861 = vmatpush.msrb.mxu1 %v5031_v11  ;;  %942 = vmatpush.msrb.mxu2 %v5348_v43  ;;  %v8622_v11 = vand.u32 4294901760, %v5434_v56 }
  0x43   : > { %784 = vmatpush.msrb.mxu0 %v8620_v27  ;;  %8621 = vst [vmem:[#allocation24_spill] sm:$0xff] %v5492_v3  ;;  %1069 = vmatpush.msrb.mxu3 %v1068_v26  ;;  %v8624_v27 = vand.u32 4294901760, %v5449_v16  ;;  %v424_v26 = vsub.f32 %v5453_v5, %v5483_v46 }
  0x44   : > { %v1079_v48 = vsub.f32 %v5434_v56, %v8622_v11  ;;  %863 = vmatpush.msrb.mxu1 %v5050_v17  ;;  %944 = vmatpush.msrb.mxu2 %v5370_v24  ;;  %v5513_v11 = vsub.f32 %v918_v21, %v5479_v38  ;;  %v5515_v17 = vand.u32 4294901760, %v917_v8 }
  0x45   : > { %788 = vmatpush.msrb.mxu0 %v8623_v9  ;;  %v1085_v20 = vsub.f32 %v5449_v16, %v8624_v27  ;;  %1075 = vmatpush.msrb.mxu3 %v1074_v10  ;;  %v5526_v9 = vsub.f32 %v338_v53, %v5492_v3  ;;  %v8625_v10 = vand.u32 4294901760, %v5473_v4 }
  0x46   : > { %865 = vmatpush.msrb.mxu1 %v5075_v25  ;;  %418 = vmatmul.f32.gmra.mxu0 %v5488_v19  ;;  %v1080_v21 = vand.u32 4294901760, %v1079_v48  ;;  %v339_v25 = vld [vmem:[%s5134_s20 + $0x30] sm:$0xff]  ;;  %v1102_v48 = vand.u32 4294901760, %v5513_v11  ;;  %v5542_v27 = vsub.f32 %v917_v8, %v5515_v17  ;;  %v5544_v19 = vand.u32 4294901760, %v915_v44 }
  0x47   : > { %559 = vmatmul.f32.gmra.mxu1 %v5278_v49  ;;  %725 = vmatmul.f32.gmra.mxu3 %v5431_v6  ;;  %v1091_v37 = vsub.f32 %v5473_v4, %v8625_v10  ;;  %v1086_v53 = vand.u32 4294901760, %v1085_v20  ;;  %v5546_v6 = vand.u32 4294901760, %v424_v26  ;;  %v8630_v8 = vand.u32 4294901760, %v5499_v36 }
  0x48   : > { %867 = vmatpush.msrb.mxu1 %v5082_v28  ;;  %648 = vmatmul.f32.gmra.mxu2 %v5385_v34  ;;  %v5551_v28 = vand.u32 4294901760, %v5526_v9  ;;  %v5561_v26 = vsub.f32 %v916_v39, %v5529_v55  ;;  %v1108_v10 = vand.u32 4294901760, %v5542_v27 }
  0x49   : > { %792 = vmatpush.msrb.mxu0 %v8626_v63  ;;  %8627 = vst [vmem:[#allocation25_spill] sm:$0xff] %v5546_v6  ;;  %946 = vmatpush.msrb.mxu2 %v5382_v31  ;;  %v5555_v63 = vand.u32 4294901760, %v339_v25  ;;  %v1097_v20 = vsub.f32 %v5499_v36, %v8630_v8  ;;  %v1092_v57 = vand.u32 4294901760, %v1091_v37 }
  0x4a   : > { %869 = vmatpush.msrb.mxu1 %v5113_v40  ;;  %1081 = vmatpush.msrb.mxu3 %v1080_v21  ;;  %v8631_v40 = vand.u32 4294901760, %v5174_v62  ;;  %v1103_v21 = vsub.f32 %v5513_v11, %v1102_v48  ;;  %v1114_v39 = vand.u32 4294901760, %v5561_v26  ;;  %v1109_v8 = vsub.f32 %v5542_v27, %v1108_v10 }
  0x4b   : > { %796 = vmatpush.msrb.mxu0 %v8628_v50  ;;  %8629 = vst [vmem:[#allocation26_spill] sm:$0xff] %v5555_v63  ;;  %948 = vmatpush.msrb.mxu2 %v5402_v61  ;;  %v5572_v50 = vsub.f32 %v915_v44, %v5544_v19  ;;  %v5581_v62 = vsub.f32 %v339_v25, %v5555_v63  ;;  %v1098_v37 = vand.u32 4294901760, %v1097_v20  ;;  %v8633_v44 = vand.u32 4294901760, %v5201_v29 }
  0x4c   : > { %871 = vmatpush.msrb.mxu1 %v5126_v45  ;;  %1087 = vmatpush.msrb.mxu3 %v1086_v53  ;;  %v432_v45 = vsub.f32 %v5526_v9, %v5551_v28  ;;  %v1104_v53 = vand.u32 4294901760, %v1103_v21  ;;  %v1115_v21 = vsub.f32 %v5561_v26, %v1114_v39 }
  0x4d   : > { %800 = vmatpush.msrb.mxu0 %v8631_v40  ;;  %950 = vmatpush.msrb.mxu2 %v5421_v13  ;;  %8632 = vst [vmem:[#allocation27_spill] sm:$0xff] %v5581_v62  ;;  %v1120_v25 = vand.u32 4294901760, %v5572_v50  ;;  %v5598_v29 = vand.u32 4294901760, %v5581_v62 }
  0x4e   : > { %873 = vmatpush.msrb.mxu1 %v5148_v51  ;;  %426 = vmatmul.f32.gmra.mxu0 %v5546_v6  ;;  %v340_v51 = vld [vmem:[%s5134_s20 + $0x38] sm:$0xff]  ;;  %v5595_v20 = vand.u32 4294901760, %v432_v45  ;;  %v8638_v45 = vand.u32 4294901760, %v5229_v47  ;;  %v1116_v47 = vand.u32 4294901760, %v1115_v21  ;;  %v8645_v21 = vld [vmem:[#allocation13_spill] sm:$0xff] }
  0x4f   : > { %563 = vmatmul.f32.gmra.mxu1 %v5334_v22  ;;  %731 = vmatmul.f32.gmra.mxu3 %v5483_v46  ;;  %8635 = vst [vmem:[#allocation29_spill] sm:$0xff] %v5598_v29  ;;  %v5600_v40 = vand.u32 4294901760, %v340_v51 }
  0x50   : > { %804 = vmatpush.msrb.mxu0 %v8633_v44  ;;  %653 = vmatmul.f32.gmra.mxu2 %v5453_v5  ;;  %8634 = vst [vmem:[#allocation28_spill] sm:$0xff] %v5595_v20 }
  0x51   : > { %1093 = vmatpush.msrb.mxu3 %v1092_v57  ;;  %952 = vmatpush.msrb.mxu2 %v5441_v59  ;;  %8636 = vst [vmem:[#allocation30_spill] sm:$0xff] %v5600_v40  ;;  %v8637_v57 = vand.u32 4294901760, %v5213_v35  ;;  %v5621_v35 = vsub.f32 %v340_v51, %v5600_v40  ;;  %v8643_v51 = vld [vmem:[#allocation5_spill] sm:$0xff] }
  0x52   : > { %875 = vmatpush.msrb.mxu1 %v5167_v60  ;;  %v1110_v60 = vand.u32 4294901760, %v1109_v8 }
  0x53   : > { %1099 = vmatpush.msrb.mxu3 %v1098_v37  ;;  %808 = vmatpush.msrb.mxu0 %v8637_v57  ;;  %v1121_v37 = vsub.f32 %v5572_v50, %v1120_v25  ;;  %8639 = vst [vmem:[#allocation31_spill] sm:$0xff] %v5621_v35  ;;  %v5632_v8 = vand.u32 4294901760, %v5621_v35  ;;  %v8644_v57 = vld [vmem:[#allocation9_spill] sm:$0xff] }
  0x54   : > { %954 = vmatpush.msrb.mxu2 %v5467_v0  ;;  %877 = vmatpush.msrb.mxu1 %v5184_v2  ;;  %v440_v2 = vsub.f32 %v5581_v62, %v5598_v29 }
  0x55   : > { %1105 = vmatpush.msrb.mxu3 %v1104_v53  ;;  %812 = vmatpush.msrb.mxu0 %v8638_v45  ;;  %v1122_v44 = vand.u32 4294901760, %v1121_v37  ;;  %8642 = vst [vmem:[#allocation33_spill] sm:$0xff] %v5632_v8  ;;  %v8648_v45 = vand.u32 4294901760, %v8645_v21  ;;  %v8649_v37 = vand.u32 4294901760, %v5307_v12 }
  0x56   : > { %956 = vmatpush.msrb.mxu2 %v5479_v38  ;;  %879 = vmatpush.msrb.mxu1 %v5203_v30  ;;  %v8640_v30 = vand.u32 4294901760, %v5239_v54  ;;  %v5629_v53 = vand.u32 4294901760, %v440_v2  ;;  %v448_v54 = vsub.f32 %v5621_v35, %v5632_v8 }
  0x57   : > { %434 = vmatmul.f32.gmra.mxu0 %v5595_v20  ;;  %567 = vmatmul.f32.gmra.mxu1 %v5414_v15 }
  0x58   : > { %737 = vmatmul.f32.gmra.mxu3 %v5551_v28  ;;  %958 = vmatpush.msrb.mxu2 %v5515_v17  ;;  %8641 = vst [vmem:[#allocation32_spill] sm:$0xff] %v5629_v53 }
  0x59   : > { %658 = vmatmul.f32.gmra.mxu2 %v5526_v9  ;;  %1111 = vmatpush.msrb.mxu3 %v1110_v60  ;;  %v8646_v60 = vand.u32 4294901760, %v8644_v57 }
  0x5a   : > { %816 = vmatpush.msrb.mxu0 %v8640_v30  ;;  %960 = vmatpush.msrb.mxu2 %v5529_v55 }
  0x5b   : > { %1117 = vmatpush.msrb.mxu3 %v1116_v47  ;;  %881 = vmatpush.msrb.mxu1 %v8643_v51 }
  0x5c   : > { %962 = vmatpush.msrb.mxu2 %v5544_v19  ;;  %1159 = vmatpush.msra.mxu0 %v8644_v57 }
  0x5d   : > { %1123 = vmatpush.msrb.mxu3 %v1122_v44  ;;  %1247 = vmatpush.msra.mxu1 %v5252_v7  ;;  %v1500_v44 = vld [vmem:[%s8385_s3 + $0x58] sm:$0xff] }
  0x5e   : > { %1162 = vmatpush.msra.mxu0 %v8645_v21  ;;  %1330 = vmatpush.msra.mxu2 %v8646_v60  ;;  %v5821_v57 = vand.u32 4294901760, %v1500_v44  ;;  %v1499_v21 = vld [vmem:[%s8385_s3 + $0x50] sm:$0xff] }
  0x5f   : > { %1425 = vmatpush.msra.mxu3 %v5252_v7  ;;  %442 = vmatmul.f32.gmra.mxu0 %v5629_v53  ;;  %v5651_v7 = vand.u32 4294901760, %v448_v54 }
  0x60   : > { %571 = vmatmul.f32.gmra.mxu1 %v5492_v3  ;;  %743 = vmatmul.f32.gmra.mxu3 %v5598_v29  ;;  %v5830_v60 = vsub.f32 %v1500_v44, %v5821_v57 }
  0x61   : > { %1249 = vmatpush.msra.mxu1 %v5267_v42  ;;  %663 = vmatmul.f32.gmra.mxu2 %v5581_v62  ;;  %8647 = vst [vmem:[#allocation5_spill] sm:$0xff] %v5651_v7 }
  0x62   : > { %1165 = vmatpush.msra.mxu0 %v5307_v12  ;;  %1427 = vmatpush.msra.mxu3 %v5267_v42  ;;  %v8651_v42 = vand.u32 4294901760, %v5356_v14  ;;  %v8656_v12 = vld [vmem:[#allocation6_spill] sm:$0xff] }
  0x63   : > { %1251 = vmatpush.msra.mxu1 %v5290_v58  ;;  %1334 = vmatpush.msra.mxu2 %v8648_v45  ;;  %v5832_v45 = vand.u32 4294901760, %v1499_v21 }
  0x64   : > { %1168 = vmatpush.msra.mxu0 %v5331_v23  ;;  %1429 = vmatpush.msra.mxu3 %v5290_v58  ;;  %v8650_v58 = vand.u32 4294901760, %v5331_v23  ;;  %v8652_v23 = vld [vmem:[#allocation12_spill] sm:$0xff] }
  0x65   : > { %1253 = vmatpush.msra.mxu1 %v5309_v33  ;;  %1338 = vmatpush.msra.mxu2 %v8649_v37 }
  0x66   : > { %1171 = vmatpush.msra.mxu0 %v5356_v14  ;;  %1431 = vmatpush.msra.mxu3 %v5309_v33  ;;  %v8653_v33 = vand.u32 4294901760, %v5368_v32  ;;  %v8657_v14 = vand.u32 4294901760, %v5434_v56 }
  0x67   : > { %1255 = vmatpush.msra.mxu1 %v5336_v41  ;;  %450 = vmatmul.f32.gmra.mxu0 %v5651_v7 }
  0x68   : > { %575 = vmatmul.f32.gmra.mxu1 %v5555_v63  ;;  %749 = vmatmul.f32.gmra.mxu3 %v5632_v8 }
  0x69   : > { %1174 = vmatpush.msra.mxu0 %v5368_v32  ;;  %668 = vmatmul.f32.gmra.mxu2 %v5621_v35  ;;  %v8658_v32 = vld [vmem:[#allocation16_spill] sm:$0xff] }
  0x6a   : > { %1257 = vmatpush.msra.mxu1 %v5348_v43  ;;  %1342 = vmatpush.msra.mxu2 %v8650_v58  ;;  %v8444_v58 = vand.u32 4294901760, %v5830_v60 }
  0x6b   : > { %1177 = vmatpush.msra.mxu0 %v5380_v52  ;;  %1433 = vmatpush.msra.mxu3 %v5336_v41  ;;  %v8655_v41 = vand.u32 4294901760, %v5400_v18 }
  0x6c   : > { %1259 = vmatpush.msra.mxu1 %v5370_v24  ;;  %1346 = vmatpush.msra.mxu2 %v8651_v42  ;;  %v5840_v42 = vsub.f32 %v1499_v21, %v5832_v45  ;;  %v8665_v21 = vld [vmem:[#allocation8_spill] sm:$0xff] }
  0x6d   : > { %1180 = vmatpush.msra.mxu0 %v5400_v18  ;;  %1435 = vmatpush.msra.mxu3 %v5348_v43  ;;  %v8654_v43 = vand.u32 4294901760, %v5380_v52  ;;  %v8660_v52 = vand.u32 4294901760, %v5473_v4 }
  0x6e   : > { %1261 = vmatpush.msra.mxu1 %v5382_v31  ;;  %1350 = vmatpush.msra.mxu2 %v8653_v33  ;;  %v1629_v33 = vsub.f32 %v5830_v60, %v8444_v58 }
  0x6f   : > { %1183 = vmatpush.msra.mxu0 %v5434_v56  ;;  %1437 = vmatpush.msra.mxu3 %v5370_v24  ;;  %v8659_v24 = vand.u32 4294901760, %v5449_v16  ;;  %v8661_v56 = vand.u32 4294901760, %v5499_v36 }
  0x70   : > { %579 = vmatmul.f32.gmra.mxu1 %v5600_v40  ;;  %818 = vmatmul.f32.vlgmr.msrb.gmra.mxu0 %v5180_v1 }
  0x71   : > { %1125 = vmatmul.f32.vlgmr.msrb.gmra.mxu3 %v5180_v1  ;;  %1263 = vmatpush.msra.mxu1 %v5402_v61 }
  0x72   : > { %968 = vmatmul.f32.vlgmr.msrb.gmra.mxu2 %v8652_v23  ;;  %1186 = vmatpush.msra.mxu0 %v5449_v16 }
  0x73   : > { %1265 = vmatpush.msra.mxu1 %v5421_v13  ;;  %1354 = vmatpush.msra.mxu2 %v8654_v43  ;;  %v8443_v43 = vand.u32 4294901760, %v5840_v42 }
  0x74   : > { %1189 = vmatpush.msra.mxu0 %v5473_v4  ;;  %1439 = vmatpush.msra.mxu3 %v5382_v31  ;;  %v8663_v31 = vld [vmem:[#allocation23_spill] sm:$0xff] }
  0x75   : > { %1267 = vmatpush.msra.mxu1 %v5441_v59  ;;  %1358 = vmatpush.msra.mxu2 %v8655_v41  ;;  %v8664_v41 = vld [vmem:[#allocation4_spill] sm:$0xff] }
  0x76   : > { %1192 = vmatpush.msra.mxu0 %v5499_v36  ;;  %1441 = vmatpush.msra.mxu3 %v5402_v61  ;;  %v1503_v61 = vld [vmem:[%s8385_s3 + $0x70] sm:$0xff] }
  0x77   : > { %1269 = vmatpush.msra.mxu1 %v5467_v0  ;;  %1362 = vmatpush.msra.mxu2 %v8657_v14  ;;  %v5764_v16 = vand.u32 4294901760, %v1503_v61  ;;  %v1498_v14 = vld [vmem:[%s8385_s3 + $0x48] sm:$0xff] }
  0x78   : > { %822 = vmatmul.f32.gmra.mxu0 %v8656_v12  ;;  %883 = vmatmul.f32.vlgmr.msrb.gmra.mxu1 %v5180_v1 }
  0x79   : > { %1129 = vmatmul.f32.gmra.mxu3 %v8656_v12  ;;  %1366 = vmatpush.msra.mxu2 %v8659_v24  ;;  %v5770_v4 = vsub.f32 %v1503_v61, %v5764_v16  ;;  %v1630_v24 = vand.u32 4294901760, %v1629_v33  ;;  %v1496_v33 = vld [vmem:[%s8385_s3 + $0x38] sm:$0xff] }
  0x7a   : > { %976 = vmatmul.f32.gmra.mxu2 %v8658_v32  ;;  %1195 = vmatpush.msra.mxu0 %v5513_v11 }
  0x7b   : > { %1443 = vmatpush.msra.mxu3 %v5421_v13  ;;  %1271 = vmatpush.msra.mxu1 %v5479_v38  ;;  %v8662_v13 = vld [vmem:[#allocation20_spill] sm:$0xff]  ;;  %v8447_v36 = vand.u32 4294901760, %v5770_v4 }
  0x7c   : > { %1370 = vmatpush.msra.mxu2 %v8660_v52  ;;  %1198 = vmatpush.msra.mxu0 %v5542_v27  ;;  %v1635_v52 = vsub.f32 %v5840_v42, %v8443_v43 }
  0x7d   : > { %1445 = vmatpush.msra.mxu3 %v5441_v59  ;;  %1273 = vmatpush.msra.mxu1 %v5515_v17 }
  0x7e   : > { %1374 = vmatpush.msra.mxu2 %v8661_v56  ;;  %1201 = vmatpush.msra.mxu0 %v5561_v26  ;;  %v5857_v56 = vand.u32 4294901760, %v1498_v14 }
  0x7f   : > { %1447 = vmatpush.msra.mxu3 %v5467_v0  ;;  %1275 = vmatpush.msra.mxu1 %v5529_v55 }
  0x80   : > { %826 = vmatmul.f32.gmra.mxu0 %v5278_v49  ;;  %887 = vmatmul.f32.gmra.mxu1 %v8656_v12 }
  0x81   : > { %1133 = vmatmul.f32.gmra.mxu3 %v5278_v49  ;;  %1378 = vmatpush.msra.mxu2 %v1102_v48  ;;  %v1501_v48 = vld [vmem:[%s8385_s3 + $0x60] sm:$0xff] }
  0x82   : > { %984 = vmatmul.f32.gmra.mxu2 %v8662_v13  ;;  %1204 = vmatpush.msra.mxu0 %v5572_v50  ;;  %v5798_v50 = vand.u32 4294901760, %v1501_v48 }
  0x83   : > { %1382 = vmatpush.msra.mxu2 %v1108_v10  ;;  %1449 = vmatpush.msra.mxu3 %v5479_v38  ;;  %v1504_v38 = vld [vmem:[%s8385_s3 + $0x78] sm:$0xff] }
  0x84   : > { %1277 = vmatpush.msra.mxu1 %v5544_v19  ;;  %v5754_v18 = vand.u32 4294901760, %v1504_v38 }
  0x85   : > { %1386 = vmatpush.msra.mxu2 %v1114_v39  ;;  %1451 = vmatpush.msra.mxu3 %v5515_v17  ;;  %v1611_v17 = vsub.f32 %v5770_v4, %v8447_v36  ;;  %v8669_v36 = vld [vmem:[#allocation10_spill] sm:$0xff] }
  0x86   : > { %1506 = vmatpush.msrb.mxu0 %v5754_v18  ;;  %v5762_v59 = vsub.f32 %v1504_v38, %v5754_v18  ;;  %v1497_v38 = vld [vmem:[%s8385_s3 + $0x40] sm:$0xff] }
  0x87   : > { %1390 = vmatpush.msra.mxu2 %v1120_v25  ;;  %1453 = vmatpush.msra.mxu3 %v5529_v55  ;;  %v1502_v55 = vld [vmem:[%s8385_s3 + $0x68] sm:$0xff]  ;;  %v1612_v26 = vand.u32 4294901760, %v1611_v17  ;;  %v5804_v25 = vsub.f32 %v1501_v48, %v5798_v50 }
  0x88   : > { %830 = vmatmul.f32.gmra.mxu0 %v5334_v22  ;;  %891 = vmatmul.f32.gmra.mxu1 %v5278_v49  ;;  %v8448_v0 = vand.u32 4294901760, %v5762_v59  ;;  %v5788_v27 = vand.u32 4294901760, %v1502_v55 }
  0x89   : > { %1137 = vmatmul.f32.gmra.mxu3 %v5334_v22  ;;  %1508 = vmatpush.msrb.mxu0 %v5764_v16  ;;  %v8445_v47 = vand.u32 4294901760, %v5804_v25 }
  0x8a   : > { %992 = vmatmul.f32.gmra.mxu2 %v8663_v31  ;;  %1455 = vmatpush.msra.mxu3 %v5544_v19  ;;  %v1605_v19 = vsub.f32 %v5762_v59, %v8448_v0  ;;  %v5796_v10 = vsub.f32 %v1502_v55, %v5788_v27  ;;  %v5868_v55 = vsub.f32 %v1498_v14, %v5857_v56 }
  0x8b   : > { %1733 = vmatpush.msrb.mxu2 %v5762_v59  ;;  %1510 = vmatpush.msrb.mxu0 %v5788_v27  ;;  %v1623_v51 = vsub.f32 %v5804_v25, %v8445_v47 }
  0x8c   : > { %1821 = vmatpush.msrb.mxu3 %v5754_v18  ;;  %v1606_v11 = vand.u32 4294901760, %v1605_v19  ;;  %v8446_v39 = vand.u32 4294901760, %v5796_v10  ;;  %v1636_v19 = vand.u32 4294901760, %v1635_v52  ;;  %v5899_v52 = vand.u32 4294901760, %v1496_v33 }
  0x8d   : > { %1736 = vmatpush.msrb.mxu2 %v5770_v4  ;;  %1512 = vmatpush.msrb.mxu0 %v5798_v50  ;;  %v1624_v54 = vand.u32 4294901760, %v1623_v51 }
  0x8e   : > { %1823 = vmatpush.msrb.mxu3 %v5764_v16  ;;  %1607 = vmatpush.msrb.mxu1 %v1606_v11  ;;  %v1617_v2 = vsub.f32 %v5796_v10, %v8446_v39  ;;  %v5870_v11 = vand.u32 4294901760, %v1497_v38 }
  0x8f   : > { %1739 = vmatpush.msrb.mxu2 %v5796_v10  ;;  %1514 = vmatpush.msrb.mxu0 %v5821_v57 }
  0x90   : > { %834 = vmatmul.f32.gmra.mxu0 %v5414_v15  ;;  %895 = vmatmul.f32.gmra.mxu1 %v5334_v22  ;;  %v1618_v30 = vand.u32 4294901760, %v1617_v2  ;;  %v5880_v2 = vsub.f32 %v1497_v38, %v5870_v11  ;;  %v1495_v38 = vld [vmem:[%s8385_s3 + $0x30] sm:$0xff] }
  0x91   : > { %1141 = vmatmul.f32.gmra.mxu3 %v5414_v15  ;;  %1613 = vmatpush.msrb.mxu1 %v1612_v26  ;;  %v8441_v26 = vand.u32 4294901760, %v5868_v55 }
  0x92   : > { %1000 = vmatmul.f32.gmra.mxu2 %v5546_v6  ;;  %1825 = vmatpush.msrb.mxu3 %v5788_v27  ;;  %v8442_v51 = vand.u32 4294901760, %v5880_v2 }
  0x93   : > { %1742 = vmatpush.msrb.mxu2 %v5804_v25  ;;  %1619 = vmatpush.msrb.mxu1 %v1618_v30  ;;  %v1641_v30 = vsub.f32 %v5868_v55, %v8441_v26  ;;  %v5910_v26 = vand.u32 4294901760, %v1495_v38 }
  0x94   : > { %1827 = vmatpush.msrb.mxu3 %v5798_v50  ;;  %1516 = vmatpush.msrb.mxu0 %v5832_v45 }
  0x95   : > { %1625 = vmatpush.msrb.mxu1 %v1624_v54  ;;  %1745 = vmatpush.msrb.mxu2 %v5830_v60  ;;  %v8666_v54 = vld [vmem:[#allocation7_spill] sm:$0xff]  ;;  %v1642_v14 = vand.u32 4294901760, %v1641_v30  ;;  %v5908_v30 = vsub.f32 %v1496_v33, %v5899_v52 }
  0x96   : > { %1829 = vmatpush.msrb.mxu3 %v5821_v57  ;;  %1518 = vmatpush.msrb.mxu0 %v5857_v56 }
  0x97   : > { %1748 = vmatpush.msrb.mxu2 %v5840_v42  ;;  %1631 = vmatpush.msrb.mxu1 %v1630_v24  ;;  %v1647_v24 = vsub.f32 %v5880_v2, %v8442_v51  ;;  %v8451_v47 = vand.u32 4294901760, %v5908_v30 }
  0x98   : > { %838 = vmatmul.f32.gmra.mxu0 %v5492_v3  ;;  %899 = vmatmul.f32.gmra.mxu1 %v5414_v15 }
  0x99   : > { %1145 = vmatmul.f32.gmra.mxu3 %v5492_v3  ;;  %1637 = vmatpush.msrb.mxu1 %v1636_v19  ;;  %v1648_v19 = vand.u32 4294901760, %v1647_v24  ;;  %v1653_v24 = vsub.f32 %v5908_v30, %v8451_v47  ;;  %v1493_v47 = vld [vmem:[%s8385_s3 + $0x20] sm:$0xff] }
  0x9a   : > { %1008 = vmatmul.f32.gmra.mxu2 %v5595_v20  ;;  %1831 = vmatpush.msrb.mxu3 %v5832_v45  ;;  %v5952_v6 = vand.u32 4294901760, %v1493_v47 }
  0x9b   : > { %1520 = vmatpush.msrb.mxu0 %v5870_v11  ;;  %1751 = vmatpush.msrb.mxu2 %v5868_v55  ;;  %v1654_v0 = vand.u32 4294901760, %v1653_v24 }
  0x9c   : > { %1833 = vmatpush.msrb.mxu3 %v5857_v56  ;;  %1643 = vmatpush.msrb.mxu1 %v1642_v14  ;;  %v5922_v14 = vsub.f32 %v1495_v38, %v5910_v26  ;;  %v1494_v38 = vld [vmem:[%s8385_s3 + $0x28] sm:$0xff] }
  0x9d   : > { %1754 = vmatpush.msrb.mxu2 %v5880_v2  ;;  %1522 = vmatpush.msrb.mxu0 %v5899_v52 }
  0x9e   : > { %1835 = vmatpush.msrb.mxu3 %v5870_v11  ;;  %1649 = vmatpush.msrb.mxu1 %v1648_v19  ;;  %v8454_v39 = vand.u32 4294901760, %v5922_v14  ;;  %v8668_v19 = vld [vmem:[#allocation14_spill] sm:$0xff] }
  0x9f   : > { %1524 = vmatpush.msrb.mxu0 %v5910_v26  ;;  %1757 = vmatpush.msrb.mxu2 %v5908_v30 }
  0xa0   : > { %842 = vmatmul.f32.gmra.mxu0 %v5555_v63  ;;  %903 = vmatmul.f32.gmra.mxu1 %v5492_v3 }
  0xa1   : > { %1149 = vmatmul.f32.gmra.mxu3 %v5555_v63  ;;  %1760 = vmatpush.msrb.mxu2 %v5922_v14 }
  0xa2   : > { %1016 = vmatmul.f32.gmra.mxu2 %v5629_v53  ;;  %1837 = vmatpush.msrb.mxu3 %v5899_v52  ;;  %v5941_v53 = vand.u32 4294901760, %v1494_v38 }
  0xa3   : > { %1655 = vmatpush.msrb.mxu1 %v1654_v0 }
  0xa4   : > { %1839 = vmatpush.msrb.mxu3 %v5910_v26  ;;  %1526 = vmatpush.msrb.mxu0 %v5941_v53  ;;  %v5950_v24 = vsub.f32 %v1494_v38, %v5941_v53 }
  0xa6   : > { %1841 = vmatpush.msrb.mxu3 %v5941_v53  ;;  %1528 = vmatpush.msrb.mxu0 %v5952_v6 }
  0xa7   : > { %1763 = vmatpush.msrb.mxu2 %v5950_v24 }
  0xa8   : > { %846 = vmatmul.f32.gmra.mxu0 %v5600_v40  ;;  %907 = vmatmul.f32.gmra.mxu1 %v5555_v63 }
  0xa9   : > { %1153 = vmatmul.f32.gmra.mxu3 %v5600_v40 }
  0xaa   : > { %1024 = vmatmul.f32.gmra.mxu2 %v5651_v7  ;;  %v1659_v7 = vsub.f32 %v5922_v14, %v8454_v39  ;;  %1843 = vmatpush.msrb.mxu3 %v5952_v6 }
  0xab   : > { %v5835_v37 = vpop.f32.mrf.mxu0 }
  0xac   : > { %v1660_v20 = vand.u32 4294901760, %v1659_v7  ;;  %v5964_v7 = vsub.f32 %v1493_v47, %v5952_v6  ;;  %v8673_v47 = vld [vmem:[#allocation17_spill] sm:$0xff] }
  0xae   : > { %1661 = vmatpush.msrb.mxu1 %v1660_v20  ;;  %v1492_v20 = vld [vmem:[%s8385_s3 + $0x18] sm:$0xff]  ;;  %1766 = vmatpush.msrb.mxu2 %v5964_v7 }
  0xaf   : > { %v5979_v13 = vand.u32 4294901760, %v1492_v20 }
  0xb0   : > { %911 = vmatmul.f32.gmra.mxu1 %v5600_v40  ;;  %1207 = vmatmul.f32.vlgmr.msra.gmra.mxu0 %v8664_v41 }
  0xb1   : > { %1457 = vmatmul.f32.vlgmr.msra.gmra.mxu3 %v5180_v1  ;;  %v5864_v61 = vpop.f32.mrf.mxu3  ;;  %1530 = vmatpush.msrb.mxu0 %v5979_v13 }
  0xb2   : > { %1392 = vmatmul.f32.vlgmr.msra.gmra.mxu2 %v5180_v1  ;;  %1845 = vmatpush.msrb.mxu3 %v5979_v13 }
  0xb3   : > { %v5873_v17 = vpop.f32.mrf.mxu0  ;;  %v5875_v48 = vpop.f32.mrf.mxu1 }
  0xb4   : > { %v5882_v44 = vpop.f32.mrf.mxu2 }
  0xb8   : > { %1212 = vmatmul.f32.gmra.mxu0 %v8665_v21  ;;  %1281 = vmatmul.f32.vlgmr.msra.gmra.mxu1 %v8666_v54  ;;  %v1489_v21 = vld [vmem:[%s8385_s3] sm:$0xff] }
  0xb9   : > { %1461 = vmatmul.f32.gmra.mxu3 %v8656_v12 }
  0xba   : > { %1396 = vmatmul.f32.gmra.mxu2 %v8656_v12  ;;  %v5912_v51 = vpop.f32.mrf.mxu3  ;;  %v8460_v12 = vand.u32 4294901760, %v5964_v7 }
  0xbb   : > { %8667 = vst [vmem:[#allocation9_spill] sm:$0xff] %v5912_v51  ;;  %v5915_v43 = vpop.f32.mrf.mxu0 }
  0xbc   : > { %v5917_v58 = vpop.f32.mrf.mxu1  ;;  %v5924_v33 = vpop.f32.mrf.mxu2 }
  0xc0   : > { %1217 = vmatmul.f32.gmra.mxu0 %v8668_v19  ;;  %1287 = vmatmul.f32.gmra.mxu1 %v8669_v36  ;;  %v8458_v19 = vand.u32 4294901760, %v5950_v24 }
  0xc1   : > { %1465 = vmatmul.f32.gmra.mxu3 %v5278_v49 }
  0xc2   : > { %1400 = vmatmul.f32.gmra.mxu2 %v5278_v49  ;;  %v5954_v39 = vpop.f32.mrf.mxu3  ;;  %v1665_v38 = vsub.f32 %v5950_v24, %v8458_v19  ;;  %v1491_v19 = vld [vmem:[%s8385_s3 + $0x10] sm:$0xff] }
  0xc3   : > { %8670 = vst [vmem:[#allocation13_spill] sm:$0xff] %v5954_v39  ;;  %v5957_v31 = vpop.f32.mrf.mxu0 }
  0xc4   : > { %8671 = vst [vmem:[#allocation12_spill] sm:$0xff] %v5957_v31  ;;  %v5959_v49 = vpop.f32.mrf.mxu1  ;;  %v5966_v0 = vpop.f32.mrf.mxu2  ;;  %v1666_v39 = vand.u32 4294901760, %v1665_v38  ;;  %v1671_v31 = vsub.f32 %v5964_v7, %v8460_v12  ;;  %v1490_v12 = vld [vmem:[%s8385_s3 + $0x8] sm:$0xff] }
  0xc5   : > { %8672 = vst [vmem:[#allocation4_spill] sm:$0xff] %v5966_v0 }
  0xc6   : > { %1667 = vmatpush.msrb.mxu1 %v1666_v39  ;;  %v1672_v38 = vand.u32 4294901760, %v1671_v31 }
  0xc8   : > { %1222 = vmatmul.f32.gmra.mxu0 %v5385_v34  ;;  %1293 = vmatmul.f32.gmra.mxu1 %v8673_v47  ;;  %v5992_v34 = vsub.f32 %v1492_v20, %v5979_v13  ;;  %v5994_v47 = vand.u32 4294901760, %v1491_v19 }
  0xc9   : > { %1469 = vmatmul.f32.gmra.mxu3 %v5334_v22  ;;  %1673 = vmatpush.msrb.mxu1 %v1672_v38 }
  0xca   : > { %1404 = vmatmul.f32.gmra.mxu2 %v5334_v22  ;;  %v6000_v0 = vpop.f32.mrf.mxu3  ;;  %1532 = vmatpush.msrb.mxu0 %v5994_v47  ;;  %v6006_v20 = vsub.f32 %v1491_v19, %v5994_v47  ;;  %v6008_v22 = vand.u32 4294901760, %v1490_v12  ;;  %v8678_v51 = vand.u32 4294901760, %v5992_v34 }
  0xcb   : > { %8674 = vst [vmem:[#allocation7_spill] sm:$0xff] %v6000_v0  ;;  %1769 = vmatpush.msrb.mxu2 %v5992_v34  ;;  %v6010_v31 = vpop.f32.mrf.mxu0  ;;  %1847 = vmatpush.msrb.mxu3 %v5994_v47 }
  0xcc   : > { %8675 = vst [vmem:[#allocation34_spill] sm:$0xff] %v6010_v31  ;;  %v6012_v39 = vpop.f32.mrf.mxu1  ;;  %v6018_v0 = vpop.f32.mrf.mxu2  ;;  %v1677_v19 = vsub.f32 %v5992_v34, %v8678_v51  ;;  %v8466_v36 = vand.u32 4294901760, %v6006_v20  ;;  %1534 = vmatpush.msrb.mxu0 %v6008_v22  ;;  %v6026_v31 = vand.u32 4294901760, %v1489_v21  ;;  %v6030_v38 = vsub.f32 %v1490_v12, %v6008_v22 }
  0xcd   : > { %8676 = vst [vmem:[#allocation35_spill] sm:$0xff] %v6012_v39  ;;  %1772 = vmatpush.msrb.mxu2 %v6006_v20  ;;  %1849 = vmatpush.msrb.mxu3 %v6008_v22 }
  0xce   : > { %8677 = vst [vmem:[#allocation36_spill] sm:$0xff] %v6018_v0  ;;  %v8680_v0 = vld [vmem:[#allocation21_spill] sm:$0xff]  ;;  %v1678_v39 = vand.u32 4294901760, %v1677_v19  ;;  %v1683_v51 = vsub.f32 %v6006_v20, %v8466_v36  ;;  %v6038_v1 = vsub.f32 %v1489_v21, %v6026_v31  ;;  %1536 = vmatpush.msrb.mxu0 %v6026_v31  ;;  %v8470_v32 = vand.u32 4294901760, %v6030_v38 }
  0xcf   : > { %8679 = vst [vmem:[#allocation37_spill] sm:$0xff] %v6026_v31  ;;  %1775 = vmatpush.msrb.mxu2 %v6030_v38  ;;  %1851 = vmatpush.msrb.mxu3 %v6026_v31  ;;  %v4937_v19 = vmov 0.0  }
  0xd0   : > { %1227 = vmatmul.f32.gmra.mxu0 %v5453_v5  ;;  %1299 = vmatmul.f32.gmra.mxu1 %v8680_v0  ;;  %v1684_v12 = vand.u32 4294901760, %v1683_v51  ;;  %v8476_v5 = vand.u32 4294901760, %v6038_v1  ;;  %v1689_v21 = vsub.f32 %v6030_v38, %v8470_v32  ;;  %2063 = vst [vmem:[#allocation2] sm:$0xff] %v4937_v19  ;;  %v8682_v51 = vand.u32 4294901760, %v5762_v59 }
  0xd1   : > { %1473 = vmatmul.f32.gmra.mxu3 %v5414_v15  ;;  %1679 = vmatpush.msrb.mxu1 %v1678_v39  ;;  %2064 = vst [vmem:[#allocation2 + $0x8] sm:$0x3] %v4937_v19  ;;  %v8684_v59 = vand.u32 4294901760, %v5796_v10  ;;  %v8689_v10 = vand.u32 4294901760, %v5868_v55  ;;  %v553_v55 = vadd.f32 %v5875_v48, %v5835_v37  ;;  %v2566_v37 = vld [vmem:[%s8389_s7 + $0x68] sm:$0xff]  ;;  %v8693_v48 = vand.u32 4294901760, %v5922_v14 }
  0xd2   : > { %1408 = vmatmul.f32.gmra.mxu2 %v5414_v15  ;;  %v6050_v36 = vpop.f32.mrf.mxu3  ;;  %v1695_v39 = vsub.f32 %v6038_v1, %v8476_v5  ;;  %1904 = vmatpush.msra.mxu0 %v8682_v51  ;;  %v1690_v31 = vand.u32 4294901760, %v1689_v21  ;;  %2065 = vst [vmem:[#allocation2 + $0x10] sm:$0xff] %v4937_v19  ;;  %v2565_v14 = vld [vmem:[%s8389_s7 + $0x60] sm:$0xff] }
  0xd3   : > { %8681 = vst [vmem:[#allocation38_spill] sm:$0xff] %v6050_v36  ;;  %1685 = vmatpush.msrb.mxu1 %v1684_v12  ;;  %1778 = vmatpush.msrb.mxu2 %v6038_v1  ;;  %v8683_v12 = vand.u32 4294901760, %v5770_v4 }
  0xd4   : > { %v6057_v15 = vpop.f32.mrf.mxu0  ;;  %v6059_v0 = vpop.f32.mrf.mxu1  ;;  %v1696_v36 = vand.u32 4294901760, %v1695_v39  ;;  %2066 = vst [vmem:[#allocation2 + $0x18] sm:$0x3] %v4937_v19 }
  0xd5   : > { %v6062_v32 = vpop.f32.mrf.mxu2  ;;  %1908 = vmatpush.msra.mxu0 %v8683_v12  ;;  %1691 = vmatpush.msrb.mxu1 %v1690_v31  ;;  %2067 = vst [vmem:[#allocation2 + $0x20] sm:$0xff] %v4937_v19 }
  0xd6   : > { %2068 = vst [vmem:[#allocation2 + $0x28] sm:$0x3] %v4937_v19 }
  0xd7   : > { %1697 = vmatpush.msrb.mxu1 %v1696_v36  ;;  %2069 = vst [vmem:[#allocation2 + $0x30] sm:$0xff] %v4937_v19  ;;  %1912 = vmatpush.msra.mxu0 %v8684_v59  ;;  %v8685_v36 = vand.u32 4294901760, %v5804_v25 }
  0xd8   : > { %1232 = vmatmul.f32.gmra.mxu0 %v5526_v9  ;;  %1305 = vmatmul.f32.gmra.mxu1 %v5483_v46  ;;  %2070 = vst [vmem:[#allocation2 + $0x38] sm:$0x3] %v4937_v19 }
  0xd9   : > { %1477 = vmatmul.f32.gmra.mxu3 %v5492_v3  ;;  %1999 = vmatpush.msra.mxu1 %v5754_v18  ;;  %2071 = vst [vmem:[#allocation2 + $0x40] sm:$0xff] %v4937_v19  ;;  %v8686_v18 = vand.u32 4294901760, %v5830_v60 }
  0xda   : > { %1412 = vmatmul.f32.gmra.mxu2 %v5492_v3  ;;  %2072 = vst [vmem:[#allocation2 + $0x48] sm:$0x3] %v4937_v19  ;;  %1916 = vmatpush.msra.mxu0 %v8685_v36 }
  0xdb   : > { %v6073_v4 = vpop.f32.mrf.mxu3  ;;  %2001 = vmatpush.msra.mxu1 %v5764_v16  ;;  %2073 = vst [vmem:[#allocation2 + $0x50] sm:$0xff] %v4937_v19  ;;  %v8687_v16 = vand.u32 4294901760, %v5840_v42  ;;  %v8690_v42 = vand.u32 4294901760, %v5880_v2  ;;  %v8691_v2 = vand.u32 4294901760, %v5908_v30 }
  0xdc   : > { %v6076_v31 = vpop.f32.mrf.mxu0  ;;  %2074 = vst [vmem:[#allocation2 + $0x58] sm:$0x3] %v4937_v19  ;;  %1920 = vmatpush.msra.mxu0 %v8686_v18  ;;  %v635_v18 = vadd.f32 %v5882_v44, %v553_v55  ;;  %v2564_v44 = vld [vmem:[%s8389_s7 + $0x58] sm:$0xff] }
  0xdd   : > { %v6078_v21 = vpop.f32.mrf.mxu1  ;;  %v6082_v39 = vpop.f32.mrf.mxu2  ;;  %2003 = vmatpush.msra.mxu1 %v5788_v27  ;;  %2075 = vst [vmem:[#allocation2 + $0x60] sm:$0xff] %v4937_v19 }
  0xde   : > { %2076 = vst [vmem:[#allocation2 + $0x68] sm:$0x3] %v4937_v19  ;;  %1924 = vmatpush.msra.mxu0 %v8687_v16 }
  0xdf   : > { %2005 = vmatpush.msra.mxu1 %v5798_v50  ;;  %2077 = vst [vmem:[#allocation2 + $0x70] sm:$0xff] %v4937_v19 }
  0xe0   : > { %1237 = vmatmul.f32.gmra.mxu0 %v5581_v62  ;;  %1311 = vmatmul.f32.gmra.mxu1 %v5551_v28  ;;  %2078 = vst [vmem:[#allocation2 + $0x78] sm:$0x3] %v4937_v19  ;;  %v8727_v62 = vld [vmem:[#allocation14_spill] sm:$0xff] }
  0xe1   : > { %1481 = vmatmul.f32.gmra.mxu3 %v5555_v63  ;;  %2007 = vmatpush.msra.mxu1 %v5821_v57  ;;  %2079 = vst [vmem:[#allocation2 + $0x80] sm:$0xff] %v4937_v19  ;;  %v2568_v57 = vld [vmem:[%s8389_s7 + $0x78] sm:$0xff] }
  0xe2   : > { %1416 = vmatmul.f32.gmra.mxu2 %v5555_v63  ;;  %1928 = vmatpush.msra.mxu0 %v8689_v10  ;;  %2080 = vst [vmem:[#allocation2 + $0x88] sm:$0x3] %v4937_v19  ;;  %v8695_v10 = vand.u32 4294901760, %v5950_v24 }
  0xe3   : > { %v6095_v27 = vpop.f32.mrf.mxu3  ;;  %2009 = vmatpush.msra.mxu1 %v5832_v45  ;;  %2081 = vst [vmem:[#allocation2 + $0x90] sm:$0xff] %v4937_v19  ;;  %v6115_v45 = vand.u32 4294901760, %v2568_v57 }
  0xe4   : > { %8688 = vst [vmem:[#allocation39_spill] sm:$0xff] %v6095_v27  ;;  %v6099_v25 = vpop.f32.mrf.mxu0  ;;  %1932 = vmatpush.msra.mxu0 %v8690_v42  ;;  %v6418_v27 = vld [vmem:[%s8386_s4 + $0x5] ss:$0 sm:$0xff] }
  0xe5   : > { %v6101_v60 = vpop.f32.mrf.mxu1  ;;  %v6104_v50 = vpop.f32.mrf.mxu2  ;;  %2082 = vst [vmem:[#allocation2 + $0x98] sm:$0x3] %v4937_v19  ;;  %2011 = vmatpush.msra.mxu1 %v5857_v56  ;;  %v2567_v56 = vld [vmem:[%s8389_s7 + $0x70] sm:$0xff]  ;;  %v6127_v19 = vsub.f32 %v2568_v57, %v6115_v45  ;;  %2570 = vmatpush.msra.mxu2 %v6115_v45 }
  0xe6   : > { %1936 = vmatpush.msra.mxu0 %v8691_v2  ;;  %v6130_v51 = vand.u32 4294901760, %v2567_v56 }
  0xe7   : > { %2013 = vmatpush.msra.mxu1 %v5870_v11  ;;  %v8475_v59 = vand.u32 4294901760, %v6127_v19 }
  0xe8   : > { %1242 = vmatmul.f32.gmra.mxu0 %v5621_v35  ;;  %1317 = vmatmul.f32.gmra.mxu1 %v5598_v29  ;;  %v6144_v36 = vsub.f32 %v2567_v56, %v6130_v51  ;;  %v8716_v35 = vld [vmem:[#allocation12_spill] sm:$0xff] }
  0xe9   : > { %1485 = vmatmul.f32.gmra.mxu3 %v5600_v40  ;;  %2015 = vmatpush.msra.mxu1 %v5899_v52  ;;  %v6147_v52 = vand.u32 4294901760, %v2566_v37  ;;  %v2669_v42 = vsub.f32 %v6127_v19, %v8475_v59  ;;  %v8707_v59 = vld [vmem:[#allocation8_spill] sm:$0xff] }
  0xea   : > { %1420 = vmatmul.f32.gmra.mxu2 %v5600_v40  ;;  %1940 = vmatpush.msra.mxu0 %v8693_v48  ;;  %v8472_v57 = vand.u32 4294901760, %v6144_v36  ;;  %v2563_v48 = vld [vmem:[%s8389_s7 + $0x50] sm:$0xff] }
  0xeb   : > { %v6133_v11 = vpop.f32.mrf.mxu3  ;;  %2572 = vmatpush.msra.mxu2 %v6130_v51  ;;  %2017 = vmatpush.msra.mxu1 %v5910_v26  ;;  %v6163_v56 = vsub.f32 %v2566_v37, %v6147_v52  ;;  %v6166_v26 = vand.u32 4294901760, %v2565_v14  ;;  %v2670_v24 = vand.u32 4294901760, %v2669_v42 }
  0xec   : > { %8692 = vst [vmem:[#allocation40_spill] sm:$0xff] %v6133_v11  ;;  %1944 = vmatpush.msra.mxu0 %v8695_v10  ;;  %v2675_v55 = vsub.f32 %v6144_v36, %v8472_v57  ;;  %v8696_v10 = vand.u32 4294901760, %v5964_v7  ;;  %v2562_v7 = vld [vmem:[%s8389_s7 + $0x48] sm:$0xff] }
  0xed   : > { %v6140_v30 = vpop.f32.mrf.mxu1  ;;  %v819_v12 = vpop.f32.mrf.mxu0  ;;  %2574 = vmatpush.msra.mxu2 %v6147_v52  ;;  %2019 = vmatpush.msra.mxu1 %v5941_v53  ;;  %v8471_v2 = vand.u32 4294901760, %v6163_v56  ;;  %v6180_v37 = vsub.f32 %v2565_v14, %v6166_v26  ;;  %v557_v53 = vadd.f32 %v5917_v58, %v5873_v17 }
  0xee   : > { %v6151_v16 = vpop.f32.mrf.mxu2  ;;  %1948 = vmatpush.msra.mxu0 %v8696_v10  ;;  %2671 = vmatpush.msra.mxu3 %v2670_v24  ;;  %v2676_v14 = vand.u32 4294901760, %v2675_v55  ;;  %v8698_v24 = vand.u32 4294901760, %v5992_v34 }
  0xef   : > { %8694 = vst [vmem:[#allocation41_spill] sm:$0xff] %v6151_v16  ;;  %2576 = vmatpush.msra.mxu2 %v6166_v26  ;;  %v2681_v42 = vsub.f32 %v6163_v56, %v8471_v2  ;;  %v8473_v58 = vand.u32 4294901760, %v6180_v37  ;;  %2021 = vmatpush.msra.mxu1 %v5952_v6 }
  0xf0   : > { %1323 = vmatmul.f32.gmra.mxu1 %v5632_v8  ;;  %1542 = vmatmul.f32.vlgmr.msrb.gmra.mxu0 %v8652_v23  ;;  %v709_v23 = vadd.f32 %v5864_v61, %v635_v18  ;;  %v6198_v61 = vand.u32 4294901760, %v2563_v48  ;;  %v8717_v8 = vld [vmem:[#allocation35_spill] sm:$0xff] }
  0xf1   : > { %1855 = vmatmul.f32.vlgmr.msrb.gmra.mxu3 %v8666_v54  ;;  %v6187_v54 = vand.u32 4294901760, %v2564_v44  ;;  %1952 = vmatpush.msra.mxu0 %v8698_v24  ;;  %v2682_v2 = vand.u32 4294901760, %v2681_v42  ;;  %v2687_v6 = vsub.f32 %v6180_v37, %v8473_v58  ;;  %v2561_v42 = vld [vmem:[%s8389_s7 + $0x40] sm:$0xff]  ;;  %v8706_v58 = vld [vmem:[#allocation9_spill] sm:$0xff]  ;;  %v565_v63 = vadd.f32 %v8717_v8, %v8716_v35 }
  0xf2   : > { %1781 = vmatmul.f32.vlgmr.msrb.gmra.mxu2 %v8664_v41  ;;  %v820_v41 = vadd.f32 %v819_v12, %v709_v23  ;;  %2677 = vmatpush.msra.mxu3 %v2676_v14  ;;  %v6216_v12 = vsub.f32 %v2563_v48, %v6198_v61  ;;  %v640_v23 = vadd.f32 %v5924_v33, %v557_v53  ;;  %v8700_v48 = vand.u32 4294901760, %v6006_v20  ;;  %v6249_v20 = vld [vmem:[%s8386_s4] ss:$0 sm:$0xff] }
  0xf3   : > { %v6204_v18 = vsub.f32 %v2564_v44, %v6187_v54  ;;  %2578 = vmatpush.msra.mxu2 %v6187_v54  ;;  %v6218_v44 = vand.u32 4294901760, %v2562_v7  ;;  %2023 = vmatpush.msra.mxu1 %v5979_v13  ;;  %v2688_v24 = vand.u32 4294901760, %v2687_v6  ;;  %v561_v53 = vadd.f32 %v5959_v49, %v5915_v43  ;;  %v2560_v43 = vld [vmem:[%s8389_s7 + $0x38] sm:$0xff] }
  0xf4   : > { %v6201_v17 = vpop.f32.mrf.mxu3  ;;  %1956 = vmatpush.msra.mxu0 %v8700_v48  ;;  %2683 = vmatpush.msra.mxu3 %v2682_v2  ;;  %v8477_v13 = vand.u32 4294901760, %v6216_v12  ;;  %v8701_v2 = vld [vmem:[#allocation16_spill] sm:$0xff]  ;;  %v6265_v48 = vand.u32 4294901760, %v2561_v42 }
  0xf5   : > { %8697 = vst [vmem:[#allocation42_spill] sm:$0xff] %v6201_v17  ;;  %v823_v55 = vpop.f32.mrf.mxu0  ;;  %v884_v10 = vpop.f32.mrf.mxu1  ;;  %v8474_v14 = vand.u32 4294901760, %v6204_v18  ;;  %2580 = vmatpush.msra.mxu2 %v6198_v61  ;;  %v6235_v33 = vsub.f32 %v2562_v7, %v6218_v44  ;;  %2025 = vmatpush.msra.mxu1 %v5994_v47  ;;  %v8702_v7 = vld [vmem:[#allocation3_spill] sm:$0xff]  ;;  %v8703_v47 = vld [vmem:[#allocation10_spill] sm:$0xff] }
  0xf6   : > { %v6222_v57 = vadd.f32 %v884_v10, %v820_v41  ;;  %v6224_v34 = vpop.f32.mrf.mxu2  ;;  %v6244_v41 = vld [vmem:[%s8386_s4 + $0x4] ss:$0 sm:$0xff]  ;;  %v2699_v10 = vsub.f32 %v6216_v12, %v8477_v13  ;;  %8704 = vst [vmem:[#allocation16_spill] sm:$0xff] %v6265_v48  ;;  %2689 = vmatpush.msra.mxu3 %v2688_v24  ;;  %v6278_v40 = vsub.f32 %v2561_v42, %v6265_v48  ;;  %v2558_v42 = vld [vmem:[%s8389_s7 + $0x28] sm:$0xff] }
  0xf7   : > { %8699 = vst [vmem:[#allocation43_spill] sm:$0xff] %v6224_v34  ;;  %v2693_v49 = vsub.f32 %v6204_v18, %v8474_v14  ;;  %v8480_v6 = vand.u32 4294901760, %v6235_v33  ;;  %2582 = vmatpush.msra.mxu2 %v6218_v44  ;;  %v715_v14 = vadd.f32 %v8706_v58, %v640_v23  ;;  %2027 = vmatpush.msra.mxu1 %v6008_v22  ;;  %v6310_v22 = vld [vmem:[%s8386_s4 + $0x1] ss:$0 sm:$0xff] }
  0xf8   : > { %2084 = vst [vmem:[#allocation2 + $0x11] sm:$0xff] %v6222_v57  ;;  %1550 = vmatmul.f32.gmra.mxu0 %v8701_v2  ;;  %1699 = vmatmul.f32.vlgmr.msrb.gmra.mxu1 %v8702_v7  ;;  %v6267_v2 = vand.u32 4294901760, %v2560_v43  ;;  %v2700_v7 = vand.u32 4294901760, %v2699_v10  ;;  %v2094_v24 = vmul.f32 %v6244_v41, %v6222_v57  ;;  %v8487_v17 = vand.u32 4294901760, %v6278_v40 }
  0xf9   : > { %1861 = vmatmul.f32.gmra.mxu3 %v8703_v47  ;;  %v2694_v5 = vand.u32 4294901760, %v2693_v49  ;;  %v2559_v47 = vld [vmem:[%s8389_s7 + $0x30] sm:$0xff]  ;;  %v2705_v13 = vsub.f32 %v6235_v33, %v8480_v6  ;;  %8708 = vst [vmem:[#allocation9_spill] sm:$0xff] %v6278_v40  ;;  %2584 = vmatpush.msra.mxu2 %v6265_v48  ;;  %v824_v23 = vadd.f32 %v823_v55, %v715_v14  ;;  %v2112_v49 = vmul.f32 0.0, %v6249_v20 }
  0xfa   : > { %8705 = vst [vmem:[#allocation10_spill] sm:$0xff] %v6267_v2  ;;  %1786 = vmatmul.f32.gmra.mxu2 %v8707_v59  ;;  %v6282_v58 = vsub.f32 %v2560_v43, %v6267_v2  ;;  %v8710_v59 = vand.u32 4294901760, %v6030_v38  ;;  %v6291_v6 = vand.u32 4294901760, %v2559_v47  ;;  %v8713_v43 = vld [vmem:[#allocation4_spill] sm:$0xff]  ;;  %v2711_v8 = vsub.f32 %v6278_v40, %v8487_v17  ;;  %v8722_v17 = vld [vmem:[#allocation13_spill] sm:$0xff] }
  0xfb   : > { %2695 = vmatpush.msra.mxu3 %v2694_v5  ;;  %v645_v38 = vadd.f32 %v8713_v43, %v561_v53  ;;  %2586 = vmatpush.msra.mxu2 %v6267_v2  ;;  %v6301_v5 = vand.u32 4294901760, %v2558_v42  ;;  %v6315_v53 = vld [vmem:[%s8386_s4 + $0x2] ss:$0 sm:$0xff]  ;;  %v2706_v35 = vand.u32 4294901760, %v2705_v13 }
  0xfc   : > { %8709 = vst [vmem:[#allocation8_spill] sm:$0xff] %v6282_v58  ;;  %1960 = vmatpush.msra.mxu0 %v8710_v59  ;;  %v6289_v10 = vpop.f32.mrf.mxu3  ;;  %v2129_v59 = vld [vmem:[#allocation2 + $0x1] sm:$0xff]  ;;  %v8720_v11 = vand.u32 4294901760, %v6282_v58 }
  0xfd   : > { %8711 = vst [vmem:[#allocation44_spill] sm:$0xff] %v6289_v10  ;;  %v827_v55 = vpop.f32.mrf.mxu0  ;;  %v888_v14 = vpop.f32.mrf.mxu1  ;;  %v8715_v10 = vand.u32 4294901760, %v6038_v1  ;;  %2701 = vmatpush.msra.mxu3 %v2700_v7  ;;  %v6322_v1 = vsub.f32 %v2559_v47, %v6291_v6  ;;  %2588 = vmatpush.msra.mxu2 %v6291_v6  ;;  %v2138_v7 = vmul.f32 %v6310_v22, %v2129_v59  ;;  %v2557_v13 = vld [vmem:[%s8389_s7 + $0x20] sm:$0xff]  ;;  %v2556_v47 = vld [vmem:[%s8389_s7 + $0x18] sm:$0xff] }
  0xfe   : > { %8712 = vst [vmem:[#allocation45_spill] sm:$0xff] %v6291_v6  ;;  %v6317_v43 = vadd.f32 %v888_v14, %v824_v23  ;;  %v6319_v34 = vpop.f32.mrf.mxu2  ;;  %v2717_v2 = vsub.f32 %v6282_v58, %v8720_v11  ;;  %v6332_v23 = vsub.f32 %v2558_v42, %v6301_v5  ;;  %v2120_v14 = vadd.f32 %v2112_v49, %v2094_v24  ;;  %v8724_v6 = vld [vmem:[#allocation6_spill] sm:$0xff]  ;;  %v8725_v24 = vld [vmem:[#allocation36_spill] sm:$0xff]  ;;  %v8726_v58 = vld [vmem:[#allocation17_spill] sm:$0xff] }
  0xff   : > { %8714 = vst [vmem:[#allocation4_spill] sm:$0xff] %v6301_v5  ;;  %1964 = vmatpush.msra.mxu0 %v8715_v10  ;;  %v2155_v10 = vld [vmem:[#allocation2 + $0x2] sm:$0xff]  ;;  %v721_v11 = vadd.f32 %v8722_v17, %v645_v38  ;;  %v2712_v42 = vand.u32 4294901760, %v2711_v8  ;;  %v650_v49 = vadd.f32 %v8725_v24, %v565_v63  ;;  %v8496_v29 = vand.u32 4294901760, %v6322_v1  ;;  %v2555_v17 = vld [vmem:[%s8389_s7 + $0x10] sm:$0xff]  ;;  %2707 = vmatpush.msra.mxu3 %v2706_v35 }
 0x100   : > { %8718 = vst [vmem:[#allocation12_spill] sm:$0xff] %v6319_v34  ;;  %v8723_v34 = vld [vmem:[#allocation20_spill] sm:$0xff]  ;;  %1703 = vmatmul.f32.gmra.mxu1 %v8724_v6  ;;  %v2164_v59 = vmul.f32 %v6315_v53, %v2155_v10  ;;  %v2718_v38 = vand.u32 4294901760, %v2717_v2  ;;  %2590 = vmatpush.msra.mxu2 %v6301_v5  ;;  %v6355_v63 = vand.u32 4294901760, %v2557_v13  ;;  %v6357_v10 = vand.u32 4294901760, %v2556_v47  ;;  %v8733_v5 = vld [vmem:[#allocation37_spill] sm:$0xff] }
 0x101   : > { %8719 = vst [vmem:[#allocation35_spill] sm:$0xff] %v6322_v1  ;;  %1558 = vmatmul.f32.gmra.mxu0 %v8723_v34  ;;  %1867 = vmatmul.f32.gmra.mxu3 %v8726_v58  ;;  %v2181_v34 = vld [vmem:[#allocation2 + $0x10] sm:$0xff]  ;;  %v6359_v58 = vand.u32 4294901760, %v2555_v17  ;;  %v828_v8 = vadd.f32 %v827_v55, %v721_v11  ;;  %v2723_v16 = vsub.f32 %v6322_v1, %v8496_v29  ;;  %v8732_v6 = vand.u32 4294901760, %v6332_v23  ;;  %v2554_v35 = vld [vmem:[%s8389_s7 + $0x8] sm:$0xff] }
 0x102   : > { %8721 = vst [vmem:[#allocation46_spill] sm:$0xff] %v6332_v23  ;;  %1791 = vmatmul.f32.gmra.mxu2 %v8727_v62  ;;  %v2146_v62 = vadd.f32 %v2138_v7, %v2120_v14  ;;  %2029 = vmatpush.msra.mxu1 %v8733_v5  ;;  %v6376_v55 = vld [vmem:[%s8386_s4 + $0x3] ss:$0 sm:$0xff]  ;;  %v6379_v11 = vsub.f32 %v2557_v13, %v6355_v63  ;;  %v2207_v40 = vld [vmem:[#allocation2 + $0x12] sm:$0xff] }
 0x103   : > { %2085 = vst [vmem:[#allocation2 + $0x21] sm:$0xff] %v6317_v43  ;;  %v2729_v2 = vsub.f32 %v6332_v23, %v8732_v6  ;;  %2713 = vmatpush.msra.mxu3 %v2712_v42  ;;  %2592 = vmatpush.msra.mxu2 %v6355_v63  ;;  %v6383_v6 = vsub.f32 %v2556_v47, %v6357_v10  ;;  %v2724_v13 = vand.u32 4294901760, %v2723_v16  ;;  %v8738_v16 = vld [vmem:[#allocation23_spill] sm:$0xff] }
 0x104   : > { %8728 = vst [vmem:[#allocation13_spill] sm:$0xff] %v6355_v63  ;;  %v6361_v24 = vpop.f32.mrf.mxu3  ;;  %v6386_v29 = vsub.f32 %v2555_v17, %v6359_v58  ;;  %v2095_v5 = vmul.f32 %v6244_v41, %v6317_v43  ;;  %2797 = vmatpush.msrb.mxu0 %v6127_v19  ;;  %2885 = vmatpush.msrb.mxu1 %v6115_v45  ;;  %v6400_v17 = vand.u32 4294901760, %v2554_v35  ;;  %v8739_v47 = vld [vmem:[#allocation11_spill] sm:$0xff] }
 0x105   : > { %8729 = vst [vmem:[#allocation20_spill] sm:$0xff] %v6357_v10  ;;  %v831_v14 = vpop.f32.mrf.mxu0  ;;  %v892_v7 = vpop.f32.mrf.mxu1  ;;  %2719 = vmatpush.msra.mxu3 %v2718_v38  ;;  %2594 = vmatpush.msra.mxu2 %v6357_v10  ;;  %v2190_v38 = vmul.f32 %v6376_v55, %v2181_v34  ;;  %v2730_v42 = vand.u32 4294901760, %v2729_v2  ;;  %v8740_v10 = vand.u32 4294901760, %v6379_v11  ;;  %v2172_v2 = vadd.f32 %v2164_v59, %v2146_v62 }
 0x106   : > { %8730 = vst [vmem:[#allocation36_spill] sm:$0xff] %v6359_v58  ;;  %v6391_v23 = vadd.f32 %v892_v7, %v828_v8  ;;  %v6393_v1 = vpop.f32.mrf.mxu2  ;;  %v2553_v8 = vld [vmem:[%s8389_s7] sm:$0xff]  ;;  %v8737_v7 = vld [vmem:[#allocation34_spill] sm:$0xff]  ;;  %v8745_v3 = vand.u32 4294901760, %v6383_v6  ;;  %v2139_v59 = vmul.f32 %v6310_v22, %v6222_v57  ;;  %2800 = vmatpush.msrb.mxu0 %v6144_v36  ;;  %2887 = vmatpush.msrb.mxu1 %v6130_v51 }
 0x107   : > { %8731 = vst [vmem:[#allocation17_spill] sm:$0xff] %v6361_v24  ;;  %v2113_v24 = vmul.f32 %v6249_v20, %v2181_v34  ;;  %v2735_v63 = vsub.f32 %v6379_v11, %v8740_v10  ;;  %v8742_v34 = vld [vmem:[#allocation21_spill] sm:$0xff]  ;;  %2725 = vmatpush.msra.mxu3 %v2724_v13  ;;  %2596 = vmatpush.msra.mxu2 %v6359_v58 }
 0x108   : > { %8734 = vst [vmem:[#allocation14_spill] sm:$0xff] %v6379_v11  ;;  %1707 = vmatmul.f32.gmra.mxu1 %v8739_v47  ;;  %v6423_v47 = vand.u32 4294901760, %v2553_v8  ;;  %v2741_v11 = vsub.f32 %v6383_v6, %v8745_v3  ;;  %2803 = vmatpush.msrb.mxu0 %v6163_v56 }
 0x109   : > { %8735 = vst [vmem:[#allocation37_spill] sm:$0xff] %v6393_v1  ;;  %v569_v1 = vadd.f32 %v6059_v0, %v8737_v7  ;;  %1566 = vmatmul.f32.gmra.mxu0 %v8738_v16  ;;  %v2121_v0 = vadd.f32 %v2113_v24, %v2095_v5  ;;  %v8741_v7 = vld [vmem:[#allocation7_spill] sm:$0xff]  ;;  %1873 = vmatmul.f32.gmra.mxu3 %v8742_v34  ;;  %v8743_v16 = vld [vmem:[#allocation18_spill] sm:$0xff]  ;;  %v2736_v10 = vand.u32 4294901760, %v2735_v63 }
 0x10a   : > { %8736 = vst [vmem:[#allocation47_spill] sm:$0xff] %v6400_v17  ;;  %v727_v48 = vadd.f32 %v8741_v7, %v650_v49  ;;  %1796 = vmatmul.f32.gmra.mxu2 %v8743_v16  ;;  %v6430_v24 = vsub.f32 %v2554_v35, %v6400_v17  ;;  %v6435_v49 = vld [vmem:[%s8386_s4 + $0x6] ss:$0 sm:$0xff]  ;;  %v6442_v13 = vsub.f32 %v2553_v8, %v6423_v47  ;;  %v8747_v16 = vand.u32 4294901760, %v6386_v29 }
 0x10b   : > { %2086 = vst [vmem:[#allocation2 + $0x31] sm:$0xff] %v6391_v23  ;;  %v2182_v62 = vld [vmem:[#allocation2 + $0x20] sm:$0xff]  ;;  %v655_v3 = vadd.f32 %v6062_v32, %v569_v1  ;;  %v2198_v35 = vadd.f32 %v2190_v38, %v2172_v2  ;;  %2731 = vmatpush.msra.mxu3 %v2730_v42  ;;  %2598 = vmatpush.msra.mxu2 %v6400_v17  ;;  %v2742_v32 = vand.u32 4294901760, %v2741_v11 }
 0x10c   : > { %8744 = vst [vmem:[#allocation34_spill] sm:$0xff] %v6423_v47  ;;  %v832_v5 = vadd.f32 %v831_v14, %v727_v48  ;;  %v6439_v63 = vpop.f32.mrf.mxu3  ;;  %v2747_v57 = vsub.f32 %v6386_v29, %v8747_v16  ;;  %v8515_v48 = vand.u32 4294901760, %v6430_v24  ;;  %v2216_v14 = vmul.f32 %v6418_v27, %v2207_v40  ;;  %2889 = vmatpush.msrb.mxu1 %v6147_v52  ;;  %v8750_v16 = vld [vmem:[#allocation15_spill] sm:$0xff] }
 0x10d   : > { %8746 = vst [vmem:[#allocation23_spill] sm:$0xff] %v6439_v63  ;;  %v835_v7 = vpop.f32.mrf.mxu0  ;;  %v896_v34 = vpop.f32.mrf.mxu1  ;;  %v2147_v8 = vadd.f32 %v2139_v59, %v2121_v0  ;;  %2737 = vmatpush.msra.mxu3 %v2736_v10  ;;  %v2243_v38 = vmul.f32 %v6435_v49, %v2182_v62  ;;  %2600 = vmatpush.msra.mxu2 %v6423_v47  ;;  %v8752_v47 = vld [vmem:[#allocation22_spill] sm:$0xff] }
 0x10e   : > { %v6453_v63 = vadd.f32 %v896_v34, %v832_v5  ;;  %v6455_v58 = vpop.f32.mrf.mxu2  ;;  %v2753_v1 = vsub.f32 %v6430_v24, %v8515_v48  ;;  %v573_v0 = vadd.f32 %v6078_v21, %v6057_v15  ;;  %v2096_v2 = vmul.f32 %v6244_v41, %v6391_v23  ;;  %v8749_v34 = vld [vmem:[#allocation25_spill] sm:$0xff]  ;;  %v6478_v15 = vld [vmem:[%s8386_s4 + $0x7] ss:$0 sm:$0xff]  ;;  %v8751_v21 = vld [vmem:[#allocation38_spill] sm:$0xff]  ;;  %2806 = vmatpush.msrb.mxu0 %v6180_v37 }
 0x10f   : > { %8748 = vst [vmem:[#allocation7_spill] sm:$0xff] %v6455_v58  ;;  %v2114_v59 = vmul.f32 %v6249_v20, %v2182_v62  ;;  %v2224_v11 = vadd.f32 %v2216_v14, %v2198_v35  ;;  %v2165_v10 = vmul.f32 %v6315_v53, %v2207_v40  ;;  %v2191_v5 = vmul.f32 %v6376_v55, %v2182_v62  ;;  %v2208_v58 = vld [vmem:[#allocation2 + $0x22] sm:$0xff] }
 0x110   : > { %2087 = vst [vmem:[#allocation2 + $0x41] sm:$0xff] %v6453_v63  ;;  %1711 = vmatmul.f32.gmra.mxu1 %v8750_v16  ;;  %v2748_v48 = vand.u32 4294901760, %v2747_v57  ;;  %v733_v42 = vadd.f32 %v8751_v21, %v655_v3  ;;  %2743 = vmatpush.msra.mxu3 %v2742_v32  ;;  %v2754_v62 = vand.u32 4294901760, %v2753_v1  ;;  %v8753_v14 = vand.u32 4294901760, %v6442_v13 }
 0x111   : > { %1574 = vmatmul.f32.gmra.mxu0 %v8749_v34  ;;  %1879 = vmatmul.f32.gmra.mxu3 %v5483_v46  ;;  %v2173_v35 = vadd.f32 %v2165_v10, %v2147_v8  ;;  %v2251_v57 = vadd.f32 %v2243_v38, %v2224_v11  ;;  %v660_v16 = vadd.f32 %v6082_v39, %v573_v0  ;;  %v8754_v46 = vand.u32 4294901760, %v6127_v19  ;;  %v6498_v39 = vld [vmem:[%s8386_s4 + $0x8] ss:$0 sm:$0xff] }
 0x112   : > { %1801 = vmatmul.f32.gmra.mxu2 %v8752_v47  ;;  %v2183_v40 = vld [vmem:[#allocation2 + $0x30] sm:$0xff]  ;;  %v2759_v34 = vsub.f32 %v6442_v13, %v8753_v14  ;;  %v2122_v17 = vadd.f32 %v2114_v59, %v2096_v2  ;;  %v836_v3 = vadd.f32 %v835_v7, %v733_v42  ;;  %2891 = vmatpush.msrb.mxu1 %v6166_v26  ;;  %v8755_v14 = vld [vmem:[#allocation28_spill] sm:$0xff] }
 0x113   : > { %2968 = vmatpush.msrb.mxu2 %v8754_v46  ;;  %v2199_v47 = vadd.f32 %v2191_v5, %v2173_v35  ;;  %2749 = vmatpush.msra.mxu3 %v2748_v48  ;;  %v2269_v1 = vmul.f32 %v6478_v15, %v6317_v43  ;;  %v2140_v7 = vmul.f32 %v6310_v22, %v6317_v43 }
 0x114   : > { %v6488_v21 = vpop.f32.mrf.mxu3  ;;  %2809 = vmatpush.msrb.mxu0 %v6204_v18  ;;  %v2097_v19 = vmul.f32 %v6244_v41, %v6453_v63  ;;  %v2115_v42 = vmul.f32 %v6249_v20, %v2183_v40  ;;  %2893 = vmatpush.msrb.mxu1 %v6187_v54  ;;  %v2217_v0 = vmul.f32 %v6418_v27, %v2208_v58  ;;  %v2760_v2 = vand.u32 4294901760, %v2759_v34 }
 0x115   : > { %v839_v8 = vpop.f32.mrf.mxu0  ;;  %v900_v32 = vpop.f32.mrf.mxu1  ;;  %2755 = vmatpush.msra.mxu3 %v2754_v62  ;;  %v2277_v59 = vadd.f32 %v2269_v1, %v2251_v57  ;;  %v2244_v11 = vmul.f32 %v6435_v49, %v2183_v40  ;;  %v2148_v43 = vadd.f32 %v2140_v7, %v2122_v17  ;;  %v739_v10 = vadd.f32 %v6073_v4, %v660_v16 }
 0x116   : > { %v6506_v38 = vadd.f32 %v900_v32, %v836_v3  ;;  %v6508_v48 = vpop.f32.mrf.mxu2  ;;  %2812 = vmatpush.msrb.mxu0 %v6216_v12  ;;  %v577_v5 = vadd.f32 %v6101_v60, %v6076_v31  ;;  %v2225_v35 = vadd.f32 %v2217_v0, %v2199_v47  ;;  %v8756_v3 = vld [vmem:[#allocation19_spill] sm:$0xff]  ;;  %v2295_v62 = vmul.f32 %v6498_v39, %v2208_v58 }
 0x117   : > { %v2166_v34 = vmul.f32 %v6315_v53, %v2208_v58  ;;  %v2192_v57 = vmul.f32 %v6376_v55, %v2183_v40  ;;  %v2123_v46 = vadd.f32 %v2115_v42, %v2097_v19  ;;  %2761 = vmatpush.msra.mxu3 %v2760_v2  ;;  %2895 = vmatpush.msrb.mxu1 %v6198_v61  ;;  %v2184_v16 = vld [vmem:[#allocation2 + $0x40] sm:$0xff]  ;;  %v8757_v7 = vand.u32 4294901760, %v6144_v36 }
 0x118   : > { %2088 = vst [vmem:[#allocation2 + $0x51] sm:$0xff] %v6506_v38  ;;  %1715 = vmatmul.f32.gmra.mxu1 %v8756_v3  ;;  %v2303_v4 = vadd.f32 %v2295_v62, %v2277_v59  ;;  %v2252_v17 = vadd.f32 %v2244_v11, %v2225_v35  ;;  %v2141_v60 = vmul.f32 %v6310_v22, %v6391_v23  ;;  %v8759_v11 = vld [vmem:[#allocation16_spill] sm:$0xff] }
 0x119   : > { %1582 = vmatmul.f32.gmra.mxu0 %v8755_v14  ;;  %1885 = vmatmul.f32.gmra.mxu3 %v5551_v28  ;;  %v2174_v31 = vadd.f32 %v2166_v34, %v2148_v43  ;;  %v840_v47 = vadd.f32 %v839_v8, %v739_v10  ;;  %v665_v28 = vadd.f32 %v6104_v50, %v577_v5  ;;  %v8758_v50 = vld [vmem:[#allocation9_spill] sm:$0xff]  ;;  %v8760_v5 = vld [vmem:[#allocation39_spill] sm:$0xff]  ;;  %v8761_v14 = vld [vmem:[#allocation32_spill] sm:$0xff] }
 0x11a   : > { %1806 = vmatmul.f32.gmra.mxu2 %v5526_v9  ;;  %2815 = vmatpush.msrb.mxu0 %v6235_v33  ;;  %v2209_v9 = vld [vmem:[#allocation2 + $0x32] sm:$0xff]  ;;  %v2270_v1 = vmul.f32 %v6478_v15, %v6391_v23  ;;  %v581_v8 = vadd.f32 %v6140_v30, %v6099_v25  ;;  %v2149_v42 = vadd.f32 %v2141_v60, %v2123_v46  ;;  %v6548_v59 = vand.u32 4294901760, %v2303_v4  ;;  %v8762_v62 = vld [vmem:[#allocation24_spill] sm:$0xff] }
 0x11b   : > { %3063 = vmatpush.msrb.mxu3 %v6115_v45  ;;  %2897 = vmatpush.msrb.mxu1 %v6218_v44  ;;  %v2200_v19 = vadd.f32 %v2192_v57, %v2174_v31  ;;  %v2098_v2 = vmul.f32 %v6244_v41, %v6506_v38  ;;  %v2116_v23 = vmul.f32 %v6249_v20, %v2184_v16  ;;  %v8763_v34 = vld [vmem:[#allocation41_spill] sm:$0xff]  ;;  %v2210_v31 = vld [vmem:[#allocation2 + $0x42] sm:$0xff] }
 0x11c   : > { %v6528_v32 = vpop.f32.mrf.mxu3  ;;  %2972 = vmatpush.msrb.mxu2 %v8757_v7  ;;  %2818 = vmatpush.msrb.mxu0 %v8758_v50  ;;  %v2278_v36 = vadd.f32 %v2270_v1, %v2252_v17  ;;  %v2218_v25 = vmul.f32 %v6418_v27, %v2209_v9  ;;  %v2167_v30 = vmul.f32 %v6315_v53, %v2209_v9  ;;  %v8764_v60 = vld [vmem:[#allocation29_spill] sm:$0xff] }
 0x11d   : > { %v843_v58 = vpop.f32.mrf.mxu0  ;;  %v904_v40 = vpop.f32.mrf.mxu1  ;;  %3065 = vmatpush.msrb.mxu3 %v6130_v51  ;;  %2899 = vmatpush.msrb.mxu1 %v8759_v11  ;;  %v2193_v43 = vmul.f32 %v6376_v55, %v2184_v16  ;;  %v2245_v10 = vmul.f32 %v6435_v49, %v2184_v16  ;;  %v745_v35 = vadd.f32 %v8760_v5, %v665_v28 }
 0x11e   : > { %v6540_v0 = vadd.f32 %v904_v40, %v840_v47  ;;  %v6542_v45 = vpop.f32.mrf.mxu2  ;;  %v2296_v51 = vmul.f32 %v6498_v39, %v2209_v9  ;;  %v670_v57 = vadd.f32 %v8763_v34, %v581_v8  ;;  %v2226_v46 = vadd.f32 %v2218_v25, %v2200_v19  ;;  %v8765_v47 = vld [vmem:[#allocation27_spill] sm:$0xff]  ;;  %v8767_v25 = vld [vmem:[#allocation8_spill] sm:$0xff] }
 0x11f   : > { %v2175_v17 = vadd.f32 %v2167_v30, %v2149_v42  ;;  %v2124_v40 = vadd.f32 %v2116_v23, %v2098_v2  ;;  %v2142_v16 = vmul.f32 %v6310_v22, %v6453_v63  ;;  %v2185_v28 = vld [vmem:[#allocation2 + $0x50] sm:$0xff]  ;;  %v6567_v1 = vsub.f32 %v2303_v4, %v6548_v59  ;;  %3067 = vmatpush.msrb.mxu3 %v6147_v52 }
 0x120   : > { %2089 = vst [vmem:[#allocation2 + $0x61] sm:$0xff] %v6540_v0  ;;  %1719 = vmatmul.f32.gmra.mxu1 %v8762_v62  ;;  %v2304_v7 = vadd.f32 %v2296_v51, %v2278_v36  ;;  %v844_v8 = vadd.f32 %v843_v58, %v745_v35  ;;  %v2253_v42 = vadd.f32 %v2245_v10, %v2226_v46  ;;  %v8768_v30 = vand.u32 4294901760, %v6163_v56  ;;  %v8769_v58 = vld [vmem:[#allocation10_spill] sm:$0xff]  ;;  %v8773_v46 = vld [vmem:[#allocation40_spill] sm:$0xff] }
 0x121   : > { %1590 = vmatmul.f32.gmra.mxu0 %v8761_v14  ;;  %1891 = vmatmul.f32.gmra.mxu3 %v8764_v60  ;;  %8766 = vst [vmem:[#allocation21_spill] sm:$0xff] %v6567_v1  ;;  %v2201_v9 = vadd.f32 %v2193_v43, %v2175_v17  ;;  %v2219_v2 = vmul.f32 %v6418_v27, %v2210_v31  ;;  %v8770_v35 = vand.u32 4294901760, %v6180_v37  ;;  %v8771_v14 = vld [vmem:[#allocation35_spill] sm:$0xff] }
 0x122   : > { %1811 = vmatmul.f32.gmra.mxu2 %v8765_v47  ;;  %2821 = vmatpush.msrb.mxu0 %v8767_v25  ;;  %v2099_v23 = vmul.f32 %v6244_v41, %v6540_v0  ;;  %v2271_v52 = vmul.f32 %v6478_v15, %v6453_v63  ;;  %v2117_v36 = vmul.f32 %v6249_v20, %v2185_v28  ;;  %v8520_v63 = vand.u32 4294901760, %v6567_v1 }
 0x123   : > { %2976 = vmatpush.msrb.mxu2 %v8768_v30  ;;  %3069 = vmatpush.msrb.mxu3 %v6166_v26  ;;  %v2246_v10 = vmul.f32 %v6435_v49, %v2185_v28  ;;  %v2150_v51 = vadd.f32 %v2142_v16, %v2124_v40  ;;  %v8772_v26 = vld [vmem:[#allocation45_spill] sm:$0xff]  ;;  %v2227_v34 = vadd.f32 %v2219_v2, %v2201_v9  ;;  %v6596_v60 = vand.u32 4294901760, %v2304_v7 }
 0x124   : > { %v6570_v19 = vpop.f32.mrf.mxu3  ;;  %2901 = vmatpush.msrb.mxu1 %v8769_v58  ;;  %2824 = vmatpush.msrb.mxu0 %v8771_v14  ;;  %v751_v17 = vadd.f32 %v8773_v46, %v670_v57  ;;  %v2279_v47 = vadd.f32 %v2271_v52, %v2253_v42  ;;  %v2168_v37 = vmul.f32 %v6315_v53, %v2210_v31  ;;  %v8774_v16 = vld [vmem:[#allocation5_spill] sm:$0xff]  ;;  %v8777_v57 = vld [vmem:[#allocation31_spill] sm:$0xff]  ;;  %v8778_v46 = vand.u32 4294901760, %v6204_v18 }
 0x125   : > { %v847_v4 = vpop.f32.mrf.mxu0  ;;  %v908_v5 = vpop.f32.mrf.mxu1  ;;  %2980 = vmatpush.msrb.mxu2 %v8770_v35  ;;  %3071 = vmatpush.msrb.mxu3 %v6187_v54  ;;  %v2143_v40 = vmul.f32 %v6310_v22, %v6506_v38  ;;  %v8775_v54 = vld [vmem:[#allocation26_spill] sm:$0xff]  ;;  %v2125_v30 = vadd.f32 %v2117_v36, %v2099_v23  ;;  %v8776_v9 = vld [vmem:[#allocation33_spill] sm:$0xff]  ;;  %v2297_v2 = vmul.f32 %v6498_v39, %v2210_v31 }
 0x126   : > { %v6583_v43 = vadd.f32 %v908_v5, %v844_v8  ;;  %v6585_v56 = vpop.f32.mrf.mxu2  ;;  %2903 = vmatpush.msrb.mxu1 %v8772_v26  ;;  %v2194_v8 = vmul.f32 %v6376_v55, %v2185_v28  ;;  %v2254_v5 = vadd.f32 %v2246_v10, %v2227_v34  ;;  %v2176_v42 = vadd.f32 %v2168_v37, %v2150_v51  ;;  %v2211_v52 = vld [vmem:[#allocation2 + $0x52] sm:$0xff]  ;;  %v8781_v34 = vld [vmem:[#allocation4_spill] sm:$0xff]  ;;  %v8782_v37 = vld [vmem:[#allocation43_spill] sm:$0xff] }
 0x127   : > { %v2604_v28 = vsub.f32 %v6567_v1, %v8520_v63  ;;  %v2272_v35 = vmul.f32 %v6478_v15, %v6506_v38  ;;  %2984 = vmatpush.msrb.mxu2 %v8778_v46  ;;  %3073 = vmatpush.msrb.mxu3 %v6198_v61  ;;  %v2186_v23 = vld [vmem:[#allocation2 + $0x60] sm:$0xff]  ;;  %v848_v36 = vadd.f32 %v847_v4, %v751_v17  ;;  %v8780_v51 = vld [vmem:[#allocation46_spill] sm:$0xff]  ;;  %v8784_v61 = vand.u32 4294901760, %v6216_v12 }
 0x128   : > { %2090 = vst [vmem:[#allocation2 + $0x71] sm:$0xff] %v6583_v43  ;;  %1723 = vmatmul.f32.gmra.mxu1 %v8775_v54  ;;  %v6618_v31 = vsub.f32 %v2304_v7, %v6596_v60  ;;  %v2305_v10 = vadd.f32 %v2297_v2, %v2279_v47  ;;  %2827 = vmatpush.msrb.mxu0 %v8780_v51  ;;  %v8786_v63 = vld [vmem:[#allocation14_spill] sm:$0xff]  ;;  %v2212_v1 = vld [vmem:[#allocation2 + $0x62] sm:$0xff] }
 0x129   : > { %1598 = vmatmul.f32.gmra.mxu0 %v8774_v16  ;;  %1897 = vmatmul.f32.gmra.mxu3 %v8776_v9  ;;  %v8783_v9 = vld [vmem:[#allocation42_spill] sm:$0xff]  ;;  %v2220_v4 = vmul.f32 %v6418_v27, %v2211_v52  ;;  %v2151_v7 = vadd.f32 %v2143_v40, %v2125_v30  ;;  %v2280_v2 = vadd.f32 %v2272_v35, %v2254_v5 }
 0x12a   : > { %1816 = vmatmul.f32.gmra.mxu2 %v8777_v57  ;;  %2905 = vmatpush.msrb.mxu1 %v8781_v34  ;;  %v1127_v38 = vadd.f32 %v8783_v9, %v8782_v37  ;;  %v2202_v57 = vadd.f32 %v2194_v8, %v2176_v42  ;;  %v2100_v8 = vmul.f32 %v6244_v41, %v6583_v43  ;;  %v8787_v37 = vand.u32 4294901760, %v6235_v33  ;;  %v8789_v33 = vld [vmem:[#allocation3_spill] sm:$0xff] }
 0x12b   : > { %2988 = vmatpush.msrb.mxu2 %v8784_v61  ;;  %3075 = vmatpush.msrb.mxu3 %v6218_v44  ;;  %v2118_v42 = vmul.f32 %v6249_v20, %v2186_v23  ;;  %v2247_v12 = vmul.f32 %v6435_v49, %v2186_v23  ;;  %v2605_v44 = vand.u32 4294901760, %v2604_v28  ;;  %v6642_v30 = vand.u32 4294901760, %v2305_v10  ;;  %v8790_v61 = vld [vmem:[#allocation12_spill] sm:$0xff] }
 0x12c   : > { %v6615_v16 = vpop.f32.mrf.mxu3  ;;  %2830 = vmatpush.msrb.mxu0 %v8786_v63  ;;  %v2298_v5 = vmul.f32 %v6498_v39, %v2211_v52  ;;  %v2228_v35 = vadd.f32 %v2220_v4, %v2202_v57  ;;  %v2195_v9 = vmul.f32 %v6376_v55, %v2186_v23  ;;  %v2144_v28 = vmul.f32 %v6310_v22, %v6540_v0 }
 0x12d   : > { %8779 = vst [vmem:[#allocation18_spill] sm:$0xff] %v6615_v16  ;;  %v912_v18 = vpop.f32.mrf.mxu1  ;;  %v1208_v46 = vpop.f32.mrf.mxu0  ;;  %2992 = vmatpush.msrb.mxu2 %v8787_v37  ;;  %3077 = vmatpush.msrb.mxu3 %v8759_v11  ;;  %v8791_v11 = vld [vmem:[#allocation44_spill] sm:$0xff]  ;;  %v2126_v4 = vadd.f32 %v2118_v42, %v2100_v8  ;;  %v8792_v23 = vand.u32 4294901760, %v8758_v50  ;;  %v6661_v54 = vsub.f32 %v2305_v10, %v6642_v30 }
 0x12e   : > { %v6628_v17 = vadd.f32 %v912_v18, %v848_v36  ;;  %v6630_v47 = vpop.f32.mrf.mxu2  ;;  %v2169_v36 = vmul.f32 %v6315_v53, %v2211_v52  ;;  %v8788_v18 = vld [vmem:[#allocation30_spill] sm:$0xff]  ;;  %v1131_v37 = vadd.f32 %v8791_v11, %v8790_v61  ;;  %v2306_v40 = vadd.f32 %v2298_v5, %v2280_v2  ;;  %2833 = vmatpush.msrb.mxu0 %v6383_v6 }
 0x12f   : > { %8785 = vst [vmem:[#allocation25_spill] sm:$0xff] %v6630_v47  ;;  %v2187_v52 = vld [vmem:[#allocation2 + $0x70] sm:$0xff]  ;;  %v2255_v16 = vadd.f32 %v2247_v12, %v2228_v35  ;;  %2996 = vmatpush.msrb.mxu2 %v8792_v23  ;;  %3079 = vmatpush.msrb.mxu3 %v8769_v58  ;;  %v8793_v61 = vand.u32 4294901760, %v6618_v31  ;;  %v2221_v2 = vmul.f32 %v6418_v27, %v2212_v1  ;;  %v8796_v35 = vld [vmem:[#allocation20_spill] sm:$0xff] }
 0x130   : > { %2091 = vst [vmem:[#allocation2 + $0x81] sm:$0xff] %v6628_v17  ;;  %1727 = vmatmul.f32.gmra.mxu1 %v8788_v18  ;;  %v2177_v57 = vadd.f32 %v2169_v36, %v2151_v7  ;;  %v1209_v18 = vadd.f32 %v1208_v46, %v1127_v38  ;;  %v2273_v58 = vmul.f32 %v6478_v15, %v6540_v0  ;;  %v8795_v38 = vand.u32 4294901760, %v8767_v25 }
 0x131   : > { %1966 = vmatmul.f32.vlgmr.msra.gmra.mxu0 %v8789_v33  ;;  %2763 = vmatmul.f32.vlgmr.msra.gmra.mxu3 %v6548_v59  ;;  %v2612_v11 = vsub.f32 %v6618_v31, %v8793_v61  ;;  %v2101_v10 = vmul.f32 %v6244_v41, %v6628_v17  ;;  %v2119_v46 = vmul.f32 %v6249_v20, %v2187_v52  ;;  %v6674_v5 = vand.u32 4294901760, %v2306_v40 }
 0x132   : > { %2606 = vmatmul.f32.vlgmr.msra.gmra.mxu2 %v2605_v44  ;;  %v8794_v44 = vld [vmem:[#allocation13_spill] sm:$0xff]  ;;  %v2203_v7 = vadd.f32 %v2195_v9, %v2177_v57  ;;  %3081 = vmatpush.msrb.mxu3 %v8772_v26  ;;  %v2152_v36 = vadd.f32 %v2144_v28, %v2126_v4  ;;  %v2281_v9 = vadd.f32 %v2273_v58, %v2255_v16  ;;  %v8797_v25 = vand.u32 4294901760, %v8771_v14  ;;  %v8798_v28 = vld [vmem:[#allocation6_spill] sm:$0xff] }
 0x133   : > { %2907 = vmatpush.msrb.mxu1 %v8794_v44  ;;  %3000 = vmatpush.msrb.mxu2 %v8795_v38  ;;  %v2248_v0 = vmul.f32 %v6435_v49, %v2187_v52  ;;  %v2170_v26 = vmul.f32 %v6315_v53, %v2212_v1  ;;  %v2613_v57 = vand.u32 4294901760, %v2612_v11  ;;  %v8532_v20 = vand.u32 4294901760, %v6661_v54 }
 0x134   : > { %v1458_v47 = vpop.f32.mrf.mxu3  ;;  %3083 = vmatpush.msrb.mxu3 %v8781_v34  ;;  %2836 = vmatpush.msrb.mxu0 %v6386_v29  ;;  %v2196_v23 = vmul.f32 %v6376_v55, %v2187_v52  ;;  %v2299_v14 = vmul.f32 %v6498_v39, %v2212_v1  ;;  %v2127_v16 = vadd.f32 %v2119_v46, %v2101_v10  ;;  %v8799_v52 = vand.u32 4294901760, %v8780_v51 }
 0x135   : > { %v1213_v50 = vpop.f32.mrf.mxu0  ;;  %v1282_v8 = vpop.f32.mrf.mxu1  ;;  %2909 = vmatpush.msrb.mxu1 %v8796_v35  ;;  %3004 = vmatpush.msrb.mxu2 %v8797_v25  ;;  %v6692_v34 = vsub.f32 %v2306_v40, %v6674_v5  ;;  %v2178_v61 = vadd.f32 %v2170_v26, %v2152_v36  ;;  %v2145_v1 = vmul.f32 %v6310_v22, %v6583_v43  ;;  %v8801_v22 = vld [vmem:[#allocation37_spill] sm:$0xff] }
 0x136   : > { %v1283_v42 = vadd.f32 %v1282_v8, %v1209_v18  ;;  %v1393_v12 = vpop.f32.mrf.mxu2  ;;  %v2229_v18 = vadd.f32 %v2221_v2, %v2203_v7  ;;  %v2307_v11 = vadd.f32 %v2299_v14, %v2281_v9  ;;  %3085 = vmatpush.msrb.mxu3 %v8794_v44  ;;  %v1214_v2 = vadd.f32 %v1213_v50, %v1131_v37  ;;  %v8802_v37 = vld [vmem:[#allocation17_spill] sm:$0xff]  ;;  %v8803_v9 = vld [vmem:[#allocation36_spill] sm:$0xff] }
 0x137   : > { %3008 = vmatpush.msrb.mxu2 %v8799_v52  ;;  %v2620_v40 = vsub.f32 %v6661_v54, %v8532_v20  ;;  %v2204_v58 = vadd.f32 %v2196_v23, %v2178_v61  ;;  %v2274_v51 = vmul.f32 %v6478_v15, %v6583_v43  ;;  %v8800_v44 = vand.u32 4294901760, %v8786_v63  ;;  %2911 = vmatpush.msrb.mxu1 %v8803_v9  ;;  %v8805_v23 = vld [vmem:[#allocation47_spill] sm:$0xff] }
 0x138   : > { %v1394_v41 = vadd.f32 %v1393_v12, %v1283_v42  ;;  %2031 = vmatmul.f32.vlgmr.msra.gmra.mxu1 %v8789_v33  ;;  %v2256_v7 = vadd.f32 %v2248_v0, %v2229_v18  ;;  %v2213_v33 = vld [vmem:[#allocation2 + $0x72] sm:$0xff]  ;;  %3087 = vmatpush.msrb.mxu3 %v8796_v35  ;;  %v1135_v50 = vadd.f32 %v8802_v37, %v8801_v22  ;;  %v8531_v36 = vand.u32 4294901760, %v6692_v34  ;;  %v8808_v37 = vld [vmem:[#allocation7_spill] sm:$0xff] }
 0x139   : > { %1970 = vmatmul.f32.gmra.mxu0 %v8798_v28  ;;  %2767 = vmatmul.f32.gmra.mxu3 %v6596_v60  ;;  %v2153_v46 = vadd.f32 %v2145_v1, %v2127_v16  ;;  %v2222_v0 = vmul.f32 %v6418_v27, %v2213_v33  ;;  %v6714_v43 = vand.u32 4294901760, %v2307_v11  ;;  %v8804_v35 = vand.u32 4294901760, %v6383_v6  ;;  %v8806_v16 = vld [vmem:[#allocation11_spill] sm:$0xff] }
 0x13a   : > { %v6688_v4 = vadd.f32 %v1458_v47, %v1394_v41  ;;  %2614 = vmatmul.f32.gmra.mxu2 %v2613_v57  ;;  %v2188_v47 = vld [vmem:[#allocation2 + $0x80] sm:$0xff]  ;;  %2839 = vmatpush.msrb.mxu0 %v6430_v24  ;;  %v2282_v63 = vadd.f32 %v2274_v51, %v2256_v7  ;;  %v2171_v26 = vmul.f32 %v6315_v53, %v2213_v33  ;;  %v2621_v18 = vand.u32 4294901760, %v2620_v40 }
 0x13b   : > { %3012 = vmatpush.msrb.mxu2 %v8800_v44  ;;  %v2249_v25 = vmul.f32 %v6435_v49, %v2188_v47  ;;  %3089 = vmatpush.msrb.mxu3 %v8803_v9  ;;  %v2197_v41 = vmul.f32 %v6376_v55, %v2188_v47  ;;  %v2230_v14 = vadd.f32 %v2222_v0, %v2204_v58  ;;  %v6730_v53 = vld [vmem:[%s8387_s5 + $0x4] ss:$0 sm:$0xff]  ;;  %v6735_v55 = vld [vmem:[%s8387_s5] ss:$0 sm:$0xff]  ;;  %v6740_v7 = vld [vmem:[%s8387_s5 + $0x1] ss:$0 sm:$0xff] }
 0x13c   : > { %2311 = vst [vmem:[#allocation2 + $0x11] sm:$0xff] %v6688_v4  ;;  %v1462_v8 = vpop.f32.mrf.mxu3  ;;  %2842 = vmatpush.msrb.mxu0 %v6442_v13  ;;  %2913 = vmatpush.msrb.mxu1 %v8805_v23  ;;  %v2300_v6 = vmul.f32 %v6498_v39, %v2213_v33  ;;  %v2179_v61 = vadd.f32 %v2171_v26, %v2153_v46  ;;  %v2214_v33 = vld [vmem:[#allocation2 + $0x82] sm:$0xff]  ;;  %v8807_v58 = vand.u32 4294901760, %v6386_v29  ;;  %v8810_v9 = vand.u32 4294901760, %v6430_v24  ;;  %v8811_v0 = vld [vmem:[#allocation34_spill] sm:$0xff] }
 0x13d   : > { %v1218_v38 = vpop.f32.mrf.mxu0  ;;  %v1288_v10 = vpop.f32.mrf.mxu1  ;;  %3016 = vmatpush.msrb.mxu2 %v8804_v35  ;;  %v6749_v47 = vsub.f32 %v2307_v11, %v6714_v43  ;;  %v2257_v40 = vadd.f32 %v2249_v25, %v2230_v14  ;;  %3091 = vmatpush.msrb.mxu3 %v8805_v23  ;;  %v8809_v46 = vld [vmem:[#allocation23_spill] sm:$0xff]  ;;  %v2275_v29 = vmul.f32 %v6478_v15, %v6628_v17 }
 0x13e   : > { %v1289_v42 = vadd.f32 %v1288_v10, %v1214_v2  ;;  %v1397_v12 = vpop.f32.mrf.mxu2  ;;  %v2308_v2 = vadd.f32 %v2300_v6, %v2282_v63  ;;  %v1219_v10 = vadd.f32 %v1218_v38, %v1135_v50  ;;  %v1139_v11 = vadd.f32 %v8809_v46, %v8808_v37  ;;  %2915 = vmatpush.msrb.mxu1 %v8811_v0  ;;  %v2293_v46 = vld [vmem:[#allocation2 + $0x92] sm:$0xff] }
 0x13f   : > { %3020 = vmatpush.msrb.mxu2 %v8807_v58  ;;  %3093 = vmatpush.msrb.mxu3 %v8811_v0  ;;  %v2223_v38 = vmul.f32 %v6418_v27, %v2214_v33  ;;  %v2366_v63 = vmul.f32 %v6740_v7, %v6688_v4  ;;  %v8529_v26 = vand.u32 4294901760, %v6749_v47  ;;  %v2283_v17 = vadd.f32 %v2275_v29, %v2257_v40  ;;  %v8813_v58 = vld [vmem:[#allocation15_spill] sm:$0xff] }
 0x140   : > { %v1398_v57 = vadd.f32 %v1397_v12, %v1289_v42  ;;  %2035 = vmatmul.f32.gmra.mxu1 %v8798_v28  ;;  %v2628_v28 = vsub.f32 %v6692_v34, %v8531_v36  ;;  %v8812_v27 = vand.u32 4294901760, %v6442_v13  ;;  %v2301_v40 = vmul.f32 %v6498_v39, %v2214_v33 }
 0x141   : > { %1974 = vmatmul.f32.gmra.mxu0 %v8806_v16  ;;  %2771 = vmatmul.f32.gmra.mxu3 %v6642_v30  ;;  %v2636_v13 = vsub.f32 %v6749_v47, %v8529_v26 }
 0x142   : > { %v1463_v52 = vadd.f32 %v1462_v8, %v1398_v57  ;;  %2622 = vmatmul.f32.gmra.mxu2 %v2621_v18  ;;  %v2205_v8 = vadd.f32 %v2197_v41, %v2179_v61  ;;  %v6769_v41 = vand.u32 4294901760, %v2308_v2  ;;  %v6771_v57 = vld [vmem:[#allocation2] sm:$0xff]  ;;  %v2629_v6 = vand.u32 4294901760, %v2628_v28  ;;  %v2267_v61 = vld [vmem:[#allocation2 + $0x91] sm:$0xff] }
 0x143   : > { %v6746_v1 = vld [vmem:[#allocation2 + $0x10] sm:$0xff]  ;;  %3024 = vmatpush.msrb.mxu2 %v8810_v9  ;;  %v2250_v24 = vmul.f32 %v6771_v57, %v6435_v49  ;;  %v2309_v28 = vadd.f32 %v2301_v40, %v2283_v17 }
 0x144   : > { %2312 = vst [vmem:[#allocation2 + $0x21] sm:$0xff] %v1463_v52  ;;  %v2322_v51 = vmul.f32 %v6730_v53, %v1463_v52  ;;  %v2340_v44 = vmul.f32 %v6735_v55, %v6746_v1  ;;  %v1466_v22 = vpop.f32.mrf.mxu3  ;;  %v2231_v18 = vadd.f32 %v2223_v38, %v2205_v8  ;;  %v6789_v8 = vsub.f32 %v2308_v2, %v6769_v41 }
 0x145   : > { %v1223_v42 = vpop.f32.mrf.mxu0  ;;  %v1294_v12 = vpop.f32.mrf.mxu1  ;;  %3028 = vmatpush.msrb.mxu2 %v8812_v27  ;;  %v2367_v0 = vmul.f32 %v6740_v7, %v1463_v52 }
 0x146   : > { %v2348_v50 = vadd.f32 %v2340_v44, %v2322_v51  ;;  %v1295_v25 = vadd.f32 %v1294_v12, %v1219_v10  ;;  %v1401_v35 = vpop.f32.mrf.mxu2  ;;  %v2276_v51 = vmul.f32 %v6478_v15, %v2267_v61  ;;  %v1224_v44 = vadd.f32 %v1223_v42, %v1139_v11 }
 0x147   : > { %v2258_v37 = vadd.f32 %v2250_v24, %v2231_v18  ;;  %v1143_v15 = vadd.f32 %v6488_v21, %v6508_v48  ;;  %v8525_v11 = vand.u32 4294901760, %v6789_v8  ;;  %v6799_v42 = vand.u32 4294901760, %v2309_v28 }
 0x148   : > { %v6777_v23 = vadd.f32 %v2366_v63, %v2348_v50  ;;  %v1402_v14 = vadd.f32 %v1401_v35, %v1295_v25  ;;  %2039 = vmatmul.f32.gmra.mxu1 %v8806_v16  ;;  %v2302_v50 = vmul.f32 %v6498_v39, %v2293_v46  ;;  %v2637_v35 = vand.u32 4294901760, %v2636_v13 }
 0x149   : > { %1978 = vmatmul.f32.gmra.mxu0 %v8813_v58  ;;  %2775 = vmatmul.f32.gmra.mxu3 %v6674_v5  ;;  %8814 = vst [vmem:[#allocation38_spill] sm:$0xff] %v6799_v42  ;;  %v2284_v17 = vadd.f32 %v2276_v51, %v2258_v37  ;;  %v2644_v48 = vsub.f32 %v6789_v8, %v8525_v11 }
 0x14a   : > { %v1467_v10 = vadd.f32 %v1466_v22, %v1402_v14  ;;  %2630 = vmatmul.f32.gmra.mxu2 %v2629_v6  ;;  %v6813_v39 = vsub.f32 %v2309_v28, %v6799_v42  ;;  %v1147_v28 = vadd.f32 %v6528_v32, %v6542_v45 }
 0x14b   : > { %v6783_v49 = vld [vmem:[#allocation2 + $0x20] sm:$0xff]  ;;  %v2310_v6 = vadd.f32 %v2302_v50, %v2284_v17  ;;  %v2645_v37 = vand.u32 4294901760, %v2644_v48  ;;  %v1151_v17 = vadd.f32 %v6570_v19, %v6585_v56  ;;  %v2550_v56 = vld [vmem:[%s8388_s6 + $0x68] sm:$0xff] }
 0x14c   : > { %2313 = vst [vmem:[#allocation2 + $0x31] sm:$0xff] %v1467_v10  ;;  %v2323_v16 = vmul.f32 %v6730_v53, %v1467_v10  ;;  %v2341_v33 = vmul.f32 %v6735_v55, %v6783_v49  ;;  %v1470_v22 = vpop.f32.mrf.mxu3  ;;  %v2368_v13 = vmul.f32 %v6740_v7, %v1467_v10 }
 0x14d   : > { %v1228_v12 = vpop.f32.mrf.mxu0  ;;  %v1300_v29 = vpop.f32.mrf.mxu1  ;;  %8815 = vst [vmem:[#allocation22_spill] sm:$0xff] %v6813_v39  ;;  %v6824_v46 = vand.u32 4294901760, %v2310_v6 }
 0x14e   : > { %v2349_v9 = vadd.f32 %v2341_v33, %v2323_v16  ;;  %v1301_v2 = vadd.f32 %v1300_v29, %v1224_v44  ;;  %v1405_v38 = vpop.f32.mrf.mxu2  ;;  %v1229_v24 = vadd.f32 %v1228_v12, %v1143_v15  ;;  %v8524_v16 = vand.u32 4294901760, %v6813_v39 }
 0x14f   : > { %8817 = vst [vmem:[#allocation19_spill] sm:$0xff] %v6824_v46 }
 0x150   : > { %v6802_v63 = vadd.f32 %v2367_v0, %v2349_v9  ;;  %v1406_v25 = vadd.f32 %v1405_v38, %v1301_v2  ;;  %2043 = vmatmul.f32.gmra.mxu1 %v8813_v58  ;;  %v2652_v32 = vsub.f32 %v6813_v39, %v8524_v16 }
 0x151   : > { %1982 = vmatmul.f32.gmra.mxu0 %v8756_v3  ;;  %2779 = vmatmul.f32.gmra.mxu3 %v6714_v43 }
 0x152   : > { %v1471_v52 = vadd.f32 %v1470_v22, %v1406_v25  ;;  %2638 = vmatmul.f32.gmra.mxu2 %v2637_v35 }
 0x153   : > { %v6807_v21 = vld [vmem:[#allocation2 + $0x30] sm:$0xff] }
 0x154   : > { %2314 = vst [vmem:[#allocation2 + $0x41] sm:$0xff] %v1471_v52  ;;  %v2324_v27 = vmul.f32 %v6730_v53, %v1471_v52  ;;  %v2342_v18 = vmul.f32 %v6735_v55, %v6807_v21  ;;  %v1474_v14 = vpop.f32.mrf.mxu3  ;;  %v2369_v50 = vmul.f32 %v6740_v7, %v1471_v52  ;;  %v8820_v52 = vld [vmem:[#allocation26_spill] sm:$0xff] }
 0x155   : > { %v1233_v61 = vpop.f32.mrf.mxu0  ;;  %v1306_v58 = vpop.f32.mrf.mxu1 }
 0x156   : > { %v2350_v40 = vadd.f32 %v2342_v18, %v2324_v27  ;;  %v1307_v51 = vadd.f32 %v1306_v58, %v1229_v24  ;;  %v1409_v44 = vpop.f32.mrf.mxu2  ;;  %v1234_v45 = vadd.f32 %v1233_v61, %v1147_v28  ;;  %v2653_v27 = vand.u32 4294901760, %v2652_v32 }
 0x158   : > { %v6822_v33 = vadd.f32 %v2368_v13, %v2350_v40  ;;  %v1410_v22 = vadd.f32 %v1409_v44, %v1307_v51  ;;  %2047 = vmatmul.f32.gmra.mxu1 %v8756_v3  ;;  %v6838_v3 = vsub.f32 %v2310_v6, %v6824_v46  ;;  %v2551_v6 = vld [vmem:[%s8388_s6 + $0x70] sm:$0xff]  ;;  %v2549_v40 = vld [vmem:[%s8388_s6 + $0x60] sm:$0xff]  ;;  %v6876_v44 = vand.u32 4294901760, %v2550_v56 }
 0x159   : > { %1986 = vmatmul.f32.gmra.mxu0 %v8762_v62  ;;  %2783 = vmatmul.f32.gmra.mxu3 %v6769_v41  ;;  %v6856_v19 = vand.u32 4294901760, %v2551_v6  ;;  %v6878_v28 = vand.u32 4294901760, %v2549_v40 }
 0x15a   : > { %8816 = vst [vmem:[#allocation28_spill] sm:$0xff] %v6822_v33  ;;  %v1475_v12 = vadd.f32 %v1474_v14, %v1410_v22  ;;  %2646 = vmatmul.f32.gmra.mxu2 %v2645_v37  ;;  %v8523_v18 = vand.u32 4294901760, %v6838_v3  ;;  %v2552_v14 = vld [vmem:[%s8388_s6 + $0x78] sm:$0xff] }
 0x15b   : > { %v6829_v10 = vld [vmem:[#allocation2 + $0x40] sm:$0xff]  ;;  %8819 = vst [vmem:[#allocation16_spill] sm:$0xff] %v6838_v3  ;;  %v6854_v61 = vand.u32 4294901760, %v2552_v14  ;;  %v6874_v51 = vsub.f32 %v2551_v6, %v6856_v19  ;;  %v8825_v6 = vld [vmem:[#allocation18_spill] sm:$0xff] }
 0x15c   : > { %8818 = vst [vmem:[#allocation9_spill] sm:$0xff] %v6829_v10  ;;  %v2325_v29 = vmul.f32 %v6730_v53, %v1475_v12  ;;  %v2343_v9 = vmul.f32 %v6735_v55, %v6829_v10  ;;  %v1478_v0 = vpop.f32.mrf.mxu3 }
 0x15d   : > { %2315 = vst [vmem:[#allocation2 + $0x51] sm:$0xff] %v1475_v12  ;;  %v1238_v2 = vpop.f32.mrf.mxu0  ;;  %v1312_v38 = vpop.f32.mrf.mxu1  ;;  %3128 = vmatpush.msra.mxu0 %v6854_v61  ;;  %3443 = vmatpush.msra.mxu3 %v6854_v61 }
 0x15e   : > { %v2351_v15 = vadd.f32 %v2343_v9, %v2325_v29  ;;  %v1313_v25 = vadd.f32 %v1312_v38, %v1234_v45  ;;  %v1413_v35 = vpop.f32.mrf.mxu2  ;;  %8821 = vst [vmem:[#allocation39_spill] sm:$0xff] %v6856_v19  ;;  %v1239_v22 = vadd.f32 %v1238_v2, %v1151_v17  ;;  %v2660_v29 = vsub.f32 %v6838_v3, %v8523_v18  ;;  %v8826_v18 = vld [vmem:[#allocation30_spill] sm:$0xff] }
 0x15f   : > { %8822 = vst [vmem:[#allocation32_spill] sm:$0xff] %v6876_v44  ;;  %3130 = vmatpush.msra.mxu0 %v6856_v19  ;;  %v8528_v2 = vand.u32 4294901760, %v6874_v51  ;;  %3445 = vmatpush.msra.mxu3 %v6856_v19 }
 0x160   : > { %v6843_v48 = vadd.f32 %v2369_v50, %v2351_v15  ;;  %v1414_v24 = vadd.f32 %v1413_v35, %v1313_v25  ;;  %2051 = vmatmul.f32.gmra.mxu1 %v8762_v62  ;;  %v6871_v62 = vsub.f32 %v2552_v14, %v6854_v61  ;;  %8823 = vst [vmem:[#allocation24_spill] sm:$0xff] %v6878_v28 }
 0x161   : > { %1990 = vmatmul.f32.gmra.mxu0 %v8820_v52  ;;  %2787 = vmatmul.f32.gmra.mxu3 %v6799_v42  ;;  %v2370_v50 = vmul.f32 %v6740_v7, %v1475_v12  ;;  %v6906_v14 = vsub.f32 %v2549_v40, %v6878_v28  ;;  %v8824_v12 = vld [vmem:[#allocation25_spill] sm:$0xff] }
 0x162   : > { %v6861_v58 = vadd.f32 %v1478_v0, %v1414_v24  ;;  %2654 = vmatmul.f32.gmra.mxu2 %v2653_v27  ;;  %v8530_v38 = vand.u32 4294901760, %v6871_v62  ;;  %v3233_v24 = vsub.f32 %v6874_v51, %v8528_v2  ;;  %3132 = vmatpush.msra.mxu0 %v6876_v44  ;;  %v6903_v27 = vsub.f32 %v2550_v56, %v6876_v44 }
 0x163   : > { %3355 = vmatpush.msra.mxu2 %v6871_v62  ;;  %3447 = vmatpush.msra.mxu3 %v6876_v44  ;;  %v8526_v11 = vand.u32 4294901760, %v6906_v14 }
 0x164   : > { %v6867_v13 = vld [vmem:[#allocation2 + $0x50] sm:$0xff]  ;;  %2316 = vst [vmem:[#allocation2 + $0x61] sm:$0xff] %v6861_v58  ;;  %v2326_v37 = vmul.f32 %v6730_v53, %v6861_v58  ;;  %v1482_v45 = vpop.f32.mrf.mxu3  ;;  %v3227_v17 = vsub.f32 %v6871_v62, %v8530_v38  ;;  %v3234_v16 = vand.u32 4294901760, %v3233_v24  ;;  %v8527_v40 = vand.u32 4294901760, %v6903_v27  ;;  %3134 = vmatpush.msra.mxu0 %v6878_v28  ;;  %v6940_v24 = vld [vmem:[#allocation2 + $0x42] sm:$0xff] }
 0x165   : > { %v2344_v32 = vmul.f32 %v6735_v55, %v6867_v13  ;;  %v1243_v9 = vpop.f32.mrf.mxu0  ;;  %v1318_v0 = vpop.f32.mrf.mxu1  ;;  %3358 = vmatpush.msra.mxu2 %v6874_v51  ;;  %8828 = vst [vmem:[#allocation29_spill] sm:$0xff] %v6940_v24  ;;  %v2371_v26 = vmul.f32 %v6740_v7, %v6861_v58  ;;  %3449 = vmatpush.msra.mxu3 %v6878_v28  ;;  %v2438_v3 = vld [vmem:[#allocation2 + $0x52] sm:$0xff] }
 0x166   : > { %v1319_v25 = vadd.f32 %v1318_v0, %v1239_v22  ;;  %v1417_v35 = vpop.f32.mrf.mxu2  ;;  %v1155_v22 = vadd.f32 %v8825_v6, %v8824_v12  ;;  %v2661_v0 = vand.u32 4294901760, %v2660_v29  ;;  %v3228_v56 = vand.u32 4294901760, %v3227_v17 }
 0x167   : > { %v2352_v15 = vadd.f32 %v2344_v32, %v2326_v37  ;;  %3361 = vmatpush.msra.mxu2 %v6903_v27 }
 0x168   : > { %v1418_v32 = vadd.f32 %v1417_v35, %v1319_v25  ;;  %2055 = vmatmul.f32.gmra.mxu1 %v8820_v52  ;;  %v2547_v52 = vld [vmem:[%s8388_s6 + $0x50] sm:$0xff]  ;;  %v3239_v35 = vsub.f32 %v6903_v27, %v8527_v40  ;;  %v1244_v12 = vadd.f32 %v1243_v9, %v1155_v22 }
 0x169   : > { %v6910_v37 = vadd.f32 %v2370_v50, %v2352_v15  ;;  %1994 = vmatmul.f32.gmra.mxu0 %v8826_v18  ;;  %v2548_v15 = vld [vmem:[%s8388_s6 + $0x58] sm:$0xff]  ;;  %2791 = vmatmul.f32.gmra.mxu3 %v6824_v46  ;;  %v6938_v17 = vand.u32 4294901760, %v2547_v52 }
 0x16a   : > { %v6921_v50 = vadd.f32 %v1482_v45, %v1418_v32  ;;  %2662 = vmatmul.f32.gmra.mxu2 %v2661_v0  ;;  %v6924_v29 = vand.u32 4294901760, %v2548_v15  ;;  %3229 = vmatpush.msra.mxu1 %v3228_v56  ;;  %v3245_v45 = vsub.f32 %v6906_v14, %v8526_v11  ;;  %v6950_v56 = vld [vmem:[%s8387_s5 + $0x2] ss:$0 sm:$0xff]  ;;  %v6955_v11 = vld [vmem:[%s8387_s5 + $0x3] ss:$0 sm:$0xff]  ;;  %v3240_v40 = vand.u32 4294901760, %v3239_v35 }
 0x16b   : > { %v6929_v25 = vld [vmem:[#allocation2 + $0x60] sm:$0xff]  ;;  %v2395_v46 = vmul.f32 %v6950_v56, %v6940_v24  ;;  %3364 = vmatpush.msra.mxu2 %v6906_v14 }
 0x16c   : > { %8827 = vst [vmem:[#allocation41_spill] sm:$0xff] %v6924_v29  ;;  %v2327_v6 = vmul.f32 %v6730_v53, %v6921_v50  ;;  %v2345_v32 = vmul.f32 %v6735_v55, %v6929_v25  ;;  %v1486_v0 = vpop.f32.mrf.mxu3  ;;  %3235 = vmatpush.msra.mxu1 %v3234_v16  ;;  %3136 = vmatpush.msra.mxu0 %v6924_v29  ;;  %v3246_v35 = vand.u32 4294901760, %v3245_v45 }
 0x16d   : > { %2317 = vst [vmem:[#allocation2 + $0x71] sm:$0xff] %v6921_v50  ;;  %v1324_v9 = vpop.f32.mrf.mxu1  ;;  %v1543_v22 = vpop.f32.mrf.mxu0  ;;  %v6961_v20 = vsub.f32 %v2548_v15, %v6924_v29  ;;  %v2421_v16 = vmul.f32 %v6955_v11, %v6867_v13  ;;  %v8830_v13 = vld [vmem:[#allocation21_spill] sm:$0xff]  ;;  %3451 = vmatpush.msra.mxu3 %v6924_v29  ;;  %v2372_v19 = vmul.f32 %v6740_v7, %v6921_v50 }
 0x16e   : > { %v2353_v2 = vadd.f32 %v2345_v32, %v2327_v6  ;;  %v1325_v38 = vadd.f32 %v1324_v9, %v1244_v12  ;;  %v1421_v36 = vpop.f32.mrf.mxu2  ;;  %3241 = vmatpush.msra.mxu1 %v3240_v40  ;;  %3138 = vmatpush.msra.mxu0 %v6938_v17  ;;  %v6970_v6 = vsub.f32 %v2547_v52, %v6938_v17 }
 0x16f   : > { %8829 = vst [vmem:[#allocation27_spill] sm:$0xff] %v6961_v20  ;;  %v8538_v15 = vand.u32 4294901760, %v6961_v20  ;;  %v2403_v9 = vadd.f32 %v2395_v46, %v6843_v48  ;;  %3367 = vmatpush.msra.mxu2 %v6961_v20  ;;  %3453 = vmatpush.msra.mxu3 %v6938_v17 }
 0x170   : > { %v6972_v12 = vadd.f32 %v2371_v26, %v2353_v2  ;;  %v1422_v32 = vadd.f32 %v1421_v36, %v1325_v38  ;;  %2059 = vmatmul.f32.gmra.mxu1 %v8826_v18  ;;  %v8537_v40 = vand.u32 4294901760, %v6970_v6  ;;  %v2546_v26 = vld [vmem:[%s8388_s6 + $0x48] sm:$0xff]  ;;  %v6987_v36 = vld [vmem:[%s8387_s5 + $0x5] ss:$0 sm:$0xff] }
 0x171   : > { %2845 = vmatmul.f32.vlgmr.msrb.gmra.mxu0 %v8830_v13  ;;  %3095 = vmatmul.f32.vlgmr.msrb.gmra.mxu3 %v6548_v59  ;;  %v3251_v46 = vsub.f32 %v6961_v20, %v8538_v15  ;;  %v6996_v48 = vand.u32 4294901760, %v2546_v26  ;;  %v2545_v18 = vld [vmem:[%s8388_s6 + $0x40] sm:$0xff]  ;;  %v2429_v2 = vadd.f32 %v2421_v16, %v2403_v9  ;;  %v2422_v15 = vmul.f32 %v6955_v11, %v6929_v25 }
 0x172   : > { %v6989_v38 = vadd.f32 %v1486_v0, %v1422_v32  ;;  %3030 = vmatmul.f32.vlgmr.msrb.gmra.mxu2 %v6548_v59  ;;  %3247 = vmatpush.msra.mxu1 %v3246_v35  ;;  %v3257_v45 = vsub.f32 %v6970_v6, %v8537_v40  ;;  %v7006_v0 = vand.u32 4294901760, %v2545_v18  ;;  %v7011_v59 = vmul.f32 %v6771_v57, %v6735_v55 }
 0x173   : > { %v2447_v32 = vmul.f32 %v6987_v36, %v2438_v3  ;;  %v2396_v40 = vmul.f32 %v6950_v56, %v2438_v3  ;;  %v3252_v28 = vand.u32 4294901760, %v3251_v46  ;;  %3140 = vmatpush.msra.mxu0 %v6996_v48  ;;  %v7026_v24 = vsub.f32 %v2546_v26, %v6996_v48  ;;  %v7034_v3 = vld [vmem:[#allocation2 + $0x62] sm:$0xff]  ;;  %3370 = vmatpush.msra.mxu2 %v6970_v6 }
 0x174   : > { %v7001_v52 = vld [vmem:[#allocation2 + $0x70] sm:$0xff]  ;;  %2318 = vst [vmem:[#allocation2 + $0x81] sm:$0xff] %v6989_v38  ;;  %v2328_v16 = vmul.f32 %v6730_v53, %v6989_v38  ;;  %v1856_v9 = vpop.f32.mrf.mxu3  ;;  %v7039_v42 = vsub.f32 %v2545_v18, %v7006_v0  ;;  %v3258_v20 = vand.u32 4294901760, %v3257_v45  ;;  %3455 = vmatpush.msra.mxu3 %v6996_v48 }
 0x175   : > { %v2346_v35 = vmul.f32 %v6735_v55, %v7001_v52  ;;  %v7022_v29 = vpop.f32.mrf.mxu0  ;;  %v1700_v57 = vpop.f32.mrf.mxu1  ;;  %v7032_v55 = vld [vmem:[%s8387_s5 + $0x6] ss:$0 sm:$0xff]  ;;  %v2455_v26 = vadd.f32 %v2447_v32, %v2429_v2  ;;  %3253 = vmatpush.msra.mxu1 %v3252_v28  ;;  %v8551_v39 = vand.u32 4294901760, %v7026_v24  ;;  %3142 = vmatpush.msra.mxu0 %v7006_v0  ;;  %v2397_v28 = vmul.f32 %v6950_v56, %v7034_v3 }
 0x176   : > { %v1701_v33 = vadd.f32 %v1700_v57, %v1543_v22  ;;  %v1782_v46 = vpop.f32.mrf.mxu2  ;;  %v8550_v18 = vand.u32 4294901760, %v7039_v42  ;;  %v2423_v2 = vmul.f32 %v6955_v11, %v7001_v52  ;;  %3373 = vmatpush.msra.mxu2 %v7026_v24  ;;  %3457 = vmatpush.msra.mxu3 %v7006_v0 }
 0x177   : > { %v2354_v44 = vadd.f32 %v2346_v35, %v2328_v16  ;;  %v2473_v16 = vmul.f32 %v7032_v55, %v6929_v25  ;;  %v2404_v35 = vadd.f32 %v2396_v40, %v6910_v37  ;;  %v8831_v25 = vand.u32 4294901760, %v8830_v13  ;;  %v2543_v13 = vld [vmem:[%s8388_s6 + $0x30] sm:$0xff]  ;;  %3259 = vmatpush.msra.mxu1 %v3258_v20 }
 0x178   : > { %v1783_v22 = vadd.f32 %v1782_v46, %v1701_v33  ;;  %v3263_v33 = vsub.f32 %v7026_v24, %v8551_v39  ;;  %v3269_v37 = vsub.f32 %v7039_v42, %v8550_v18  ;;  %v2405_v32 = vadd.f32 %v2397_v28, %v6972_v12  ;;  %3376 = vmatpush.msra.mxu2 %v7039_v42 }
 0x179   : > { %v7047_v10 = vadd.f32 %v2372_v19, %v2354_v44  ;;  %2850 = vmatmul.f32.gmra.mxu0 %v6618_v31  ;;  %2919 = vmatmul.f32.vlgmr.msrb.gmra.mxu1 %v8831_v25  ;;  %v2544_v19 = vld [vmem:[%s8388_s6 + $0x38] sm:$0xff]  ;;  %v2430_v44 = vadd.f32 %v2422_v15, %v2404_v35  ;;  %v7078_v57 = vand.u32 4294901760, %v2543_v13  ;;  %v2481_v46 = vadd.f32 %v2473_v16, %v2455_v26 }
 0x17a   : > { %3099 = vmatmul.f32.gmra.mxu3 %v6596_v60  ;;  %3034 = vmatmul.f32.gmra.mxu2 %v6596_v60  ;;  %v7070_v40 = vand.u32 4294901760, %v2544_v19  ;;  %v7075_v45 = vadd.f32 %v1856_v9, %v1783_v22  ;;  %v3264_v15 = vand.u32 4294901760, %v3263_v33  ;;  %v7084_v60 = vld [vmem:[%s8387_s5 + $0x7] ss:$0 sm:$0xff]  ;;  %v2321_v35 = vmul.f32 %v6730_v53, %v6688_v4  ;;  %v7090_v22 = vld [vmem:[#allocation2 + $0x72] sm:$0xff] }
 0x17b   : > { %v2448_v9 = vmul.f32 %v6987_v36, %v7034_v3  ;;  %v3270_v12 = vand.u32 4294901760, %v3269_v37  ;;  %v2431_v25 = vadd.f32 %v2423_v2, %v2405_v32  ;;  %v7098_v26 = vsub.f32 %v2543_v13, %v7078_v57  ;;  %v4924_v53 = vld [vmem:[#allocation2 + $0x1] sm:$0xff] }
 0x17c   : > { %8832 = vst [vmem:[#allocation8_spill] sm:$0xff] %v7075_v45  ;;  %v1862_v20 = vpop.f32.mrf.mxu3  ;;  %3144 = vmatpush.msra.mxu0 %v7070_v40  ;;  %v7094_v28 = vsub.f32 %v2544_v19, %v7070_v40  ;;  %3265 = vmatpush.msra.mxu1 %v3264_v15  ;;  %v2499_v4 = vmul.f32 %v7084_v60, %v6861_v58  ;;  %v7111_v32 = vld [vmem:[#allocation2 + $0x80] sm:$0xff]  ;;  %v8833_v39 = vand.u32 4294901760, %v6618_v31 }
 0x17d   : > { %v2365_v16 = vmul.f32 %v4924_v53, %v6740_v7  ;;  %v2456_v33 = vadd.f32 %v2448_v9, %v2430_v44  ;;  %v1704_v18 = vpop.f32.mrf.mxu1  ;;  %3459 = vmatpush.msra.mxu3 %v7070_v40  ;;  %v2474_v2 = vmul.f32 %v7032_v55, %v7001_v52  ;;  %v2449_v13 = vmul.f32 %v6987_v36, %v7090_v22  ;;  %v2541_v31 = vld [vmem:[%s8388_s6 + $0x20] sm:$0xff] }
 0x17e   : > { %v1559_v37 = vpop.f32.mrf.mxu0  ;;  %v8555_v19 = vand.u32 4294901760, %v7094_v28  ;;  %3146 = vmatpush.msra.mxu0 %v7078_v57  ;;  %v1705_v58 = vadd.f32 %v1704_v18, %v7022_v29  ;;  %v1787_v7 = vpop.f32.mrf.mxu2  ;;  %3271 = vmatpush.msra.mxu1 %v3270_v12  ;;  %v8554_v44 = vand.u32 4294901760, %v7098_v26  ;;  %v7116_v15 = vadd.f32 %v2499_v4, %v2481_v46  ;;  %v2542_v46 = vld [vmem:[%s8388_s6 + $0x28] sm:$0xff] }
 0x17f   : > { %3379 = vmatpush.msra.mxu2 %v7094_v28  ;;  %v2347_v9 = vadd.f32 %v7011_v59, %v2321_v35  ;;  %3461 = vmatpush.msra.mxu3 %v7078_v57  ;;  %v2482_v53 = vadd.f32 %v2474_v2, %v2456_v33  ;;  %v2500_v29 = vmul.f32 %v7084_v60, %v6921_v50  ;;  %v7136_v35 = vand.u32 4294901760, %v2542_v46 }
 0x180   : > { %v3275_v52 = vsub.f32 %v7094_v28, %v8555_v19  ;;  %v2457_v18 = vadd.f32 %v2449_v13, %v2431_v25  ;;  %v1788_v12 = vadd.f32 %v1787_v7, %v1705_v58  ;;  %v3281_v59 = vsub.f32 %v7098_v26, %v8554_v44 }
 0x181   : > { %2855 = vmatmul.f32.gmra.mxu0 %v6661_v54  ;;  %2925 = vmatmul.f32.gmra.mxu1 %v8833_v39  ;;  %v7141_v39 = vadd.f32 %v2500_v29, %v2482_v53  ;;  %v2475_v25 = vmul.f32 %v7032_v55, %v7111_v32  ;;  %v7145_v33 = vand.u32 4294901760, %v2541_v31  ;;  %v2373_v53 = vadd.f32 %v2365_v16, %v2347_v9  ;;  %v4925_v29 = vld [vmem:[#allocation2 + $0x2] sm:$0xff] }
 0x182   : > { %3103 = vmatmul.f32.gmra.mxu3 %v6642_v30  ;;  %3038 = vmatmul.f32.gmra.mxu2 %v6642_v30  ;;  %v3276_v50 = vand.u32 4294901760, %v3275_v52  ;;  %v3282_v4 = vand.u32 4294901760, %v3281_v59  ;;  %v7148_v2 = vadd.f32 %v1862_v20, %v1788_v12  ;;  %v7152_v30 = vsub.f32 %v2542_v46, %v7136_v35 }
 0x183   : > { %3382 = vmatpush.msra.mxu2 %v7098_v26  ;;  %3148 = vmatpush.msra.mxu0 %v7136_v35  ;;  %v2483_v13 = vadd.f32 %v2475_v25, %v2457_v18  ;;  %v7155_v7 = vsub.f32 %v2541_v31, %v7145_v33  ;;  %v2501_v52 = vmul.f32 %v7084_v60, %v6989_v38 }
 0x184   : > { %8834 = vst [vmem:[#allocation10_spill] sm:$0xff] %v7148_v2  ;;  %3277 = vmatpush.msra.mxu1 %v3276_v50  ;;  %v1868_v58 = vpop.f32.mrf.mxu3  ;;  %3463 = vmatpush.msra.mxu3 %v7136_v35  ;;  %v2391_v20 = vmul.f32 %v4925_v29, %v6950_v56  ;;  %v8553_v46 = vand.u32 4294901760, %v7152_v30  ;;  %v2417_v16 = vmul.f32 %v6955_v11, %v6746_v1 }
 0x185   : > { %v1708_v59 = vpop.f32.mrf.mxu1  ;;  %3150 = vmatpush.msra.mxu0 %v7145_v33  ;;  %v8552_v31 = vand.u32 4294901760, %v7155_v7  ;;  %3385 = vmatpush.msra.mxu2 %v7152_v30  ;;  %v7166_v38 = vadd.f32 %v2501_v52, %v2483_v13  ;;  %v2540_v13 = vld [vmem:[%s8388_s6 + $0x18] sm:$0xff] }
 0x186   : > { %v1567_v12 = vpop.f32.mrf.mxu0  ;;  %3283 = vmatpush.msra.mxu1 %v3282_v4  ;;  %v1709_v18 = vadd.f32 %v1708_v59, %v1559_v37  ;;  %v1792_v50 = vpop.f32.mrf.mxu2  ;;  %3465 = vmatpush.msra.mxu3 %v7145_v33  ;;  %v3287_v9 = vsub.f32 %v7152_v30, %v8553_v46  ;;  %v8836_v37 = vand.u32 4294901760, %v6661_v54  ;;  %v2399_v52 = vadd.f32 %v2391_v20, %v2373_v53  ;;  %v2539_v54 = vld [vmem:[%s8388_s6 + $0x10] sm:$0xff] }
 0x187   : > { %8835 = vst [vmem:[#allocation35_spill] sm:$0xff] %v7166_v38  ;;  %v3293_v4 = vsub.f32 %v7155_v7, %v8552_v31  ;;  %v7184_v29 = vand.u32 4294901760, %v2540_v13  ;;  %v2434_v59 = vld [vmem:[#allocation2 + $0x12] sm:$0xff]  ;;  %3388 = vmatpush.msra.mxu2 %v7155_v7 }
 0x188   : > { %v1793_v25 = vadd.f32 %v1792_v50, %v1709_v18  ;;  %v3288_v1 = vand.u32 4294901760, %v3287_v9  ;;  %v7190_v50 = vand.u32 4294901760, %v2539_v54  ;;  %v2425_v53 = vadd.f32 %v2417_v16, %v2399_v52 }
 0x189   : > { %2860 = vmatmul.f32.gmra.mxu0 %v6692_v34  ;;  %2931 = vmatmul.f32.gmra.mxu1 %v8836_v37  ;;  %v3294_v18 = vand.u32 4294901760, %v3293_v4  ;;  %v2460_v37 = vld [vmem:[#allocation2 + $0x20] sm:$0xff]  ;;  %v2443_v4 = vmul.f32 %v6987_v36, %v2434_v59 }
 0x18a   : > { %3107 = vmatmul.f32.gmra.mxu3 %v6674_v5  ;;  %3042 = vmatmul.f32.gmra.mxu2 %v6674_v5  ;;  %v7192_v31 = vadd.f32 %v1868_v58, %v1793_v25  ;;  %v7196_v5 = vsub.f32 %v2540_v13, %v7184_v29  ;;  %v7200_v9 = vsub.f32 %v2539_v54, %v7190_v50 }
 0x18b   : > { %3289 = vmatpush.msra.mxu1 %v3288_v1  ;;  %3152 = vmatpush.msra.mxu0 %v7184_v29  ;;  %v2469_v16 = vmul.f32 %v7032_v55, %v2460_v37  ;;  %v2392_v25 = vmul.f32 %v6950_v56, %v2434_v59  ;;  %v2418_v13 = vmul.f32 %v6955_v11, %v6783_v49  ;;  %v8838_v49 = vand.u32 4294901760, %v6692_v34  ;;  %v2537_v59 = vld [vmem:[%s8388_s6] sm:$0xff] }
 0x18c   : > { %8837 = vst [vmem:[#allocation45_spill] sm:$0xff] %v7192_v31  ;;  %v1874_v20 = vpop.f32.mrf.mxu3  ;;  %3467 = vmatpush.msra.mxu3 %v7184_v29  ;;  %v8557_v58 = vand.u32 4294901760, %v7196_v5  ;;  %3391 = vmatpush.msra.mxu2 %v7196_v5  ;;  %v8556_v54 = vand.u32 4294901760, %v7200_v9 }
 0x18d   : > { %v1712_v44 = vpop.f32.mrf.mxu1  ;;  %3295 = vmatpush.msra.mxu1 %v3294_v18  ;;  %3154 = vmatpush.msra.mxu0 %v7190_v50  ;;  %v2451_v18 = vadd.f32 %v2443_v4, %v2425_v53  ;;  %v2400_v37 = vadd.f32 %v2392_v25, %v6777_v23  ;;  %v2486_v53 = vld [vmem:[#allocation2 + $0x21] sm:$0xff]  ;;  %v7232_v25 = vand.u32 4294901760, %v2537_v59 }
 0x18e   : > { %v1575_v46 = vpop.f32.mrf.mxu0  ;;  %v1713_v52 = vadd.f32 %v1712_v44, %v1567_v12  ;;  %v1797_v1 = vpop.f32.mrf.mxu2  ;;  %3469 = vmatpush.msra.mxu3 %v7190_v50  ;;  %v3299_v19 = vsub.f32 %v7196_v5, %v8557_v58  ;;  %v3305_v44 = vsub.f32 %v7200_v9, %v8556_v54  ;;  %v2538_v12 = vld [vmem:[%s8388_s6 + $0x8] sm:$0xff]  ;;  %3394 = vmatpush.msra.mxu2 %v7200_v9  ;;  %v2461_v54 = vld [vmem:[#allocation2 + $0x30] sm:$0xff] }
 0x18f   : > { %v2435_v23 = vld [vmem:[#allocation2 + $0x22] sm:$0xff]  ;;  %v7230_v4 = vand.u32 4294901760, %v2538_v12 }
 0x190   : > { %v1798_v31 = vadd.f32 %v1797_v1, %v1713_v52  ;;  %v3300_v34 = vand.u32 4294901760, %v3299_v19  ;;  %v2477_v52 = vadd.f32 %v2469_v16, %v2451_v18  ;;  %v2426_v1 = vadd.f32 %v2418_v13, %v2400_v37  ;;  %v7245_v19 = vld [vmem:[%s8387_s5 + $0x8] ss:$0 sm:$0xff] }
 0x191   : > { %2865 = vmatmul.f32.gmra.mxu0 %v6749_v47  ;;  %2937 = vmatmul.f32.gmra.mxu1 %v8838_v49  ;;  %v3306_v49 = vand.u32 4294901760, %v3305_v44  ;;  %v7239_v2 = vsub.f32 %v2538_v12, %v7230_v4  ;;  %v7248_v16 = vsub.f32 %v2537_v59, %v7232_v25  ;;  %v2444_v13 = vmul.f32 %v6987_v36, %v2435_v23 }
 0x192   : > { %3111 = vmatmul.f32.gmra.mxu3 %v6714_v43  ;;  %3046 = vmatmul.f32.gmra.mxu2 %v6714_v43  ;;  %v7235_v58 = vadd.f32 %v1874_v20, %v1798_v31  ;;  %v2495_v43 = vmul.f32 %v7084_v60, %v2486_v53  ;;  %v2512_v20 = vld [vmem:[#allocation2 + $0x22] sm:$0xff] }
 0x193   : > { %3301 = vmatpush.msra.mxu1 %v3300_v34  ;;  %3156 = vmatpush.msra.mxu0 %v7230_v4  ;;  %v8559_v12 = vand.u32 4294901760, %v7239_v2  ;;  %v8558_v53 = vand.u32 4294901760, %v7248_v16  ;;  %v2470_v34 = vmul.f32 %v7032_v55, %v2461_v54  ;;  %v2452_v45 = vadd.f32 %v2444_v13, %v2426_v1  ;;  %v2487_v13 = vld [vmem:[#allocation2 + $0x31] sm:$0xff] }
 0x194   : > { %8839 = vst [vmem:[#allocation40_spill] sm:$0xff] %v7235_v58  ;;  %v1880_v31 = vpop.f32.mrf.mxu3  ;;  %3471 = vmatpush.msra.mxu3 %v7230_v4  ;;  %v2503_v44 = vadd.f32 %v2495_v43, %v2477_v52  ;;  %3397 = vmatpush.msra.mxu2 %v7239_v2  ;;  %v2521_v38 = vmul.f32 %v7245_v19, %v2512_v20  ;;  %v8840_v43 = vand.u32 4294901760, %v6871_v62  ;;  %v8841_v1 = vand.u32 4294901760, %v6749_v47  ;;  %v2436_v47 = vld [vmem:[#allocation2 + $0x32] sm:$0xff] }
 0x195   : > { %v1716_v37 = vpop.f32.mrf.mxu1  ;;  %3307 = vmatpush.msra.mxu1 %v3306_v49  ;;  %3158 = vmatpush.msra.mxu0 %v7232_v25  ;;  %v3311_v49 = vsub.f32 %v7239_v2, %v8559_v12  ;;  %v3317_v52 = vsub.f32 %v7248_v16, %v8558_v53  ;;  %v2419_v54 = vmul.f32 %v6955_v11, %v6807_v21  ;;  %v8842_v21 = vand.u32 4294901760, %v6874_v51 }
 0x196   : > { %v1583_v18 = vpop.f32.mrf.mxu0  ;;  %v1717_v59 = vadd.f32 %v1716_v37, %v1575_v46  ;;  %v1802_v58 = vpop.f32.mrf.mxu2  ;;  %3473 = vmatpush.msra.mxu3 %v7232_v25  ;;  %v2393_v46 = vmul.f32 %v6950_v56, %v2435_v23  ;;  %v2529_v20 = vadd.f32 %v2521_v38, %v2503_v44  ;;  %3400 = vmatpush.msra.mxu2 %v7248_v16  ;;  %v2513_v38 = vld [vmem:[#allocation2 + $0x32] sm:$0xff]  ;;  %v8844_v44 = vand.u32 4294901760, %v6903_v27 }
 0x197   : > { %3526 = vmatpush.msrb.mxu0 %v8840_v43  ;;  %v3312_v53 = vand.u32 4294901760, %v3311_v49  ;;  %v3318_v62 = vand.u32 4294901760, %v3317_v52  ;;  %v2478_v43 = vadd.f32 %v2470_v34, %v2452_v45  ;;  %v2394_v27 = vmul.f32 %v6950_v56, %v2436_v47 }
 0x198   : > { %v1803_v37 = vadd.f32 %v1802_v58, %v1717_v59  ;;  %v2401_v23 = vadd.f32 %v2393_v46, %v6802_v63  ;;  %v2496_v59 = vmul.f32 %v7084_v60, %v2487_v13  ;;  %v7284_v34 = vand.u32 4294901760, %v2529_v20  ;;  %v8846_v13 = vld [vmem:[#allocation9_spill] sm:$0xff] }
 0x199   : > { %2870 = vmatmul.f32.gmra.mxu0 %v6789_v8  ;;  %2943 = vmatmul.f32.gmra.mxu1 %v8841_v1  ;;  %v2462_v1 = vld [vmem:[#allocation2 + $0x40] sm:$0xff]  ;;  %v8845_v46 = vand.u32 4294901760, %v6906_v14 }
 0x19a   : > { %3115 = vmatmul.f32.gmra.mxu3 %v6769_v41  ;;  %3050 = vmatmul.f32.gmra.mxu2 %v6769_v41  ;;  %v7279_v58 = vadd.f32 %v1880_v31, %v1803_v37  ;;  %v2427_v12 = vadd.f32 %v2419_v54, %v2401_v23  ;;  %v2504_v51 = vadd.f32 %v2496_v59, %v2478_v43  ;;  %v8847_v23 = vld [vmem:[#allocation22_spill] sm:$0xff]  ;;  %v8850_v59 = vld [vmem:[#allocation28_spill] sm:$0xff] }
 0x19b   : > { %3530 = vmatpush.msrb.mxu0 %v8842_v21  ;;  %3313 = vmatpush.msra.mxu1 %v3312_v53  ;;  %v2445_v31 = vmul.f32 %v6987_v36, %v2436_v47  ;;  %v2471_v53 = vmul.f32 %v7032_v55, %v2462_v1  ;;  %v2522_v54 = vmul.f32 %v7245_v19, %v2513_v38  ;;  %v2488_v47 = vld [vmem:[#allocation2 + $0x41] sm:$0xff] }
 0x19c   : > { %8843 = vst [vmem:[#allocation5_spill] sm:$0xff] %v7279_v58  ;;  %v1886_v41 = vpop.f32.mrf.mxu3  ;;  %v3160_v14 = vsub.f32 %v2529_v20, %v7284_v34  ;;  %v2402_v1 = vadd.f32 %v2394_v27, %v8850_v59  ;;  %v8856_v20 = vand.u32 4294901760, %v6970_v6  ;;  %v8858_v59 = vld [vmem:[#allocation24_spill] sm:$0xff] }
 0x19d   : > { %3534 = vmatpush.msrb.mxu0 %v8844_v44  ;;  %v1720_v63 = vpop.f32.mrf.mxu1  ;;  %3319 = vmatpush.msra.mxu1 %v3318_v62  ;;  %v2453_v37 = vadd.f32 %v2445_v31, %v2427_v12  ;;  %v2420_v62 = vmul.f32 %v6955_v11, %v8846_v13  ;;  %v2530_v21 = vadd.f32 %v2522_v54, %v2504_v51  ;;  %v8851_v12 = vld [vmem:[#allocation39_spill] sm:$0xff]  ;;  %v8855_v13 = vld [vmem:[#allocation32_spill] sm:$0xff]  ;;  %v8857_v51 = vld [vmem:[#allocation29_spill] sm:$0xff] }
 0x19e   : > { %v1591_v45 = vpop.f32.mrf.mxu0  ;;  %v1721_v49 = vadd.f32 %v1720_v63, %v1583_v18  ;;  %v1807_v52 = vpop.f32.mrf.mxu2  ;;  %v8848_v18 = vand.u32 4294901760, %v6789_v8  ;;  %v8852_v44 = vld [vmem:[#allocation27_spill] sm:$0xff]  ;;  %v2463_v8 = vld [vmem:[#allocation2 + $0x50] sm:$0xff]  ;;  %v2446_v27 = vmul.f32 %v6987_v36, %v8857_v51 }
 0x19f   : > { %3621 = vmatpush.msrb.mxu1 %v6854_v61  ;;  %3538 = vmatpush.msrb.mxu0 %v8845_v46  ;;  %v8849_v61 = vld [vmem:[#allocation38_spill] sm:$0xff]  ;;  %v2479_v38 = vadd.f32 %v2471_v53, %v2453_v37  ;;  %v8853_v63 = vand.u32 4294901760, %v8852_v44  ;;  %v2497_v46 = vmul.f32 %v7084_v60, %v2488_v47  ;;  %v3161_v37 = vand.u32 4294901760, %v3160_v14  ;;  %v8860_v44 = vld [vmem:[#allocation16_spill] sm:$0xff]  ;;  %v8863_v51 = vld [vmem:[#allocation41_spill] sm:$0xff] }
 0x1a0   : > { %v1808_v43 = vadd.f32 %v1807_v52, %v1721_v49  ;;  %v2428_v49 = vadd.f32 %v2420_v62, %v2402_v1  ;;  %v2472_v47 = vmul.f32 %v7032_v55, %v2463_v8  ;;  %v8859_v1 = vand.u32 4294901760, %v7026_v24  ;;  %v2489_v8 = vld [vmem:[#allocation2 + $0x51] sm:$0xff] }
 0x1a1   : > { %2875 = vmatmul.f32.gmra.mxu0 %v8847_v23  ;;  %2949 = vmatmul.f32.gmra.mxu1 %v8848_v18  ;;  %v7313_v18 = vand.u32 4294901760, %v2530_v21  ;;  %v2505_v62 = vadd.f32 %v2497_v46, %v2479_v38 }
 0x1a2   : > { %3119 = vmatmul.f32.gmra.mxu3 %v8849_v61  ;;  %3054 = vmatmul.f32.gmra.mxu2 %v8849_v61  ;;  %v7305_v31 = vadd.f32 %v1886_v41, %v1808_v43  ;;  %v2514_v41 = vld [vmem:[#allocation2 + $0x42] sm:$0xff]  ;;  %v2454_v6 = vadd.f32 %v2446_v27, %v2428_v49  ;;  %v8864_v49 = vand.u32 4294901760, %v7039_v42 }
 0x1a3   : > { %3623 = vmatpush.msrb.mxu1 %v8851_v12  ;;  %3542 = vmatpush.msrb.mxu0 %v8853_v63  ;;  %v8861_v63 = vand.u32 4294901760, %v8847_v23  ;;  %v3168_v38 = vsub.f32 %v2530_v21, %v7313_v18 }
 0x1a4   : > { %8854 = vst [vmem:[#allocation33_spill] sm:$0xff] %v7305_v31  ;;  %v1892_v52 = vpop.f32.mrf.mxu3  ;;  %v2480_v24 = vadd.f32 %v2472_v47, %v2454_v6  ;;  %v8868_v6 = vand.u32 4294901760, %v7098_v26 }
 0x1a5   : > { %3625 = vmatpush.msrb.mxu1 %v8855_v13  ;;  %3546 = vmatpush.msrb.mxu0 %v8856_v20  ;;  %v1724_v53 = vpop.f32.mrf.mxu1  ;;  %v2523_v13 = vmul.f32 %v7245_v19, %v2514_v41  ;;  %v8862_v20 = vld [vmem:[#allocation19_spill] sm:$0xff]  ;;  %v8866_v41 = vand.u32 4294901760, %v7094_v28  ;;  %v8869_v28 = vand.u32 4294901760, %v8860_v44 }
 0x1a6   : > { %v1599_v54 = vpop.f32.mrf.mxu0  ;;  %v1725_v43 = vadd.f32 %v1724_v53, %v1591_v45  ;;  %v1812_v61 = vpop.f32.mrf.mxu2  ;;  %v3162_v45 = vsub.f32 %v3160_v14, %v3161_v37  ;;  %v2498_v53 = vmul.f32 %v7084_v60, %v2489_v8 }
 0x1a7   : > { %3627 = vmatpush.msrb.mxu1 %v8858_v59  ;;  %3550 = vmatpush.msrb.mxu0 %v8859_v1  ;;  %v2531_v46 = vadd.f32 %v2523_v13, %v2505_v62  ;;  %v2515_v62 = vld [vmem:[#allocation2 + $0x52] sm:$0xff] }
 0x1a8   : > { %v1813_v12 = vadd.f32 %v1812_v61, %v1725_v43  ;;  %v3169_v61 = vand.u32 4294901760, %v3168_v38  ;;  %v3163_v1 = vand.u32 4294901760, %v3162_v45 }
 0x1a9   : > { %2880 = vmatmul.f32.gmra.mxu0 %v8860_v44  ;;  %2955 = vmatmul.f32.gmra.mxu1 %v8861_v63  ;;  %v7337_v42 = vand.u32 4294901760, %v2531_v46  ;;  %v8872_v44 = vand.u32 4294901760, %v7155_v7 }
 0x1aa   : > { %3123 = vmatmul.f32.gmra.mxu3 %v8862_v20  ;;  %3058 = vmatmul.f32.gmra.mxu2 %v8862_v20  ;;  %v7329_v27 = vadd.f32 %v1892_v52, %v1813_v12  ;;  %v2506_v52 = vadd.f32 %v2498_v53, %v2480_v24  ;;  %v2524_v12 = vmul.f32 %v7245_v19, %v2515_v62 }
 0x1ab   : > { %3629 = vmatpush.msrb.mxu1 %v8863_v51  ;;  %3554 = vmatpush.msrb.mxu0 %v8864_v49  ;;  %v3176_v63 = vsub.f32 %v2531_v46, %v7337_v42  ;;  %v8877_v49 = vand.u32 4294901760, %v7239_v2  ;;  %v2441_v2 = vld [vmem:[#allocation2 + $0x82] sm:$0xff] }
 0x1ac   : > { %8865 = vst [vmem:[#allocation31_spill] sm:$0xff] %v7329_v27  ;;  %v1898_v23 = vpop.f32.mrf.mxu3  ;;  %v2532_v13 = vadd.f32 %v2524_v12, %v2506_v52 }
 0x1ad   : > { %3631 = vmatpush.msrb.mxu1 %v6938_v17  ;;  %3558 = vmatpush.msrb.mxu0 %v8866_v41  ;;  %v1728_v43 = vpop.f32.mrf.mxu1 }
 0x1ae   : > { %v7335_v21 = vpop.f32.mrf.mxu0  ;;  %v1729_v59 = vadd.f32 %v1728_v43, %v1599_v54  ;;  %v1817_v47 = vpop.f32.mrf.mxu2  ;;  %v3170_v54 = vsub.f32 %v3168_v38, %v3169_v61  ;;  %v7362_v46 = vand.u32 4294901760, %v2532_v13 }
 0x1af   : > { %8867 = vst [vmem:[#allocation46_spill] sm:$0xff] %v7335_v21  ;;  %3633 = vmatpush.msrb.mxu1 %v6996_v48  ;;  %3562 = vmatpush.msrb.mxu0 %v8868_v6  ;;  %v8870_v48 = vand.u32 4294901760, %v7152_v30  ;;  %v8875_v30 = vand.u32 4294901760, %v7196_v5 }
 0x1b0   : > { %v1818_v17 = vadd.f32 %v1817_v47, %v1729_v59  ;;  %v3171_v8 = vand.u32 4294901760, %v3170_v54  ;;  %v3184_v24 = vsub.f32 %v2532_v13, %v7362_v46  ;;  %v8883_v54 = vld [vmem:[#allocation35_spill] sm:$0xff] }
 0x1b1   : > { %2961 = vmatmul.f32.gmra.mxu1 %v8869_v28  ;;  %3164 = vmatmul.f32.vlgmr.msra.gmra.mxu0 %v3163_v1 }
 0x1b2   : > { %3477 = vmatmul.f32.vlgmr.msra.gmra.mxu3 %v3161_v37  ;;  %3403 = vmatmul.f32.vlgmr.msra.gmra.mxu2 %v3160_v14  ;;  %v7349_v26 = vadd.f32 %v1898_v23, %v1818_v17  ;;  %v3185_v53 = vand.u32 4294901760, %v3184_v24 }
 0x1b3   : > { %3635 = vmatpush.msrb.mxu1 %v7006_v0  ;;  %3566 = vmatpush.msrb.mxu0 %v8870_v48  ;;  %v3177_v0 = vand.u32 4294901760, %v3176_v63 }
 0x1b4   : > { %8871 = vst [vmem:[#allocation4_spill] sm:$0xff] %v7349_v26  ;;  %v7351_v20 = vpop.f32.mrf.mxu3  ;;  %v3186_v43 = vsub.f32 %v3184_v24, %v3185_v53 }
 0x1b5   : > { %3637 = vmatpush.msrb.mxu1 %v7070_v40  ;;  %3570 = vmatpush.msrb.mxu0 %v8872_v44  ;;  %v7358_v14 = vpop.f32.mrf.mxu1  ;;  %v2525_v40 = vmul.f32 %v7245_v19, %v7034_v3  ;;  %v3178_v7 = vsub.f32 %v3176_v63, %v3177_v0  ;;  %v2398_v3 = vmul.f32 %v6950_v56, %v7090_v22  ;;  %v4928_v44 = vld [vmem:[#allocation2 + $0x92] sm:$0xff] }
 0x1b6   : > { %v7356_v37 = vpop.f32.mrf.mxu0  ;;  %8874 = vst [vmem:[#allocation42_spill] sm:$0xff] %v7358_v14  ;;  %v7360_v45 = vpop.f32.mrf.mxu2  ;;  %v3187_v1 = vand.u32 4294901760, %v3186_v43 }
 0x1b7   : > { %8873 = vst [vmem:[#allocation43_spill] sm:$0xff] %v7356_v37  ;;  %3639 = vmatpush.msrb.mxu1 %v7078_v57  ;;  %3574 = vmatpush.msrb.mxu0 %v8875_v30  ;;  %v2533_v51 = vadd.f32 %v2525_v40, %v7116_v15  ;;  %v8876_v57 = vand.u32 4294901760, %v7200_v9  ;;  %v3179_v9 = vand.u32 4294901760, %v3178_v7  ;;  %v2406_v56 = vadd.f32 %v2398_v3, %v7047_v10 }
 0x1b9   : > { %3172 = vmatmul.f32.gmra.mxu0 %v3171_v8  ;;  %3321 = vmatmul.f32.vlgmr.msra.gmra.mxu1 %v7284_v34  ;;  %v7390_v41 = vand.u32 4294901760, %v2533_v51  ;;  %v2528_v8 = vmul.f32 %v4928_v44, %v7245_v19 }
 0x1ba   : > { %3483 = vmatmul.f32.gmra.mxu3 %v3169_v61  ;;  %3408 = vmatmul.f32.gmra.mxu2 %v3168_v38  ;;  %v2424_v38 = vmul.f32 %v6955_v11, %v7111_v32  ;;  %v2526_v11 = vmul.f32 %v7245_v19, %v7090_v22 }
 0x1bb   : > { %3641 = vmatpush.msrb.mxu1 %v7136_v35  ;;  %3578 = vmatpush.msrb.mxu0 %v8876_v57  ;;  %v3192_v61 = vsub.f32 %v2533_v51, %v7390_v41 }
 0x1bc   : > { %v7375_v5 = vpop.f32.mrf.mxu3  ;;  %v2432_v32 = vadd.f32 %v2424_v38, %v2406_v56 }
 0x1bd   : > { %3643 = vmatpush.msrb.mxu1 %v7145_v33  ;;  %3582 = vmatpush.msrb.mxu0 %v8877_v49  ;;  %v7386_v15 = vpop.f32.mrf.mxu1  ;;  %v8880_v33 = vand.u32 4294901760, %v7248_v16  ;;  %v2450_v16 = vmul.f32 %v6987_v36, %v2441_v2  ;;  %v3193_v52 = vand.u32 4294901760, %v3192_v61  ;;  %v2527_v36 = vmul.f32 %v7245_v19, %v2441_v2 }
 0x1be   : > { %v7384_v23 = vpop.f32.mrf.mxu0  ;;  %8879 = vst [vmem:[#allocation3_spill] sm:$0xff] %v7386_v15  ;;  %v7388_v35 = vpop.f32.mrf.mxu2 }
 0x1bf   : > { %8878 = vst [vmem:[#allocation14_spill] sm:$0xff] %v7384_v23  ;;  %3645 = vmatpush.msrb.mxu1 %v7184_v29  ;;  %3586 = vmatpush.msrb.mxu0 %v8880_v33  ;;  %v2534_v29 = vadd.f32 %v2526_v11, %v7141_v39  ;;  %v2458_v62 = vadd.f32 %v2450_v16, %v2432_v32  ;;  %v4926_v39 = vld [vmem:[#allocation2] sm:$0xff] }
 0x1c0   : > { %v3194_v28 = vsub.f32 %v3192_v61, %v3193_v52 }
 0x1c1   : > { %3180 = vmatmul.f32.gmra.mxu0 %v3179_v9  ;;  %3325 = vmatmul.f32.gmra.mxu1 %v7313_v18  ;;  %v7412_v6 = vand.u32 4294901760, %v2534_v29 }
 0x1c2   : > { %3489 = vmatmul.f32.gmra.mxu3 %v3177_v0  ;;  %3413 = vmatmul.f32.gmra.mxu2 %v3176_v63  ;;  %v2535_v63 = vadd.f32 %v2527_v36, %v8883_v54  ;;  %v3195_v30 = vand.u32 4294901760, %v3194_v28 }
 0x1c3   : > { %3647 = vmatpush.msrb.mxu1 %v7190_v50  ;;  %v2476_v50 = vmul.f32 %v4926_v39, %v7032_v55  ;;  %v3200_v12 = vsub.f32 %v2534_v29, %v7412_v6 }
 0x1c4   : > { %v7403_v10 = vpop.f32.mrf.mxu3 }
 0x1c5   : > { %3649 = vmatpush.msrb.mxu1 %v7230_v4  ;;  %v7408_v22 = vpop.f32.mrf.mxu1  ;;  %v4927_v4 = vld [vmem:[#allocation2 + $0x91] sm:$0xff]  ;;  %v2484_v13 = vadd.f32 %v2476_v50, %v2458_v62  ;;  %v3201_v40 = vand.u32 4294901760, %v3200_v12 }
 0x1c6   : > { %v7406_v59 = vpop.f32.mrf.mxu0  ;;  %8882 = vst [vmem:[#allocation44_spill] sm:$0xff] %v7408_v22  ;;  %v7410_v47 = vpop.f32.mrf.mxu2  ;;  %v2502_v17 = vmul.f32 %v4927_v4, %v7084_v60  ;;  %v7430_v60 = vand.u32 4294901760, %v2535_v63 }
 0x1c7   : > { %8881 = vst [vmem:[#allocation12_spill] sm:$0xff] %v7406_v59  ;;  %3651 = vmatpush.msrb.mxu1 %v7232_v25 }
 0x1c8   : > { %v2510_v7 = vadd.f32 %v2502_v17, %v2484_v13  ;;  %v3208_v51 = vsub.f32 %v2535_v63, %v7430_v60 }
 0x1c9   : > { %3188 = vmatmul.f32.gmra.mxu0 %v3187_v1  ;;  %3329 = vmatmul.f32.gmra.mxu1 %v7337_v42 }
 0x1ca   : > { %3495 = vmatmul.f32.gmra.mxu3 %v3185_v53  ;;  %3418 = vmatmul.f32.gmra.mxu2 %v3184_v24  ;;  %v3202_v24 = vsub.f32 %v3200_v12, %v3201_v40  ;;  %v2536_v57 = vadd.f32 %v2528_v8, %v2510_v7  ;;  %v3209_v53 = vand.u32 4294901760, %v3208_v51 }
 0x1cc   : > { %v7421_v48 = vpop.f32.mrf.mxu3  ;;  %v3203_v9 = vand.u32 4294901760, %v3202_v24  ;;  %v7442_v33 = vand.u32 4294901760, %v2536_v57  ;;  %v3210_v56 = vsub.f32 %v3208_v51, %v3209_v53 }
 0x1cd   : > { %v7425_v25 = vpop.f32.mrf.mxu1 }
 0x1ce   : > { %v7423_v55 = vpop.f32.mrf.mxu0  ;;  %8885 = vst [vmem:[#allocation20_spill] sm:$0xff] %v7425_v25  ;;  %v7428_v0 = vpop.f32.mrf.mxu2  ;;  %v3216_v2 = vsub.f32 %v2536_v57, %v7442_v33  ;;  %v3211_v29 = vand.u32 4294901760, %v3210_v56 }
 0x1cf   : > { %8884 = vst [vmem:[#allocation13_spill] sm:$0xff] %v7423_v55 }
 0x1d0   : > { %v3217_v16 = vand.u32 4294901760, %v3216_v2 }
 0x1d1   : > { %3196 = vmatmul.f32.gmra.mxu0 %v3195_v30  ;;  %3333 = vmatmul.f32.gmra.mxu1 %v7362_v46 }
 0x1d2   : > { %3501 = vmatmul.f32.gmra.mxu3 %v3193_v52  ;;  %3423 = vmatmul.f32.gmra.mxu2 %v3192_v61  ;;  %v3218_v62 = vsub.f32 %v3216_v2, %v3217_v16 }
 0x1d4   : > { %v7434_v49 = vpop.f32.mrf.mxu3  ;;  %v3219_v36 = vand.u32 4294901760, %v3218_v62 }
 0x1d5   : > { %v7438_v19 = vpop.f32.mrf.mxu1 }
 0x1d6   : > { %v7436_v3 = vpop.f32.mrf.mxu0  ;;  %8887 = vst [vmem:[#allocation37_spill] sm:$0xff] %v7438_v19  ;;  %v7440_v38 = vpop.f32.mrf.mxu2 }
 0x1d7   : > { %8886 = vst [vmem:[#allocation6_spill] sm:$0xff] %v7436_v3 }
 0x1d9   : > { %3204 = vmatmul.f32.gmra.mxu0 %v3203_v9  ;;  %3337 = vmatmul.f32.gmra.mxu1 %v7390_v41 }
 0x1da   : > { %3507 = vmatmul.f32.gmra.mxu3 %v3201_v40  ;;  %3428 = vmatmul.f32.gmra.mxu2 %v3200_v12 }
 0x1dc   : > { %v7446_v11 = vpop.f32.mrf.mxu3 }
 0x1dd   : > { %v7450_v43 = vpop.f32.mrf.mxu1 }
 0x1de   : > { %v7448_v32 = vpop.f32.mrf.mxu0  ;;  %8889 = vst [vmem:[#allocation36_spill] sm:$0xff] %v7450_v43  ;;  %v7452_v61 = vpop.f32.mrf.mxu2 }
 0x1df   : > { %8888 = vst [vmem:[#allocation17_spill] sm:$0xff] %v7448_v32 }
 0x1e1   : > { %3212 = vmatmul.f32.gmra.mxu0 %v3211_v29  ;;  %3341 = vmatmul.f32.gmra.mxu1 %v7412_v6 }
 0x1e2   : > { %3513 = vmatmul.f32.gmra.mxu3 %v3209_v53  ;;  %3433 = vmatmul.f32.gmra.mxu2 %v3208_v51 }
 0x1e4   : > { %v7455_v1 = vpop.f32.mrf.mxu3 }
 0x1e5   : > { %v7459_v39 = vpop.f32.mrf.mxu1 }
 0x1e6   : > { %v7457_v52 = vpop.f32.mrf.mxu0  ;;  %8891 = vst [vmem:[#allocation11_spill] sm:$0xff] %v7459_v39  ;;  %v7461_v50 = vpop.f32.mrf.mxu2 }
 0x1e7   : > { %8890 = vst [vmem:[#allocation47_spill] sm:$0xff] %v7457_v52 }
 0x1e9   : > { %3220 = vmatmul.f32.gmra.mxu0 %v3219_v36  ;;  %3345 = vmatmul.f32.gmra.mxu1 %v7430_v60 }
 0x1ea   : > { %3519 = vmatmul.f32.gmra.mxu3 %v3217_v16  ;;  %3438 = vmatmul.f32.gmra.mxu2 %v3216_v2 }
 0x1ec   : > { %v7464_v4 = vpop.f32.mrf.mxu3 }
 0x1ed   : > { %v7466_v17 = vpop.f32.mrf.mxu1 }
 0x1ee   : > { %8892 = vst [vmem:[#allocation7_spill] sm:$0xff] %v7466_v17  ;;  %v7468_v28 = vpop.f32.mrf.mxu0  ;;  %v7470_v12 = vpop.f32.mrf.mxu2 }
 0x1f1   : > { %3349 = vmatmul.f32.gmra.mxu1 %v7442_v33  ;;  %3588 = vmatmul.f32.vlgmr.msrb.gmra.mxu0 %v7284_v34 }
 0x1f4   : > { %v7474_v54 = vpop.f32.mrf.mxu3 }
 0x1f6   : > { %v7476_v63 = vpop.f32.mrf.mxu0  ;;  %v7478_v13 = vpop.f32.mrf.mxu1 }
 0x1f7   : > { %v7480_v44 = vpop.f32.mrf.mxu2 }
 0x1f9   : > { %3592 = vmatmul.f32.gmra.mxu0 %v7313_v18  ;;  %3653 = vmatmul.f32.vlgmr.msrb.gmra.mxu1 %v7284_v34 }
 0x1fd   : > { %v7488_v40 = vpop.f32.mrf.mxu3 }
 0x1fe   : > { %v7484_v8 = vpop.f32.mrf.mxu0  ;;  %v7486_v30 = vpop.f32.mrf.mxu1 }
 0x1ff   : > { %v7490_v7 = vpop.f32.mrf.mxu2 }
 0x201   : > { %3596 = vmatmul.f32.gmra.mxu0 %v7337_v42  ;;  %3657 = vmatmul.f32.gmra.mxu1 %v7313_v18 }
 0x205   : > { %v7500_v9 = vpop.f32.mrf.mxu3 }
 0x206   : > { %v7494_v24 = vpop.f32.mrf.mxu0  ;;  %v7496_v51 = vpop.f32.mrf.mxu1 }
 0x207   : > { %v7498_v57 = vpop.f32.mrf.mxu2 }
 0x209   : > { %3600 = vmatmul.f32.gmra.mxu0 %v7362_v46  ;;  %3661 = vmatmul.f32.gmra.mxu1 %v7337_v42 }
 0x20d   : > { %v7512_v18 = vpop.f32.mrf.mxu3 }
 0x20e   : > { %v7504_v34 = vpop.f32.mrf.mxu0  ;;  %v7506_v53 = vpop.f32.mrf.mxu1 }
 0x20f   : > { %v7508_v56 = vpop.f32.mrf.mxu2 }
 0x211   : > { %3604 = vmatmul.f32.gmra.mxu0 %v7390_v41  ;;  %3665 = vmatmul.f32.gmra.mxu1 %v7362_v46 }
 0x215   : > { %v7522_v42 = vpop.f32.mrf.mxu3 }
 0x216   : > { %v7514_v2 = vpop.f32.mrf.mxu0  ;;  %v7516_v29 = vpop.f32.mrf.mxu1 }
 0x217   : > { %v7518_v16 = vpop.f32.mrf.mxu2 }
 0x219   : > { %3608 = vmatmul.f32.gmra.mxu0 %v7412_v6  ;;  %3669 = vmatmul.f32.gmra.mxu1 %v7390_v41 }
 0x21d   : > { %v7536_v26 = vpop.f32.mrf.mxu3 }
 0x21e   : > { %v7524_v62 = vpop.f32.mrf.mxu0  ;;  %v7526_v36 = vpop.f32.mrf.mxu1  ;;  %8893 = vst [vmem:[#allocation23_spill] sm:$0xff] %v7536_v26 }
 0x21f   : > { %v7530_v46 = vpop.f32.mrf.mxu2 }
 0x221   : > { %3612 = vmatmul.f32.gmra.mxu0 %v7430_v60  ;;  %3673 = vmatmul.f32.gmra.mxu1 %v7412_v6 }
 0x225   : > { %v7544_v27 = vpop.f32.mrf.mxu3 }
 0x226   : > { %v7532_v17 = vpop.f32.mrf.mxu0  ;;  %v7534_v52 = vpop.f32.mrf.mxu1  ;;  %8894 = vst [vmem:[#allocation34_spill] sm:$0xff] %v7544_v27  ;;  %v2765_v27 = vadd.f32 %v7351_v20, %v7360_v45 }
 0x227   : > { %v7540_v41 = vpop.f32.mrf.mxu2 }
 0x229   : > { %3616 = vmatmul.f32.gmra.mxu0 %v7442_v33  ;;  %3677 = vmatmul.f32.gmra.mxu1 %v7430_v60 }
 0x22d   : > { %v7549_v31 = vpop.f32.mrf.mxu3 }
 0x22e   : > { %v7542_v39 = vpop.f32.mrf.mxu1  ;;  %v3165_v32 = vpop.f32.mrf.mxu0  ;;  %8896 = vst [vmem:[#allocation26_spill] sm:$0xff] %v7549_v31 }
 0x22f   : > { %v7547_v3 = vpop.f32.mrf.mxu2 }
 0x230   : > { %8895 = vst [vmem:[#allocation15_spill] sm:$0xff] %v7547_v3  ;;  %v2847_v3 = vadd.f32 %v7468_v28, %v2765_v27 }
 0x231   : > { %3681 = vmatmul.f32.gmra.mxu1 %v7442_v33 }
 0x235   : > { %v3478_v60 = vpop.f32.mrf.mxu3 }
 0x236   : > { %v3173_v6 = vpop.f32.mrf.mxu0  ;;  %v3322_v43 = vpop.f32.mrf.mxu1 }
 0x237   : > { %v3404_v58 = vpop.f32.mrf.mxu2 }
 0x23d   : > { %v7561_v33 = vpop.f32.mrf.mxu3 }
 0x23e   : > { %v7551_v19 = vpop.f32.mrf.mxu0  ;;  %v3326_v55 = vpop.f32.mrf.mxu1  ;;  %8899 = vst [vmem:[#allocation30_spill] sm:$0xff] %v7561_v33 }
 0x23f   : > { %v3409_v22 = vpop.f32.mrf.mxu2 }
 0x245   : > { %v7569_v31 = vpop.f32.mrf.mxu3 }
 0x246   : > { %v7553_v25 = vpop.f32.mrf.mxu0  ;;  %v7555_v59 = vpop.f32.mrf.mxu1  ;;  %8903 = vst [vmem:[#allocation38_spill] sm:$0xff] %v7569_v31  ;;  %v2769_v31 = vadd.f32 %v7375_v5, %v7388_v35  ;;  %v2777_v5 = vadd.f32 %v7421_v48, %v7428_v0  ;;  %v2785_v48 = vadd.f32 %v7446_v11, %v7452_v61 }
 0x247   : > { %v7563_v37 = vpop.f32.mrf.mxu2 }
 0x248   : > { %8900 = vst [vmem:[#allocation21_spill] sm:$0xff] %v7563_v37 }
 0x24e   : > { %v7557_v23 = vpop.f32.mrf.mxu0  ;;  %v7559_v15 = vpop.f32.mrf.mxu1 }
 0x24f   : > { %8897 = vst [vmem:[#allocation25_spill] sm:$0xff] %v7557_v23  ;;  %v7579_v33 = vpop.f32.mrf.mxu2 }
 0x250   : > { %8898 = vst [vmem:[#allocation18_spill] sm:$0xff] %v7559_v15  ;;  %v2921_v15 = vadd.f32 %v7478_v13, %v2847_v3  ;;  %v2773_v13 = vadd.f32 %v7403_v10, %v7410_v47 }
 0x252   : > { %v3032_v37 = vadd.f32 %v7480_v44, %v2921_v15 }
 0x254   : > { %v3097_v45 = vadd.f32 %v7474_v54, %v3032_v37  ;;  %v2781_v37 = vadd.f32 %v7434_v49, %v7440_v38  ;;  %v2872_v49 = vadd.f32 %v7514_v2, %v2785_v48  ;;  %v4020_v48 = vld [vmem:[%s8390_s8 + $0x78] sm:$0xff] }
 0x256   : > { %v7565_v14 = vpop.f32.mrf.mxu0  ;;  %v7567_v21 = vpop.f32.mrf.mxu1  ;;  %v3166_v3 = vadd.f32 %v3165_v32, %v3097_v45  ;;  %v2867_v0 = vadd.f32 %v7504_v34, %v2781_v37  ;;  %v2951_v11 = vadd.f32 %v7526_v36, %v2872_v49  ;;  %v7661_v49 = vand.u32 4294901760, %v4020_v48 }
 0x257   : > { %8901 = vst [vmem:[#allocation9_spill] sm:$0xff] %v7565_v14  ;;  %v7582_v14 = vpop.f32.mrf.mxu3  ;;  %v7595_v15 = vpop.f32.mrf.mxu2 }
 0x258   : > { %8902 = vst [vmem:[#allocation22_spill] sm:$0xff] %v7567_v21  ;;  %v2852_v21 = vadd.f32 %v7476_v63, %v2769_v31  ;;  %v3323_v44 = vadd.f32 %v3322_v43, %v3166_v3  ;;  %v2857_v31 = vadd.f32 %v7484_v8, %v2773_v13  ;;  %v2945_v38 = vadd.f32 %v7516_v29, %v2867_v0  ;;  %v8906_v13 = vld [vmem:[#allocation23_spill] sm:$0xff] }
 0x259   : > { %4022 = vmatpush.msrb.mxu2 %v7661_v49  ;;  %4337 = vmatpush.msra.mxu1 %v7661_v49 }
 0x25a   : > { %v2927_v28 = vadd.f32 %v7486_v30, %v2852_v21  ;;  %v2862_v21 = vadd.f32 %v7494_v24, %v2777_v5  ;;  %v2933_v32 = vadd.f32 %v7496_v51, %v2857_v31  ;;  %v3405_v43 = vadd.f32 %v3404_v58, %v3323_v44  ;;  %v8907_v44 = vld [vmem:[#allocation30_spill] sm:$0xff]  ;;  %v8908_v31 = vld [vmem:[#allocation15_spill] sm:$0xff] }
 0x25b   : > { %v2789_v24 = vadd.f32 %v7455_v1, %v7461_v50  ;;  %v3048_v2 = vadd.f32 %v7518_v16, %v2945_v38 }
 0x25c   : > { %v3036_v35 = vadd.f32 %v7490_v7, %v2927_v28  ;;  %v2939_v54 = vadd.f32 %v7506_v53, %v2862_v21  ;;  %v3040_v30 = vadd.f32 %v7498_v57, %v2933_v32  ;;  %v3479_v58 = vadd.f32 %v3478_v60, %v3405_v43  ;;  %v8905_v28 = vld [vmem:[#allocation18_spill] sm:$0xff] }
 0x25d   : > { %v2877_v57 = vadd.f32 %v7524_v62, %v2789_v24  ;;  %v3113_v45 = vadd.f32 %v7522_v42, %v3048_v2  ;;  %v4019_v24 = vld [vmem:[%s8390_s8 + $0x70] sm:$0xff]  ;;  %v8914_v2 = vld [vmem:[#allocation38_spill] sm:$0xff] }
 0x25e   : > { %v7574_v26 = vpop.f32.mrf.mxu0  ;;  %v7576_v23 = vpop.f32.mrf.mxu1  ;;  %v3101_v8 = vadd.f32 %v7488_v40, %v3036_v35  ;;  %v3044_v51 = vadd.f32 %v7508_v56, %v2939_v54  ;;  %v2793_v40 = vadd.f32 %v7464_v4, %v7470_v12  ;;  %v3105_v29 = vadd.f32 %v7500_v9, %v3040_v30  ;;  %v8910_v42 = vld [vmem:[#allocation9_spill] sm:$0xff]  ;;  %v8912_v54 = vld [vmem:[#allocation34_spill] sm:$0xff] }
 0x25f   : > { %v7601_v63 = vpop.f32.mrf.mxu3  ;;  %v3429_v34 = vpop.f32.mrf.mxu2  ;;  %v2957_v50 = vadd.f32 %v7534_v52, %v2877_v57  ;;  %v7677_v57 = vsub.f32 %v4020_v48, %v7661_v49 }
 0x260   : > { %v3174_v7 = vadd.f32 %v3173_v6, %v3101_v8  ;;  %v2882_v1 = vadd.f32 %v7532_v17, %v2793_v40  ;;  %v3182_v36 = vadd.f32 %v7551_v19, %v3105_v29  ;;  %v3109_v12 = vadd.f32 %v7512_v18, %v3044_v51 }
 0x261   : > { %4249 = vmatpush.msra.mxu0 %v7677_v57 }
 0x262   : > { %v3327_v61 = vadd.f32 %v3326_v55, %v3174_v7  ;;  %v3052_v55 = vadd.f32 %v7530_v46, %v2951_v11  ;;  %v2963_v16 = vadd.f32 %v7542_v39, %v2882_v1  ;;  %v3190_v17 = vadd.f32 %v7553_v25, %v3109_v12  ;;  %v8913_v11 = vld [vmem:[#allocation26_spill] sm:$0xff] }
 0x263   : > { %v3331_v52 = vadd.f32 %v7555_v59, %v3182_v36  ;;  %v3056_v46 = vadd.f32 %v7540_v41, %v2957_v50  ;;  %v8909_v59 = vld [vmem:[#allocation21_spill] sm:$0xff]  ;;  %v8911_v41 = vld [vmem:[#allocation22_spill] sm:$0xff] }
 0x264   : > { %v3410_v4 = vadd.f32 %v3409_v22, %v3327_v61  ;;  %v8904_v22 = vld [vmem:[#allocation25_spill] sm:$0xff]  ;;  %v3335_v3 = vadd.f32 %v8905_v28, %v3190_v17  ;;  %v3117_v39 = vadd.f32 %v8906_v13, %v3052_v55  ;;  %v3060_v35 = vadd.f32 %v8908_v31, %v2963_v16 }
 0x265   : > { %v3198_v18 = vadd.f32 %v8904_v22, %v3113_v45  ;;  %v3415_v37 = vadd.f32 %v8909_v59, %v3331_v52  ;;  %v3121_v8 = vadd.f32 %v8912_v54, %v3056_v46  ;;  %v8572_v55 = vand.u32 4294901760, %v7677_v57 }
 0x266   : > { %v7587_v20 = vpop.f32.mrf.mxu0  ;;  %v7589_v27 = vpop.f32.mrf.mxu1  ;;  %v3485_v5 = vadd.f32 %v8907_v44, %v3410_v4  ;;  %v3206_v21 = vadd.f32 %v8910_v42, %v3117_v39  ;;  %v3420_v38 = vadd.f32 %v7579_v33, %v3335_v3  ;;  %v3125_v61 = vadd.f32 %v8913_v11, %v3060_v35  ;;  %v4017_v4 = vld [vmem:[%s8390_s8 + $0x60] sm:$0xff]  ;;  %v4016_v3 = vld [vmem:[%s8390_s8 + $0x58] sm:$0xff] }
 0x267   : > { %v7633_v62 = vpop.f32.mrf.mxu3  ;;  %v3339_v32 = vadd.f32 %v8911_v41, %v3198_v18  ;;  %v3214_v51 = vadd.f32 %v7574_v26, %v3121_v8  ;;  %v3491_v29 = vadd.f32 %v8914_v2, %v3415_v37  ;;  %v4018_v26 = vld [vmem:[%s8390_s8 + $0x68] sm:$0xff]  ;;  %v4121_v16 = vsub.f32 %v7677_v57, %v8572_v55 }
 0x268   : > { %v3343_v7 = vadd.f32 %v7576_v23, %v3206_v21 }
 0x269   : > { %v3425_v33 = vadd.f32 %v7595_v15, %v3339_v32  ;;  %v3347_v1 = vadd.f32 %v7589_v27, %v3214_v51  ;;  %v7690_v15 = vand.u32 4294901760, %v4018_v26  ;;  %v4122_v39 = vand.u32 4294901760, %v4121_v16 }
 0x26b   : > { %4123 = vmatpush.msrb.mxu3 %v4122_v39 }
 0x26e   : > { %v7607_v10 = vpop.f32.mrf.mxu1  ;;  %v3589_v47 = vpop.f32.mrf.mxu0 }
 0x26f   : > { %v3590_v53 = vadd.f32 %v3589_v47, %v3479_v58  ;;  %v3434_v47 = vpop.f32.mrf.mxu2  ;;  %v3514_v23 = vpop.f32.mrf.mxu3 }
 0x270   : > { %v3435_v46 = vadd.f32 %v3434_v47, %v3347_v1 }
 0x272   : > { %v7758_v48 = vadd.f32 %v3514_v23, %v3435_v46 }
 0x276   : > { %v3654_v6 = vpop.f32.mrf.mxu1  ;;  %v3593_v56 = vpop.f32.mrf.mxu0 }
 0x277   : > { %v7628_v60 = vadd.f32 %v3654_v6, %v3590_v53  ;;  %v3594_v43 = vadd.f32 %v3593_v56, %v3485_v5  ;;  %v7679_v53 = vand.u32 4294901760, %v4019_v24  ;;  %v3222_v6 = vadd.f32 %v7587_v20, %v3125_v61  ;;  %v3439_v13 = vpop.f32.mrf.mxu2 }
 0x278   : > { %v3430_v56 = vadd.f32 %v3429_v34, %v3343_v7  ;;  %v3497_v20 = vadd.f32 %v7582_v14, %v3420_v38  ;;  %v7707_v34 = vsub.f32 %v4018_v26, %v7690_v15  ;;  %v7715_v14 = vand.u32 4294901760, %v4017_v4 }
 0x279   : > { %v7637_v9 = vmul.f32 0.70710677, %v7628_v60  ;;  %4024 = vmatpush.msrb.mxu2 %v7679_v53  ;;  %v7695_v36 = vsub.f32 %v4019_v24, %v7679_v53  ;;  %v3351_v27 = vadd.f32 %v7607_v10, %v3222_v6  ;;  %4339 = vmatpush.msra.mxu1 %v7679_v53  ;;  %v7718_v10 = vadd.f32 %v7601_v63, %v3425_v33 }
 0x27a   : > { %v8566_v28 = vand.u32 4294901760, %v7707_v34  ;;  %v7736_v5 = vadd.f32 %v7633_v62, %v3430_v56  ;;  %v7748_v21 = vsub.f32 %v4017_v4, %v7715_v14  ;;  %v7750_v62 = vand.u32 4294901760, %v4016_v3 }
 0x27b   : > { %v7644_v19 = vand.u32 2147483647, %v7637_v9  ;;  %v8568_v17 = vand.u32 4294901760, %v7695_v36  ;;  %4026 = vmatpush.msrb.mxu2 %v7690_v15  ;;  %4252 = vmatpush.msra.mxu0 %v7695_v36  ;;  %v3440_v31 = vadd.f32 %v3439_v13, %v3351_v27  ;;  %vm3701_vm4 = vcmp.ge.f32.partialorder %v7637_v9, 0.0 }
 0x27c   : > { %4341 = vmatpush.msra.mxu1 %v7690_v15  ;;  %v8564_v24 = vand.u32 4294901760, %v7748_v21 }
 0x27d   : > { %v3725_v25 = vmul.f32 0.3275911, %v7644_v19  ;;  %v4127_v44 = vsub.f32 %v7695_v36, %v8568_v17  ;;  %4028 = vmatpush.msrb.mxu2 %v7715_v14  ;;  %4255 = vmatpush.msra.mxu0 %v7707_v34  ;;  %v3933_v32 = vsub.f32 0.0, %v7644_v19 }
 0x27e   : > { %v3658_v0 = vpop.f32.mrf.mxu1  ;;  %v3597_v40 = vpop.f32.mrf.mxu0  ;;  %4343 = vmatpush.msra.mxu1 %v7715_v14  ;;  %v4139_v26 = vsub.f32 %v7748_v21, %v8564_v24 }
 0x27f   : > { %v7659_v30 = vadd.f32 1.0, %v3725_v25  ;;  %v7668_v58 = vadd.f32 %v3658_v0, %v3594_v43  ;;  %v3598_v22 = vadd.f32 %v3597_v40, %v3491_v29  ;;  %v4133_v25 = vsub.f32 %v7707_v34, %v8566_v28  ;;  %v4015_v43 = vld [vmem:[%s8390_s8 + $0x50] sm:$0xff]  ;;  %v3520_v0 = vpop.f32.mrf.mxu3  ;;  %4030 = vmatpush.msrb.mxu2 %v7750_v62  ;;  %4258 = vmatpush.msra.mxu0 %v7748_v21 }
 0x280   : > { %v4128_v42 = vand.u32 4294901760, %v4127_v44  ;;  %4345 = vmatpush.msra.mxu1 %v7750_v62  ;;  %v7771_v51 = vadd.f32 %v3520_v0, %v3440_v31  ;;  %v7775_v40 = vsub.f32 %v4016_v3, %v7750_v62  ;;  %v7777_v33 = vand.u32 4294901760, %v4015_v43 }
 0x281   : > { %4859 = vrcp.f32 %v7659_v30  ;;  %v7688_v50 = vmul.f32 0.70710677, %v7668_v58  ;;  %v3752_v41 = vand.u32 2147483648, %v7659_v30  ;;  %v3750_v8 = vand.u32 2147483647, %v7659_v30 }
 0x282   : > { %4129 = vmatpush.msrb.mxu3 %v4128_v42  ;;  %v4134_v38 = vand.u32 4294901760, %v4133_v25  ;;  %vm3746_vm1 = vweird.f32 %v7659_v30  ;;  %v3941_v2 = vmul.f32 %v3933_v32, %v7644_v19  ;;  %v8562_v1 = vand.u32 4294901760, %v7775_v40  ;;  %4032 = vmatpush.msrb.mxu2 %v7777_v33 }
 0x283   : > { %v7704_v12 = vand.u32 2147483647, %v7688_v50  ;;  %v3753_v23 = vor.u32 1.1754944e-38, %v3752_v41  ;;  %vm3751_vm3 = vcmp.eq.f32.partialorder %v3750_v8, 8.507059e+37  ;;  %4261 = vmatpush.msra.mxu0 %v7775_v40  ;;  %v7795_v19 = vmul.f32 0.5, %v7628_v60  ;;  %4347 = vmatpush.msra.mxu1 %v7777_v33 }
 0x284   : > { %4135 = vmatpush.msrb.mxu3 %v4134_v38  ;;  %v4140_v16 = vand.u32 4294901760, %v4139_v26  ;;  %v4145_v46 = vsub.f32 %v7775_v40, %v8562_v1  ;;  %v7814_v39 = vsub.f32 %v4015_v43, %v7777_v33  ;;  %v8570_v44 = vmov -1.0  }
 0x285   : > { %v3726_v18 = vmul.f32 0.3275911, %v7704_v12  ;;  %v3934_v60 = vsub.f32 0.0, %v7704_v12  ;;  %v7817_v31 = vsel %vm3701_vm4, 1.0, %v8570_v44  ;;  %v7824_v41 = vmul.f32 0.5, %v7668_v58  ;;  %v4013_v58 = vld [vmem:[%s8390_s8 + $0x40] sm:$0xff] }
 0x286   : > { %v3662_v52 = vpop.f32.mrf.mxu1  ;;  %v3601_v47 = vpop.f32.mrf.mxu0  ;;  %4141 = vmatpush.msrb.mxu3 %v4140_v16  ;;  %v4146_v9 = vand.u32 4294901760, %v4145_v46  ;;  %4264 = vmatpush.msra.mxu0 %v7814_v39  ;;  %vm3702_vm6 = vcmp.ge.f32.partialorder %v7688_v50, 0.0  ;;  %v8560_v38 = vand.u32 4294901760, %v7814_v39 }
 0x287   : > { %v7721_v45 = vpop.eup %4859  ;;  %v7739_v35 = vadd.f32 1.0, %v3726_v18  ;;  %v7744_v59 = vadd.f32 %v3662_v52, %v3598_v22  ;;  %v3602_v61 = vadd.f32 %v3601_v47, %v3497_v20  ;;  %v3949_v22 = vmul.f32 1.442695, %v3941_v2  ;;  %v4014_v47 = vld [vmem:[%s8390_s8 + $0x48] sm:$0xff] }
 0x288   : > { %v3742_v63 = vmul.f32 %v7721_v45, %v7659_v30  ;;  %vm3747_vm0 = vweird.f32 %v7721_v45  ;;  %4147 = vmatpush.msrb.mxu3 %v4146_v9  ;;  %v3942_v43 = vmul.f32 %v3934_v60, %v7704_v12  ;;  %v7862_v46 = vsel %vm3702_vm6, 1.0, %v8570_v44 }
 0x289   : > { %4861 = vrcp.f32 %v7739_v35  ;;  %v7766_v7 = vmul.f32 0.70710677, %v7744_v59  ;;  %vm3748_vm2 = vmor %vm3746_vm1, %vm3747_vm0  ;;  %v3765_v25 = vand.u32 2147483647, %v7739_v35  ;;  %vm3761_vm7 = vweird.f32 %v7739_v35 }
 0x28a   : > { %v3743_v37 = vsub.f32 1.0, %v3742_v63 }
 0x28b   : > { %v7783_v29 = vand.u32 2147483647, %v7766_v7  ;;  %vm3766_vm9 = vcmp.eq.f32.partialorder %v3765_v25, 8.507059e+37  ;;  %vm3703_vm0 = vcmp.ge.f32.partialorder %v7766_v7, 0.0 }
 0x28c   : > { %v3744_v54 = vmul.f32 %v7721_v45, %v3743_v37  ;;  %v3767_v37 = vand.u32 2147483648, %v7739_v35 }
 0x28d   : > { %v3727_v27 = vmul.f32 0.3275911, %v7783_v29  ;;  %v3935_v9 = vsub.f32 0.0, %v7783_v29 }
 0x28e   : > { %v3745_v11 = vadd.f32 %v7721_v45, %v3744_v54  ;;  %v3666_v30 = vpop.f32.mrf.mxu1  ;;  %v3605_v26 = vpop.f32.mrf.mxu0 }
 0x28f   : > { %v7791_v56 = vadd.f32 %v3666_v30, %v3602_v61  ;;  %v4862_v4 = vpop.eup %4861  ;;  %v7808_v18 = vadd.f32 1.0, %v3727_v27  ;;  %v7841_v30 = vand.u32 4294901760, %v4014_v47  ;;  %v3606_v25 = vadd.f32 %v3605_v26, %v7718_v10 }
 0x290   : > { %v3749_v6 = vsel %vm3748_vm2, %v7721_v45, %v3745_v11  ;;  %v3757_v45 = vmul.f32 %v4862_v4, %v7739_v35  ;;  %vm3762_vm5 = vweird.f32 %v4862_v4  ;;  %v3768_v11 = vor.u32 1.1754944e-38, %v3767_v37 }
 0x291   : > { %v7797_v20 = vsel %vm3751_vm3, %v3753_v23, %v3749_v6  ;;  %v7811_v3 = vmul.f32 0.70710677, %v7791_v56  ;;  %4863 = vrcp.f32 %v7808_v18  ;;  %vm3763_vm8 = vmor %vm3761_vm7, %vm3762_vm5  ;;  %v3780_v2 = vand.u32 2147483647, %v7808_v18  ;;  %4034 = vmatpush.msrb.mxu2 %v7841_v30  ;;  %4349 = vmatpush.msra.mxu1 %v7841_v30 }
 0x292   : > { %v3861_v52 = vmul.f32 1.0614054, %v7797_v20  ;;  %v3758_v63 = vsub.f32 1.0, %v3757_v45  ;;  %4865 = vpow2.f32 %v3949_v22  ;;  %v7845_v6 = vand.u32 4294901760, %v4013_v58 }
 0x293   : > { %v7833_v0 = vand.u32 2147483647, %v7811_v3  ;;  %v7856_v45 = vsub.f32 %v4014_v47, %v7841_v30  ;;  %vm3776_vm10 = vweird.f32 %v7808_v18  ;;  %vm7878_vm11 = vcmp.eq.f32.partialorder %v3780_v2, 8.507059e+37 }
 0x294   : > { %v3869_v13 = vadd.f32 -1.4531521, %v3861_v52  ;;  %v3759_v32 = vmul.f32 %v4862_v4, %v3758_v63  ;;  %v4151_v52 = vsub.f32 %v7814_v39, %v8560_v38  ;;  %v3951_v63 = vmul.f32 1.442695, %v3942_v43  ;;  %4036 = vmatpush.msrb.mxu2 %v7845_v6  ;;  %v4012_v43 = vld [vmem:[%s8390_s8 + $0x38] sm:$0xff]  ;;  %4351 = vmatpush.msra.mxu1 %v7845_v6 }
 0x295   : > { %v3728_v61 = vmul.f32 0.3275911, %v7833_v0  ;;  %4267 = vmatpush.msra.mxu0 %v7856_v45  ;;  %vm3704_vm3 = vcmp.ge.f32.partialorder %v7811_v3, 0.0  ;;  %v4008_v3 = vld [vmem:[%s8390_s8 + $0x18] sm:$0xff] }
 0x296   : > { %v3877_v42 = vmul.f32 %v3869_v13, %v7797_v20  ;;  %v3760_v8 = vadd.f32 %v4862_v4, %v3759_v32  ;;  %v3782_v32 = vand.u32 2147483648, %v7808_v18  ;;  %v3670_v47 = vpop.f32.mrf.mxu1 }
 0x297   : > { %v4864_v27 = vpop.eup %4863  ;;  %v7849_v35 = vadd.f32 1.0, %v3728_v61  ;;  %v7892_v26 = vadd.f32 %v3670_v47, %v3606_v25 }
 0x298   : > { %v3885_v54 = vadd.f32 1.4214138, %v3877_v42  ;;  %v3764_v23 = vsel %vm3763_vm8, %v4862_v4, %v3760_v8  ;;  %v3772_v60 = vmul.f32 %v4864_v27, %v7808_v18  ;;  %v4866_v13 = vpop.eup %4865  ;;  %v8561_v8 = vand.u32 4294901760, %v7856_v45 }
 0x299   : > { %v7847_v16 = vsel %vm3766_vm9, %v3768_v11, %v3764_v23  ;;  %4867 = vrcp.f32 %v7849_v35  ;;  %vm3777_vm12 = vweird.f32 %v4864_v27  ;;  %v7887_v23 = vld [vmem:[%s8390_s8 + $0x30] sm:$0xff]  ;;  %v7903_v38 = vmul.f32 0.70710677, %v7892_v26 }
 0x29a   : > { %v3893_v12 = vmul.f32 %v3885_v54, %v7797_v20  ;;  %v3862_v22 = vmul.f32 1.0614054, %v7847_v16  ;;  %v3773_v42 = vsub.f32 1.0, %v3772_v60  ;;  %v4152_v54 = vand.u32 4294901760, %v4151_v52  ;;  %vm3778_vm13 = vmor %vm3776_vm10, %vm3777_vm12 }
 0x29b   : > { %v4157_v2 = vsub.f32 %v7856_v45, %v8561_v8  ;;  %v7895_v52 = vsub.f32 %v4013_v58, %v7845_v6  ;;  %v7908_v58 = vand.u32 4294901760, %v7887_v23  ;;  %4869 = vpow2.f32 %v3951_v63 }
 0x29c   : > { %v3901_v4 = vadd.f32 -0.28449672, %v3893_v12  ;;  %v3870_v37 = vadd.f32 -1.4531521, %v3862_v22  ;;  %v3774_v12 = vmul.f32 %v4864_v27, %v3773_v42  ;;  %4153 = vmatpush.msrb.mxu3 %v4152_v54  ;;  %v3795_v63 = vand.u32 2147483647, %v7849_v35 }
 0x29d   : > { %v4158_v54 = vand.u32 4294901760, %v4157_v2  ;;  %v8563_v25 = vand.u32 4294901760, %v7895_v52  ;;  %4270 = vmatpush.msra.mxu0 %v7895_v52  ;;  %v3797_v10 = vand.u32 2147483648, %v7849_v35  ;;  %vm3791_vm15 = vweird.f32 %v7849_v35 }
 0x29e   : > { %v3909_v50 = vmul.f32 %v3901_v4, %v7797_v20  ;;  %v3878_v61 = vmul.f32 %v3870_v37, %v7847_v16  ;;  %v7897_v4 = vand.u32 4294901760, %v4012_v43  ;;  %v3783_v37 = vor.u32 1.1754944e-38, %v3782_v32 }
 0x29f   : > { %v4868_v42 = vpop.eup %4867  ;;  %4159 = vmatpush.msrb.mxu3 %v4158_v54  ;;  %vm3796_vm2 = vcmp.eq.f32.partialorder %v3795_v63, 8.507059e+37  ;;  %vm3705_vm7 = vcmp.ge.f32.partialorder %v7903_v38, 0.0 }
 0x2a0   : > { %v3917_v11 = vadd.f32 0.2548296, %v3909_v50  ;;  %v3886_v60 = vadd.f32 1.4214138, %v3878_v61  ;;  %v3775_v50 = vadd.f32 %v4864_v27, %v3774_v12  ;;  %4038 = vmatpush.msrb.mxu2 %v7897_v4  ;;  %v3787_v18 = vmul.f32 %v4868_v42, %v7849_v35  ;;  %4353 = vmatpush.msra.mxu1 %v7897_v4 }
 0x2a1   : > { %v3943_v61 = vmul.f32 %v3935_v9, %v7783_v29  ;;  %v7920_v12 = vand.u32 2147483647, %v7903_v38  ;;  %v4163_v29 = vsub.f32 %v7895_v52, %v8563_v25  ;;  %vm3792_vm14 = vweird.f32 %v4868_v42  ;;  %v3609_v25 = vpop.f32.mrf.mxu0  ;;  %v4870_v24 = vpop.eup %4869 }
 0x2a2   : > { %v3925_v22 = vmul.f32 %v3917_v11, %v7797_v20  ;;  %v3894_v32 = vmul.f32 %v3886_v60, %v7847_v16  ;;  %v3779_v47 = vsel %vm3778_vm13, %v4864_v27, %v3775_v50  ;;  %4040 = vmatpush.msrb.mxu2 %v7908_v58  ;;  %4355 = vmatpush.msra.mxu1 %v7908_v58  ;;  %vm3793_vm1 = vmor %vm3791_vm15, %vm3792_vm14  ;;  %v7945_v35 = vmul.f32 0.5, %v7744_v59 }
 0x2a3   : > { %v7916_v11 = vsel %vm7878_vm11, %v3783_v37, %v3779_v47  ;;  %v3729_v60 = vmul.f32 0.3275911, %v7920_v12  ;;  %v7936_v47 = vsub.f32 %v4012_v43, %v7897_v4  ;;  %v3937_v59 = vsub.f32 0.0, %v7920_v12 }
 0x2a4   : > { %v3965_v20 = vmul.f32 %v4866_v13, %v3925_v22  ;;  %v3902_v2 = vadd.f32 -0.28449672, %v3894_v32  ;;  %v3863_v27 = vmul.f32 1.0614054, %v7916_v11  ;;  %v3788_v22 = vsub.f32 1.0, %v3787_v18 }
 0x2a5   : > { %v4164_v32 = vand.u32 4294901760, %v4163_v29  ;;  %4273 = vmatpush.msra.mxu0 %v7936_v47 }
 0x2a6   : > { %v3973_v13 = vsub.f32 1.0, %v3965_v20  ;;  %v3910_v9 = vmul.f32 %v3902_v2, %v7847_v16  ;;  %v3871_v50 = vadd.f32 -1.4531521, %v3863_v27  ;;  %v3789_v37 = vmul.f32 %v4868_v42, %v3788_v22  ;;  %v3674_v22 = vpop.f32.mrf.mxu1 }
 0x2a7   : > { %v7933_v20 = vadd.f32 1.0, %v3729_v60  ;;  %v3798_v2 = vor.u32 1.1754944e-38, %v3797_v10  ;;  %4165 = vmatpush.msrb.mxu3 %v4164_v32  ;;  %v3610_v10 = vadd.f32 %v3609_v25, %v7736_v5  ;;  %v7975_v32 = vsub.f32 %v7887_v23, %v7908_v58 }
 0x2a8   : > { %v3981_v54 = vmul.f32 %v3973_v13, %v7817_v31  ;;  %v3918_v18 = vadd.f32 0.2548296, %v3910_v9  ;;  %v3879_v8 = vmul.f32 %v3871_v50, %v7916_v11  ;;  %v3790_v1 = vadd.f32 %v4868_v42, %v3789_v37 }
 0x2a9   : > { %v3936_v31 = vsub.f32 0.0, %v7833_v0  ;;  %4871 = vrcp.f32 %v7933_v20  ;;  %v3953_v13 = vmul.f32 1.442695, %v3943_v61  ;;  %v7954_v50 = vsel %vm3703_vm0, 1.0, %v8570_v44  ;;  %4276 = vmatpush.msra.mxu0 %v7975_v32  ;;  %v3613_v17 = vpop.f32.mrf.mxu0 }
 0x2aa   : > { %v3887_v43 = vadd.f32 1.4214138, %v3879_v8  ;;  %v3794_v27 = vsel %vm3793_vm1, %v4868_v42, %v3790_v1  ;;  %v3989_v60 = vadd.f32 1.0, %v3981_v54  ;;  %v3926_v9 = vmul.f32 %v3918_v18, %v7847_v16 }
 0x2ab   : > { %v7947_v29 = vsel %vm3796_vm2, %v3798_v2, %v3794_v27  ;;  %v3944_v42 = vmul.f32 %v3936_v31, %v7833_v0  ;;  %v8565_v61 = vand.u32 4294901760, %v7936_v47  ;;  %v7961_v63 = vadd.f32 %v3674_v22, %v3610_v10 }
 0x2ac   : > { %v3895_v8 = vmul.f32 %v3887_v43, %v7916_v11  ;;  %v3864_v1 = vmul.f32 1.0614054, %v7947_v29  ;;  %4873 = vpow2.f32 %v3953_v13  ;;  %v7964_v16 = vmul.f32 0.5, %v7791_v56 }
 0x2ad   : > { %v3997_v37 = vmul.f32 %v3989_v60, %v7795_v19  ;;  %v4169_v54 = vsub.f32 %v7936_v47, %v8565_v61  ;;  %v7971_v0 = vmul.f32 0.70710677, %v7961_v63  ;;  %v3966_v18 = vmul.f32 %v4870_v24, %v3926_v9 }
 0x2ae   : > { %v3903_v5 = vadd.f32 -0.28449672, %v3895_v8  ;;  %v3872_v7 = vadd.f32 -1.4531521, %v3864_v1  ;;  %v3955_v31 = vmul.f32 1.442695, %v3944_v42  ;;  %v3945_v43 = vmul.f32 %v3937_v59, %v7920_v12 }
 0x2af   : > { %v4872_v25 = vpop.eup %4871  ;;  %v4170_v13 = vand.u32 4294901760, %v4169_v54  ;;  %vm3806_vm4 = vweird.f32 %v7933_v20  ;;  %v3812_v24 = vand.u32 2147483648, %v7933_v20  ;;  %v7985_v23 = vand.u32 4294901760, %v3997_v37  ;;  %v4010_v12 = vld [vmem:[%s8390_s8 + $0x28] sm:$0xff] }
 0x2b0   : > { %v3911_v2 = vmul.f32 %v3903_v5, %v7916_v11  ;;  %v3880_v56 = vmul.f32 %v3872_v7, %v7947_v29  ;;  %v3802_v19 = vmul.f32 %v4872_v25, %v7933_v20  ;;  %v7988_v10 = vand.u32 2147483647, %v7971_v0 }
 0x2b1   : > { %4171 = vmatpush.msrb.mxu3 %v4170_v13  ;;  %v8567_v9 = vand.u32 4294901760, %v7975_v32  ;;  %v3974_v1 = vsub.f32 1.0, %v3966_v18  ;;  %v3810_v5 = vand.u32 2147483647, %v7933_v20  ;;  %vm3807_vm5 = vweird.f32 %v4872_v25 }
 0x2b2   : > { %v3919_v27 = vadd.f32 0.2548296, %v3911_v2  ;;  %v3888_v22 = vadd.f32 1.4214138, %v3880_v56  ;;  %v3803_v60 = vsub.f32 1.0, %v3802_v19  ;;  %v4874_v8 = vpop.eup %4873  ;;  %v4009_v56 = vld [vmem:[%s8390_s8 + $0x20] sm:$0xff]  ;;  %vm3808_vm6 = vmor %vm3806_vm4, %vm3807_vm5 }
 0x2b3   : > { %v3730_v54 = vmul.f32 0.3275911, %v7988_v10  ;;  %v4175_v2 = vsub.f32 %v7975_v32, %v8567_v9  ;;  %v3813_v13 = vor.u32 1.1754944e-38, %v3812_v24  ;;  %v3982_v28 = vmul.f32 %v3974_v1, %v7862_v46 }
 0x2b4   : > { %v3927_v42 = vmul.f32 %v3919_v27, %v7916_v11  ;;  %v3896_v59 = vmul.f32 %v3888_v22, %v7947_v29  ;;  %v3804_v7 = vmul.f32 %v4872_v25, %v3803_v60  ;;  %v8004_v11 = vand.u32 4294901760, %v4010_v12 }
 0x2b5   : > { %v8007_v27 = vsub.f32 %v3997_v37, %v7985_v23  ;;  %v8009_v60 = vadd.f32 1.0, %v3730_v54  ;;  %v4176_v61 = vand.u32 4294901760, %v4175_v2  ;;  %vm3811_vm8 = vcmp.eq.f32.partialorder %v3810_v5, 8.507059e+37 }
 0x2b6   : > { %v3967_v19 = vmul.f32 %v4874_v8, %v3927_v42  ;;  %v3904_v18 = vadd.f32 -0.28449672, %v3896_v59  ;;  %v3805_v22 = vadd.f32 %v4872_v25, %v3804_v7  ;;  %4042 = vmatpush.msrb.mxu2 %v8004_v11  ;;  %v8017_v24 = vsub.f32 %v4010_v12, %v8004_v11  ;;  %4357 = vmatpush.msra.mxu1 %v8004_v11  ;;  %v3678_v42 = vpop.f32.mrf.mxu1 }
 0x2b7   : > { %v8019_v8 = vand.u32 4294901760, %v4009_v56  ;;  %4875 = vrcp.f32 %v8009_v60  ;;  %4177 = vmatpush.msrb.mxu3 %v4176_v61  ;;  %v8027_v20 = vsel %vm3704_vm3, 1.0, %v8570_v44  ;;  %v3957_v12 = vmul.f32 1.442695, %v3945_v43 }
 0x2b8   : > { %v3912_v9 = vmul.f32 %v3904_v18, %v7947_v29  ;;  %v3809_v37 = vsel %vm3808_vm6, %v4872_v25, %v3805_v22  ;;  %v3975_v46 = vsub.f32 1.0, %v3967_v19  ;;  %4279 = vmatpush.msra.mxu0 %v8017_v24  ;;  %v3614_v5 = vadd.f32 %v3613_v17, %v7758_v48 }
 0x2b9   : > { %8917 = vst [vmem:[#allocation28_spill] sm:$0xff] %v8019_v8  ;;  %v8029_v1 = vsel %vm3811_vm8, %v3813_v13, %v3809_v37  ;;  %4044 = vmatpush.msrb.mxu2 %v8019_v8  ;;  %v8569_v61 = vand.u32 4294901760, %v8017_v24  ;;  %4359 = vmatpush.msra.mxu1 %v8019_v8  ;;  %v8573_v43 = vand.u32 4294901760, %v8007_v27  ;;  %v3990_v7 = vadd.f32 1.0, %v3982_v28 }
 0x2ba   : > { %v3920_v59 = vadd.f32 0.2548296, %v3912_v9  ;;  %v3865_v25 = vmul.f32 1.0614054, %v8029_v1  ;;  %4877 = vpow2.f32 %v3955_v31  ;;  %v8044_v9 = vsel %vm3705_vm7, 1.0, %v8570_v44 }
 0x2bb   : > { %v3938_v17 = vsub.f32 0.0, %v7988_v10  ;;  %v4181_v48 = vsub.f32 %v8017_v24, %v8569_v61  ;;  %v8050_v2 = vadd.f32 %v3678_v42, %v3614_v5  ;;  %v3983_v19 = vmul.f32 %v3975_v46, %v7954_v50 }
 0x2bc   : > { %v3873_v54 = vadd.f32 -1.4531521, %v3865_v25  ;;  %4879 = vpow2.f32 %v3957_v12  ;;  %v8054_v28 = vsub.f32 %v4009_v56, %v8019_v8  ;;  %v8056_v31 = vand.u32 4294901760, %v4008_v3 }
 0x2bd   : > { %v4876_v38 = vpop.eup %4875  ;;  %v3928_v18 = vmul.f32 %v3920_v59, %v7947_v29  ;;  %v4182_v22 = vand.u32 4294901760, %v4181_v48  ;;  %v8061_v37 = vmul.f32 0.70710677, %v8050_v2  ;;  %v8066_v42 = vsub.f32 %v8007_v27, %v8573_v43 }
 0x2be   : > { %8918 = vst [vmem:[#allocation39_spill] sm:$0xff] %v8056_v31  ;;  %v3881_v13 = vmul.f32 %v3873_v54, %v8029_v1  ;;  %v8069_v50 = vmul.f32 %v3990_v7, %v7824_v41  ;;  %v3817_v56 = vmul.f32 %v4876_v38, %v8009_v60  ;;  %v3825_v46 = vand.u32 2147483647, %v8009_v60  ;;  %4046 = vmatpush.msrb.mxu2 %v8056_v31  ;;  %v4007_v41 = vld [vmem:[%s8390_s8 + $0x10] sm:$0xff] }
 0x2bf   : > { %4282 = vmatpush.msra.mxu0 %v8054_v28  ;;  %v3946_v12 = vmul.f32 %v3938_v17, %v7988_v10  ;;  %4183 = vmatpush.msrb.mxu3 %v4182_v22  ;;  %v8077_v59 = vand.u32 2147483647, %v8061_v37  ;;  %v8575_v25 = vand.u32 4294901760, %v8054_v28  ;;  %v3991_v7 = vadd.f32 1.0, %v3983_v19 }
 0x2c0   : > { %v3889_v29 = vadd.f32 1.4214138, %v3881_v13  ;;  %4361 = vmatpush.msra.mxu1 %v8056_v31  ;;  %v4878_v5 = vpop.eup %4877  ;;  %v3818_v54 = vsub.f32 1.0, %v3817_v56  ;;  %v3827_v48 = vand.u32 2147483648, %v8009_v60  ;;  %v8086_v13 = vsub.f32 %v4008_v3, %v8056_v31  ;;  %v3617_v31 = vpop.f32.mrf.mxu0 }
 0x2c1   : > { %v3968_v10 = vmul.f32 %v4878_v5, %v3928_v18  ;;  %v3731_v22 = vmul.f32 0.3275911, %v8077_v59  ;;  %v4187_v61 = vsub.f32 %v8054_v28, %v8575_v25  ;;  %vm3822_vm9 = vweird.f32 %v4876_v38 }
 0x2c2   : > { %v3897_v17 = vmul.f32 %v3889_v29, %v8029_v1  ;;  %v4880_v44 = vpop.eup %4879  ;;  %v3819_v55 = vmul.f32 %v4876_v38, %v3818_v54  ;;  %v8577_v19 = vand.u32 4294901760, %v8086_v13  ;;  %v8094_v56 = vand.u32 4294901760, %v4007_v41  ;;  %4285 = vmatpush.msra.mxu0 %v8086_v13 }
 0x2c3   : > { %vm3821_vm10 = vweird.f32 %v8009_v60  ;;  %v8098_v18 = vadd.f32 1.0, %v3731_v22  ;;  %v4188_v29 = vand.u32 4294901760, %v4187_v61  ;;  %v3959_v43 = vmul.f32 1.442695, %v3946_v12 }
 0x2c4   : > { %8919 = vst [vmem:[#allocation27_spill] sm:$0xff] %v8094_v56  ;;  %v3905_v3 = vadd.f32 -0.28449672, %v3897_v17  ;;  %v3820_v5 = vadd.f32 %v4876_v38, %v3819_v55  ;;  %v4193_v54 = vsub.f32 %v8086_v13, %v8577_v19  ;;  %v8104_v25 = vsub.f32 %v4007_v41, %v8094_v56  ;;  %4048 = vmatpush.msrb.mxu2 %v8094_v56  ;;  %vm3823_vm11 = vmor %vm3821_vm10, %vm3822_vm9  ;;  %v4006_v41 = vld [vmem:[%s8390_s8 + $0x8] sm:$0xff] }
 0x2c5   : > { %v3976_v8 = vsub.f32 1.0, %v3968_v10  ;;  %v3828_v60 = vor.u32 1.1754944e-38, %v3827_v48  ;;  %4881 = vrcp.f32 %v8098_v18  ;;  %4189 = vmatpush.msrb.mxu3 %v4188_v29  ;;  %4363 = vmatpush.msra.mxu1 %v8094_v56  ;;  %v4057_v55 = vand.u32 4294901760, %v8066_v42  ;;  %v3682_v10 = vpop.f32.mrf.mxu1 }
 0x2c6   : > { %8920 = vst [vmem:[#allocation32_spill] sm:$0xff] %v8104_v25  ;;  %v3913_v17 = vmul.f32 %v3905_v3, %v8029_v1  ;;  %v8113_v61 = vmul.f32 %v3991_v7, %v7945_v35  ;;  %v3824_v12 = vsel %vm3823_vm11, %v4876_v38, %v3820_v5  ;;  %vm3826_vm12 = vcmp.eq.f32.partialorder %v3825_v46, 8.507059e+37  ;;  %4288 = vmatpush.msra.mxu0 %v8104_v25  ;;  %v4005_v35 = vld [vmem:[%s8390_s8] sm:$0xff] }
 0x2c7   : > { %v8119_v22 = vsel %vm3826_vm12, %v3828_v60, %v3824_v12  ;;  %v3618_v3 = vadd.f32 %v3617_v31, %v7771_v51  ;;  %v4194_v29 = vand.u32 4294901760, %v4193_v54  ;;  %v8126_v38 = vand.u32 4294901760, %v8069_v50 }
 0x2c8   : > { %v3921_v48 = vadd.f32 0.2548296, %v3913_v17  ;;  %v3866_v42 = vmul.f32 1.0614054, %v8119_v22  ;;  %4883 = vpow2.f32 %v3959_v43  ;;  %v8578_v46 = vand.u32 4294901760, %v8104_v25 }
 0x2c9   : > { %v3984_v7 = vmul.f32 %v3976_v8, %v8027_v20  ;;  %4195 = vmatpush.msrb.mxu3 %v4194_v29  ;;  %v8132_v17 = vand.u32 4294901760, %v4006_v41  ;;  %v8134_v51 = vadd.f32 %v3682_v10, %v3618_v3  ;;  %v8137_v31 = vand.u32 4294901760, %v8113_v61 }
 0x2ca   : > { %v3929_v5 = vmul.f32 %v3921_v48, %v8029_v1  ;;  %v3874_v54 = vadd.f32 -1.4531521, %v3866_v42  ;;  %v4199_v60 = vsub.f32 %v8104_v25, %v8578_v46  ;;  %v8142_v43 = vand.u32 4294901760, %v4005_v35 }
 0x2cb   : > { %8921 = vst [vmem:[#allocation29_spill] sm:$0xff] %v8132_v17  ;;  %v4882_v12 = vpop.eup %4881  ;;  %v3939_v8 = vsub.f32 0.0, %v8077_v59  ;;  %v8146_v20 = vsub.f32 %v4006_v41, %v8132_v17  ;;  %v8149_v1 = vmul.f32 0.70710677, %v8134_v51  ;;  %4050 = vmatpush.msrb.mxu2 %v8132_v17  ;;  %4365 = vmatpush.msra.mxu1 %v8132_v17  ;;  %v3992_v29 = vadd.f32 1.0, %v3984_v7 }
 0x2cc   : > { %8922 = vst [vmem:[#allocation24_spill] sm:$0xff] %v8134_v51  ;;  %v3969_v19 = vmul.f32 %v4880_v44, %v3929_v5  ;;  %v3882_v10 = vmul.f32 %v3874_v54, %v8119_v22  ;;  %v3832_v48 = vmul.f32 %v4882_v12, %v8098_v18  ;;  %v4200_v3 = vand.u32 4294901760, %v4199_v60 }
 0x2cd   : > { %8923 = vst [vmem:[#allocation16_spill] sm:$0xff] %v8142_v43  ;;  %v8157_v44 = vsub.f32 %v8069_v50, %v8126_v38  ;;  %v8583_v41 = vand.u32 4294901760, %v8146_v20  ;;  %v8161_v5 = vand.u32 2147483647, %v8149_v1  ;;  %4291 = vmatpush.msra.mxu0 %v8146_v20  ;;  %4367 = vmatpush.msra.mxu1 %v8142_v43  ;;  %v3840_v60 = vand.u32 2147483647, %v8098_v18 }
 0x2ce   : > { %8924 = vst [vmem:[#allocation19_spill] sm:$0xff] %v8146_v20  ;;  %v3977_v42 = vsub.f32 1.0, %v3969_v19  ;;  %v4884_v46 = vpop.eup %4883  ;;  %v3890_v54 = vadd.f32 1.4214138, %v3882_v10  ;;  %v3833_v51 = vsub.f32 1.0, %v3832_v48  ;;  %4201 = vmatpush.msrb.mxu3 %v4200_v3  ;;  %v8167_v50 = vsub.f32 %v4005_v35, %v8142_v43  ;;  %4052 = vmatpush.msrb.mxu2 %v8142_v43 }
 0x2cf   : > { %8925 = vst [vmem:[#allocation41_spill] sm:$0xff] %v8149_v1  ;;  %vm3837_vm13 = vweird.f32 %v4882_v12  ;;  %v3842_v19 = vand.u32 2147483648, %v8098_v18  ;;  %v4205_v7 = vsub.f32 %v8146_v20, %v8583_v41  ;;  %v3732_v1 = vmul.f32 0.3275911, %v8161_v5  ;;  %4058 = vmatmul.f32.vlgmr.msrb.gmra.mxu2 %v4057_v55 }
 0x2d0   : > { %v8926_v10 = vand.u32 4294901760, %v8007_v27  ;;  %v3898_v48 = vmul.f32 %v3890_v54, %v8119_v22  ;;  %v3834_v3 = vmul.f32 %v4882_v12, %v3833_v51  ;;  %v4210_v35 = vand.u32 4294901760, %v8167_v50  ;;  %4294 = vmatpush.msra.mxu0 %v8167_v50 }
 0x2d1   : > { %v8927_v43 = vand.u32 4294901760, %v7677_v57  ;;  %v4063_v17 = vand.u32 4294901760, %v8157_v44  ;;  %v4000_v41 = vmul.f32 %v3992_v29, %v7964_v16  ;;  %v3985_v20 = vmul.f32 %v3977_v42, %v8044_v9  ;;  %4297 = vmatmul.f32.vlgmr.msra.gmra.mxu0 %v8007_v27 }
 0x2d2   : > { %4371 = vmatmul.f32.vlgmr.msra.gmra.mxu1 %v8926_v10  ;;  %v4206_v56 = vand.u32 4294901760, %v4205_v7  ;;  %v8185_v25 = vadd.f32 1.0, %v3732_v1  ;;  %v3906_v55 = vadd.f32 -0.28449672, %v3898_v48  ;;  %v3835_v51 = vadd.f32 %v4882_v12, %v3834_v3 }
 0x2d3   : > { %4420 = vmatpush.msra.mxu2 %v8927_v43  ;;  %vm3836_vm14 = vweird.f32 %v8098_v18  ;;  %v4211_v57 = vsub.f32 %v8167_v50, %v4210_v35  ;;  %v8928_v43 = vand.u32 4294901760, %v7695_v36  ;;  %v3843_v16 = vor.u32 1.1754944e-38, %v3842_v19 }
 0x2d4   : > { %vm3838_vm15 = vmor %vm3836_vm14, %vm3837_vm13  ;;  %4207 = vmatpush.msrb.mxu3 %v4206_v56  ;;  %4885 = vrcp.f32 %v8185_v25  ;;  %v4064_v9 = vsub.f32 %v8157_v44, %v4063_v17  ;;  %v8199_v27 = vsub.f32 %v8113_v61, %v8137_v31  ;;  %v3914_v18 = vmul.f32 %v3906_v55, %v8119_v22 }
 0x2d5   : > { %4424 = vmatpush.msra.mxu2 %v8928_v43  ;;  %v3839_v1 = vsel %vm3838_vm15, %v4882_v12, %v3835_v51  ;;  %vm3841_vm0 = vcmp.eq.f32.partialorder %v3840_v60, 8.507059e+37  ;;  %v8929_v29 = vand.u32 4294901760, %v7707_v34  ;;  %v8204_v36 = vand.u32 4294901760, %v4000_v41 }
 0x2d6   : > { %v3993_v42 = vadd.f32 1.0, %v3985_v20  ;;  %v8206_v54 = vsel %vm3841_vm0, %v3843_v16, %v3839_v1  ;;  %v4212_v56 = vand.u32 4294901760, %v4211_v57  ;;  %v3922_v19 = vadd.f32 0.2548296, %v3914_v18 }
 0x2d7   : > { %4428 = vmatpush.msra.mxu2 %v8929_v29  ;;  %v3867_v7 = vmul.f32 1.0614054, %v8206_v54  ;;  %v8930_v10 = vand.u32 4294901760, %v7748_v21  ;;  %v3689_v61 = vmul.f32 0.5, %v7892_v26  ;;  %v3947_v12 = vmul.f32 %v3939_v8, %v8077_v59 }
 0x2d8   : > { %4213 = vmatpush.msrb.mxu3 %v4212_v56  ;;  %v4065_v34 = vand.u32 4294901760, %v4064_v9  ;;  %v4071_v60 = vand.u32 4294901760, %v8199_v27  ;;  %vm3706_vm1 = vcmp.ge.f32.partialorder %v7971_v0, 0.0  ;;  %v3930_v20 = vmul.f32 %v3922_v19, %v8119_v22 }
 0x2d9   : > { %4432 = vmatpush.msra.mxu2 %v8930_v10  ;;  %v3875_v48 = vadd.f32 -1.4531521, %v3867_v7  ;;  %4215 = vmatmul.f32.vlgmr.msrb.gmra.mxu3 %v7985_v23  ;;  %v8931_v3 = vand.u32 4294901760, %v7775_v40  ;;  %v4001_v55 = vmul.f32 %v3993_v42, %v3689_v61  ;;  %v8222_v26 = vsub.f32 %v4000_v41, %v8204_v36 }
 0x2da   : > { %4377 = vmatmul.f32.gmra.mxu1 %v4063_v17  ;;  %v4886_v21 = vpop.eup %4885  ;;  %4302 = vmatmul.f32.gmra.mxu0 %v8157_v44  ;;  %v3970_v59 = vmul.f32 %v4884_v46, %v3930_v20  ;;  %v4072_v17 = vsub.f32 %v8199_v27, %v4071_v60  ;;  %v8932_v8 = vmov -1.0   ;;  %v3961_v51 = vmul.f32 1.442695, %v3947_v12 }
 0x2db   : > { %4436 = vmatpush.msra.mxu2 %v8931_v3  ;;  %4515 = vmatpush.msra.mxu3 %v7661_v49  ;;  %v3883_v0 = vmul.f32 %v3875_v48, %v8206_v54  ;;  %v3847_v22 = vmul.f32 %v4886_v21, %v8185_v25  ;;  %v3714_v40 = vsel %vm3706_vm1, 1.0, %v8932_v8  ;;  %v8933_v44 = vand.u32 4294901760, %v7814_v39 }
 0x2dc   : > { %4066 = vmatmul.f32.gmra.mxu2 %v4065_v34  ;;  %v3978_v49 = vsub.f32 1.0, %v3970_v59  ;;  %v3855_v46 = vand.u32 2147483647, %v8185_v25  ;;  %v8232_v43 = vand.u32 4294901760, %v4001_v55  ;;  %vm3852_vm2 = vweird.f32 %v4886_v21 }
 0x2dd   : > { %4517 = vmatpush.msra.mxu3 %v7679_v53  ;;  %4440 = vmatpush.msra.mxu2 %v8933_v44  ;;  %v3891_v57 = vadd.f32 1.4214138, %v3883_v0  ;;  %v3848_v41 = vsub.f32 1.0, %v3847_v22  ;;  %v3857_v16 = vand.u32 2147483648, %v8185_v25  ;;  %v4079_v9 = vand.u32 4294901760, %v8222_v26 }
 0x2de   : > { %v8934_v18 = vand.u32 4294901760, %v7856_v45  ;;  %v3986_v53 = vmul.f32 %v3978_v49, %v3714_v40  ;;  %v4073_v29 = vand.u32 4294901760, %v4072_v17  ;;  %v3690_v42 = vmul.f32 0.5, %v7961_v63 }
 0x2df   : > { %4519 = vmatpush.msra.mxu3 %v7690_v15  ;;  %v3899_v39 = vmul.f32 %v3891_v57, %v8206_v54  ;;  %v3849_v1 = vmul.f32 %v4886_v21, %v3848_v41  ;;  %vm3851_vm3 = vweird.f32 %v8185_v25  ;;  %v8935_v15 = vand.u32 4294901760, %v7895_v52  ;;  %v8941_v41 = vld [vmem:[#allocation28_spill] sm:$0xff] }
 0x2e0   : > { %4444 = vmatpush.msra.mxu2 %v8934_v18  ;;  %v3994_v56 = vadd.f32 1.0, %v3986_v53  ;;  %4887 = vpow2.f32 %v3961_v51  ;;  %vm3853_vm4 = vmor %vm3851_vm3, %vm3852_vm2  ;;  %vm3856_vm5 = vcmp.eq.f32.partialorder %v3855_v46, 8.507059e+37  ;;  %v3858_v45 = vor.u32 1.1754944e-38, %v3857_v16  ;;  %v8942_v46 = vld [vmem:[#allocation32_spill] sm:$0xff]  ;;  %v8945_v18 = vld [vmem:[#allocation27_spill] sm:$0xff] }
 0x2e1   : > { %4521 = vmatpush.msra.mxu3 %v7715_v14  ;;  %v3907_v19 = vadd.f32 -0.28449672, %v3899_v39  ;;  %v3850_v7 = vadd.f32 %v4886_v21, %v3849_v1  ;;  %v4086_v14 = vsub.f32 %v4001_v55, %v8232_v43  ;;  %v4080_v61 = vsub.f32 %v8222_v26, %v4079_v9  ;;  %v8946_v53 = vld [vmem:[#allocation19_spill] sm:$0xff] }
 0x2e2   : > { %4383 = vmatmul.f32.gmra.mxu1 %v4071_v60  ;;  %4219 = vmatmul.f32.gmra.mxu3 %v8126_v38  ;;  %v4002_v63 = vmul.f32 %v3994_v56, %v3690_v42  ;;  %v3940_v12 = vsub.f32 0.0, %v8161_v5  ;;  %v8936_v34 = vand.u32 4294901760, %v7936_v47  ;;  %v8937_v20 = vand.u32 4294901760, %v7975_v32  ;;  %v8948_v56 = vld [vmem:[#allocation29_spill] sm:$0xff] }
 0x2e3   : > { %4448 = vmatpush.msra.mxu2 %v8935_v15  ;;  %4307 = vmatmul.f32.gmra.mxu0 %v8199_v27  ;;  %v3915_v10 = vmul.f32 %v3907_v19, %v8206_v54  ;;  %v3854_v25 = vsel %vm3853_vm4, %v4886_v21, %v3850_v7  ;;  %v4081_v55 = vand.u32 4294901760, %v4080_v61  ;;  %vm3707_vm6 = vcmp.ge.f32.partialorder %v8061_v37, 0.0  ;;  %v8949_v19 = vld [vmem:[#allocation41_spill] sm:$0xff] }
 0x2e4   : > { %4523 = vmatpush.msra.mxu3 %v7750_v62  ;;  %4074 = vmatmul.f32.gmra.mxu2 %v4073_v29  ;;  %v3859_v52 = vsel %vm3856_vm5, %v3858_v45, %v3854_v25  ;;  %v4087_v62 = vand.u32 4294901760, %v4086_v14  ;;  %v8259_v48 = vand.u32 4294901760, %v4002_v63  ;;  %v8938_v32 = vand.u32 4294901760, %v8017_v24 }
 0x2e5   : > { %4452 = vmatpush.msra.mxu2 %v8936_v34  ;;  %v3923_v27 = vadd.f32 0.2548296, %v3915_v10  ;;  %v3868_v60 = vmul.f32 1.0614054, %v3859_v52  ;;  %v8939_v17 = vand.u32 4294901760, %v8054_v28  ;;  %v8943_v16 = vand.u32 4294901760, %v8942_v46 }
 0x2e6   : > { %4525 = vmatpush.msra.mxu3 %v7777_v33  ;;  %v4888_v59 = vpop.eup %4887  ;;  %v3948_v33 = vmul.f32 %v3940_v12, %v8161_v5  ;;  %v4088_v5 = vsub.f32 %v4086_v14, %v4087_v62  ;;  %v4094_v22 = vsub.f32 %v4002_v63, %v8259_v48  ;;  %v8947_v39 = vand.u32 4294901760, %v8946_v53 }
 0x2e7   : > { %4456 = vmatpush.msra.mxu2 %v8937_v20  ;;  %v3931_v3 = vmul.f32 %v3923_v27, %v8206_v54  ;;  %v3876_v21 = vadd.f32 -1.4531521, %v3868_v60  ;;  %vm3708_vm7 = vcmp.ge.f32.partialorder %v8949_v19, 0.0 }
 0x2e8   : > { %4527 = vmatpush.msra.mxu3 %v7841_v30  ;;  %v3963_v37 = vmul.f32 1.442695, %v3948_v33  ;;  %v4089_v49 = vand.u32 4294901760, %v4088_v5  ;;  %v4095_v57 = vand.u32 4294901760, %v4094_v22  ;;  %v3716_v10 = vsel %vm3708_vm7, 1.0, %v8932_v8 }
 0x2e9   : > { %v3971_v47 = vmul.f32 %v4888_v59, %v3931_v3  ;;  %v3884_v30 = vmul.f32 %v3876_v21, %v3859_v52  ;;  %4460 = vmatpush.msra.mxu2 %v8938_v32 }
 0x2ea   : > { %4389 = vmatmul.f32.gmra.mxu1 %v4079_v9  ;;  %4529 = vmatpush.msra.mxu3 %v7845_v6  ;;  %v3715_v6 = vsel %vm3707_vm6, 1.0, %v8932_v8  ;;  %4889 = vpow2.f32 %v3963_v37  ;;  %v4096_v9 = vsub.f32 %v4094_v22, %v4095_v57 }
 0x2eb   : > { %4223 = vmatmul.f32.gmra.mxu3 %v8137_v31  ;;  %4312 = vmatmul.f32.gmra.mxu0 %v8222_v26  ;;  %v3979_v54 = vsub.f32 1.0, %v3971_v47  ;;  %v3892_v0 = vadd.f32 1.4214138, %v3884_v30  ;;  %v3691_v26 = vmul.f32 0.5, %v8050_v2 }
 0x2ec   : > { %4531 = vmatpush.msra.mxu3 %v7897_v4  ;;  %4082 = vmatmul.f32.gmra.mxu2 %v4081_v55  ;;  %v8940_v4 = vand.u32 4294901760, %v8086_v13  ;;  %v4097_v15 = vand.u32 4294901760, %v4096_v9 }
 0x2ed   : > { %4464 = vmatpush.msra.mxu2 %v8939_v17  ;;  %v3987_v24 = vmul.f32 %v3979_v54, %v3715_v6  ;;  %v3900_v40 = vmul.f32 %v3892_v0, %v3859_v52 }
 0x2ee   : > { %4533 = vmatpush.msra.mxu3 %v7908_v58 }
 0x2ef   : > { %4468 = vmatpush.msra.mxu2 %v8940_v4  ;;  %v3995_v51 = vadd.f32 1.0, %v3987_v24  ;;  %v3908_v44 = vadd.f32 -0.28449672, %v3900_v40 }
 0x2f0   : > { %4535 = vmatpush.msra.mxu3 %v8004_v11  ;;  %v8944_v11 = vld [vmem:[#allocation39_spill] sm:$0xff]  ;;  %v4890_v42 = vpop.eup %4889 }
 0x2f1   : > { %v4003_v58 = vmul.f32 %v3995_v51, %v3691_v26  ;;  %v3916_v28 = vmul.f32 %v3908_v44, %v3859_v52  ;;  %4472 = vmatpush.msra.mxu2 %v8943_v16 }
 0x2f2   : > { %4395 = vmatmul.f32.gmra.mxu1 %v4087_v62  ;;  %4537 = vmatpush.msra.mxu3 %v8941_v41 }
 0x2f3   : > { %4227 = vmatmul.f32.gmra.mxu3 %v8204_v36  ;;  %4317 = vmatmul.f32.gmra.mxu0 %v4086_v14  ;;  %v4101_v2 = vand.u32 4294901760, %v4003_v58  ;;  %v3924_v13 = vadd.f32 0.2548296, %v3916_v28  ;;  %v8950_v14 = vld [vmem:[#allocation16_spill] sm:$0xff] }
 0x2f4   : > { %4539 = vmatpush.msra.mxu3 %v8944_v11  ;;  %4090 = vmatmul.f32.gmra.mxu2 %v4089_v49 }
 0x2f5   : > { %4476 = vmatpush.msra.mxu2 %v8947_v39  ;;  %v3932_v1 = vmul.f32 %v3924_v13, %v3859_v52  ;;  %v4102_v29 = vsub.f32 %v4003_v58, %v4101_v2  ;;  %v8951_v52 = vld [vmem:[#allocation24_spill] sm:$0xff] }
 0x2f6   : > { %4541 = vmatpush.msra.mxu3 %v8945_v18  ;;  %v3692_v50 = vmul.f32 0.5, %v8951_v52 }
 0x2f7   : > { %4480 = vmatpush.msra.mxu2 %v4210_v35  ;;  %v3972_v7 = vmul.f32 %v4890_v42, %v3932_v1  ;;  %v4103_v45 = vand.u32 4294901760, %v4102_v29 }
 0x2f8   : > { %4543 = vmatpush.msra.mxu3 %v8948_v56 }
 0x2f9   : > { %v3980_v63 = vsub.f32 1.0, %v3972_v7  ;;  %v4104_v61 = vsub.f32 %v4102_v29, %v4103_v45 }
 0x2fa   : > { %4401 = vmatmul.f32.gmra.mxu1 %v4095_v57  ;;  %4545 = vmatpush.msra.mxu3 %v8950_v14 }
 0x2fb   : > { %4231 = vmatmul.f32.gmra.mxu3 %v8232_v43  ;;  %4322 = vmatmul.f32.gmra.mxu0 %v4094_v22  ;;  %v3988_v25 = vmul.f32 %v3980_v63, %v3716_v10  ;;  %v4105_v34 = vand.u32 4294901760, %v4104_v61 }
 0x2fc   : > { %4098 = vmatmul.f32.gmra.mxu2 %v4097_v15 }
 0x2fd   : > { %v3996_v35 = vadd.f32 1.0, %v3988_v25 }
 0x2ff   : > { %v4004_v12 = vmul.f32 %v3996_v35, %v3692_v50 }
 0x301   : > { %v4109_v27 = vand.u32 4294901760, %v4004_v12 }
 0x302   : > { %4407 = vmatmul.f32.gmra.mxu1 %v4103_v45 }
 0x303   : > { %4235 = vmatmul.f32.gmra.mxu3 %v8259_v48  ;;  %4327 = vmatmul.f32.gmra.mxu0 %v4102_v29  ;;  %v4110_v60 = vsub.f32 %v4004_v12, %v4109_v27 }
 0x304   : > { %4106 = vmatmul.f32.gmra.mxu2 %v4105_v34 }
 0x305   : > { %v4111_v62 = vand.u32 4294901760, %v4110_v60 }
 0x307   : > { %v4112_v20 = vsub.f32 %v4110_v60, %v4111_v62 }
 0x309   : > { %v4113_v8 = vand.u32 4294901760, %v4112_v20 }
 0x30a   : > { %4413 = vmatmul.f32.gmra.mxu1 %v4111_v62 }
 0x30b   : > { %4239 = vmatmul.f32.gmra.mxu3 %v4101_v2  ;;  %4332 = vmatmul.f32.gmra.mxu0 %v4110_v60 }
 0x30c   : > { %4114 = vmatmul.f32.gmra.mxu2 %v4113_v8 }
 0x313   : > { %4243 = vmatmul.f32.gmra.mxu3 %v4109_v27 }
 0x314   : > { %4482 = vmatmul.f32.vlgmr.msra.gmra.mxu2 %v7985_v23 }
 0x31b   : > { %4547 = vmatmul.f32.vlgmr.msra.gmra.mxu3 %v7985_v23 }
 0x31c   : > { %4486 = vmatmul.f32.gmra.mxu2 %v8126_v38 }
 0x323   : > { %4551 = vmatmul.f32.gmra.mxu3 %v8126_v38 }
 0x324   : > { %4490 = vmatmul.f32.gmra.mxu2 %v8137_v31 }
 0x32b   : > { %4555 = vmatmul.f32.gmra.mxu3 %v8137_v31 }
 0x32c   : > { %4494 = vmatmul.f32.gmra.mxu2 %v8204_v36 }
 0x333   : > { %4559 = vmatmul.f32.gmra.mxu3 %v8204_v36 }
 0x334   : > { %4498 = vmatmul.f32.gmra.mxu2 %v8232_v43 }
 0x33b   : > { %4563 = vmatmul.f32.gmra.mxu3 %v8232_v43 }
 0x33c   : > { %4502 = vmatmul.f32.gmra.mxu2 %v8259_v48 }
 0x343   : > { %4567 = vmatmul.f32.gmra.mxu3 %v8259_v48 }
 0x344   : > { %4506 = vmatmul.f32.gmra.mxu2 %v4101_v2 }
 0x34b   : > { %4571 = vmatmul.f32.gmra.mxu3 %v4101_v2 }
 0x34c   : > { %4510 = vmatmul.f32.gmra.mxu2 %v4109_v27 }
 0x34e   : > { %v4298_v43 = vpop.f32.mrf.mxu0 }
 0x34f   : > { %v4372_v54 = vpop.f32.mrf.mxu1 }
 0x352   : > { %v4059_v23 = vpop.f32.mrf.mxu2 }
 0x353   : > { %4575 = vmatmul.f32.gmra.mxu3 %v4109_v27 }
 0x357   : > { %v4303_v5 = vpop.f32.mrf.mxu0  ;;  %v4378_v37 = vpop.f32.mrf.mxu1 }
 0x35c   : > { %v4216_v38 = vpop.f32.mrf.mxu3 }
 0x35d   : > { %v4217_v6 = vadd.f32 %v4216_v38, %v4059_v23 }
 0x35f   : > { %v4067_v3 = vpop.f32.mrf.mxu2  ;;  %v4299_v17 = vadd.f32 %v4298_v43, %v4217_v6  ;;  %v4384_v57 = vpop.f32.mrf.mxu1 }
 0x360   : > { %v4308_v51 = vpop.f32.mrf.mxu0 }
 0x361   : > { %v4373_v4 = vadd.f32 %v4372_v54, %v4299_v17 }
 0x365   : > { %v4220_v31 = vpop.f32.mrf.mxu3 }
 0x366   : > { %v4221_v26 = vadd.f32 %v4220_v31, %v4067_v3 }
 0x367   : > { %v4075_v21 = vpop.f32.mrf.mxu2  ;;  %v4390_v39 = vpop.f32.mrf.mxu1 }
 0x368   : > { %v4304_v49 = vadd.f32 %v4303_v5, %v4221_v26  ;;  %v4313_v13 = vpop.f32.mrf.mxu0 }
 0x36a   : > { %v4379_v11 = vadd.f32 %v4378_v37, %v4304_v49 }
 0x36e   : > { %v4224_v55 = vpop.f32.mrf.mxu3 }
 0x36f   : > { %v4083_v59 = vpop.f32.mrf.mxu2  ;;  %v4225_v46 = vadd.f32 %v4224_v55, %v4075_v21  ;;  %v4396_v34 = vpop.f32.mrf.mxu1  ;;  %v8952_v55 = vld [vmem:[#allocation8_spill] sm:$0xff] }
 0x370   : > { %v4318_v14 = vpop.f32.mrf.mxu0 }
 0x371   : > { %v4309_v9 = vadd.f32 %v4308_v51, %v4225_v46 }
 0x373   : > { %v4385_v19 = vadd.f32 %v4384_v57, %v4309_v9 }
 0x376   : > { %v4228_v36 = vpop.f32.mrf.mxu3 }
 0x377   : > { %v4091_v33 = vpop.f32.mrf.mxu2  ;;  %v4229_v42 = vadd.f32 %v4228_v36, %v4083_v59  ;;  %v8953_v59 = vld [vmem:[#allocation46_spill] sm:$0xff] }
 0x378   : > { %v1968_v36 = vadd.f32 %v8953_v59, %v8952_v55 }
 0x379   : > { %v4314_v45 = vadd.f32 %v4313_v13, %v4229_v42 }
 0x37b   : > { %v4391_v35 = vadd.f32 %v4390_v39, %v4314_v45  ;;  %v8957_v45 = vld [vmem:[#allocation3_spill] sm:$0xff] }
 0x37e   : > { %v4232_v47 = vpop.f32.mrf.mxu3 }
 0x37f   : > { %v8308_v30 = vpop.f32.mrf.mxu2  ;;  %v4233_v25 = vadd.f32 %v4232_v47, %v4091_v33  ;;  %v4323_v33 = vpop.f32.mrf.mxu0 }
 0x381   : > { %v4319_v20 = vadd.f32 %v4318_v14, %v4233_v25 }
 0x383   : > { %v4397_v47 = vadd.f32 %v4396_v34, %v4319_v20 }
 0x386   : > { %v8310_v32 = vpop.f32.mrf.mxu3 }
 0x387   : > { %v8312_v48 = vpop.f32.mrf.mxu2  ;;  %v4237_v5 = vadd.f32 %v8310_v32, %v8308_v30 }
 0x389   : > { %v4324_v30 = vadd.f32 %v4323_v33, %v4237_v5 }
 0x38e   : > { %v8314_v0 = vpop.f32.mrf.mxu3 }
 0x38f   : > { %v8316_v22 = vpop.f32.mrf.mxu2 }
 0x396   : > { %v8318_v24 = vpop.f32.mrf.mxu3 }
 0x397   : > { %v4483_v40 = vpop.f32.mrf.mxu2 }
 0x398   : > { %v4484_v44 = vadd.f32 %v4483_v40, %v4373_v4  ;;  %v8954_v40 = vld [vmem:[#allocation42_spill] sm:$0xff] }
 0x399   : > { %v2033_v26 = vadd.f32 %v8954_v40, %v1968_v36  ;;  %v4245_v36 = vadd.f32 %v8318_v24, %v8316_v22 }
 0x39e   : > { %v4548_v41 = vpop.f32.mrf.mxu3 }
 0x39f   : > { %v4549_v58 = vadd.f32 %v4548_v41, %v4484_v44  ;;  %v4487_v28 = vpop.f32.mrf.mxu2  ;;  %v4402_v41 = vpop.f32.mrf.mxu1 }
 0x3a0   : > { %v4488_v2 = vadd.f32 %v4487_v28, %v4379_v11 }
 0x3a1   : > { %v4819_v16 = vmul.f32 -1.442695, %v4549_v58 }
 0x3a3   : > { %4891 = vpow2.f32 %v4819_v16 }
 0x3a6   : > { %v4552_v18 = vpop.f32.mrf.mxu3 }
 0x3a7   : > { %v4553_v53 = vadd.f32 %v4552_v18, %v4488_v2  ;;  %v4491_v1 = vpop.f32.mrf.mxu2  ;;  %v8955_v18 = vld [vmem:[#allocation10_spill] sm:$0xff]  ;;  %v4408_v34 = vpop.f32.mrf.mxu1 }
 0x3a8   : > { %v4492_v15 = vadd.f32 %v4491_v1, %v4385_v19  ;;  %v4241_v1 = vadd.f32 %v8314_v0, %v8312_v48 }
 0x3a9   : > { %v4892_v29 = vpop.eup %4891  ;;  %v4820_v56 = vmul.f32 -1.442695, %v4553_v53  ;;  %v8956_v53 = vld [vmem:[#allocation43_spill] sm:$0xff] }
 0x3aa   : > { %v4603_v7 = vadd.f32 1.0, %v4892_v29  ;;  %v1972_v39 = vadd.f32 %v8956_v53, %v8955_v18 }
 0x3ab   : > { %4893 = vpow2.f32 %v4820_v56 }
 0x3ac   : > { %4895 = vrcp.f32 %v4603_v7  ;;  %v4620_v23 = vand.u32 2147483647, %v4603_v7  ;;  %v4622_v38 = vand.u32 2147483648, %v4603_v7  ;;  %vm4616_vm9 = vweird.f32 %v4603_v7 }
 0x3ad   : > { %v2037_v14 = vadd.f32 %v8957_v45, %v1972_v39 }
 0x3ae   : > { %v4556_v63 = vpop.f32.mrf.mxu3  ;;  %vm4621_vm11 = vcmp.eq.f32.partialorder %v4620_v23, 8.507059e+37  ;;  %v4623_v4 = vor.u32 1.1754944e-38, %v4622_v38  ;;  %v8958_v38 = vld [vmem:[#allocation45_spill] sm:$0xff] }
 0x3af   : > { %v4557_v10 = vadd.f32 %v4556_v63, %v4492_v15  ;;  %v4495_v61 = vpop.f32.mrf.mxu2  ;;  %v4328_v63 = vpop.f32.mrf.mxu0 }
 0x3b0   : > { %v4496_v62 = vadd.f32 %v4495_v61, %v4391_v35  ;;  %v4329_v0 = vadd.f32 %v4328_v63, %v4241_v1  ;;  %v8963_v1 = vld [vmem:[#allocation20_spill] sm:$0xff] }
 0x3b1   : > { %v4894_v52 = vpop.eup %4893  ;;  %v4821_v50 = vmul.f32 -1.442695, %v4557_v10 }
 0x3b2   : > { %v4896_v12 = vpop.eup %4895  ;;  %v4604_v27 = vadd.f32 1.0, %v4894_v52 }
 0x3b3   : > { %v4612_v60 = vmul.f32 %v4896_v12, %v4603_v7  ;;  %4897 = vpow2.f32 %v4821_v50  ;;  %vm4617_vm8 = vweird.f32 %v4896_v12  ;;  %v4403_v7 = vadd.f32 %v4402_v41, %v4324_v30 }
 0x3b4   : > { %4899 = vrcp.f32 %v4604_v27  ;;  %vm4618_vm10 = vmor %vm4616_vm9, %vm4617_vm8  ;;  %v4635_v46 = vand.u32 2147483647, %v4604_v27  ;;  %v4637_v16 = vand.u32 2147483648, %v4604_v27  ;;  %vm4631_vm13 = vweird.f32 %v4604_v27 }
 0x3b5   : > { %v4613_v8 = vsub.f32 1.0, %v4612_v60 }
 0x3b6   : > { %v4560_v3 = vpop.f32.mrf.mxu3  ;;  %vm4636_vm15 = vcmp.eq.f32.partialorder %v4635_v46, 8.507059e+37  ;;  %v4638_v10 = vor.u32 1.1754944e-38, %v4637_v16  ;;  %v8962_v46 = vld [vmem:[#allocation12_spill] sm:$0xff] }
 0x3b7   : > { %v4614_v31 = vmul.f32 %v4896_v12, %v4613_v8  ;;  %v4561_v21 = vadd.f32 %v4560_v3, %v4496_v62  ;;  %v4499_v43 = vpop.f32.mrf.mxu2  ;;  %v8959_v3 = vld [vmem:[#allocation14_spill] sm:$0xff] }
 0x3b8   : > { %v4500_v57 = vadd.f32 %v4499_v43, %v4397_v47 }
 0x3b9   : > { %v4898_v54 = vpop.eup %4897  ;;  %v4615_v6 = vadd.f32 %v4896_v12, %v4614_v31  ;;  %v4822_v37 = vmul.f32 -1.442695, %v4561_v21  ;;  %v1976_v31 = vadd.f32 %v8959_v3, %v8958_v38  ;;  %v4409_v21 = vadd.f32 %v4408_v34, %v4329_v0 }
 0x3ba   : > { %v4900_v17 = vpop.eup %4899  ;;  %v8325_v51 = vadd.f32 1.0, %v4898_v54  ;;  %v8960_v54 = vld [vmem:[#allocation44_spill] sm:$0xff] }
 0x3bb   : > { %v4619_v44 = vsel %vm4618_vm10, %v4896_v12, %v4615_v6  ;;  %v4627_v49 = vmul.f32 %v4900_v17, %v4604_v27  ;;  %4901 = vpow2.f32 %v4822_v37  ;;  %vm4632_vm12 = vweird.f32 %v4900_v17 }
 0x3bc   : > { %v4624_v58 = vsel %vm4621_vm11, %v4623_v4, %v4619_v44  ;;  %4903 = vrcp.f32 %v8325_v51  ;;  %vm4633_vm14 = vmor %vm4631_vm13, %vm4632_vm12  ;;  %v4650_v27 = vand.u32 2147483647, %v8325_v51  ;;  %v4652_v60 = vand.u32 2147483648, %v8325_v51  ;;  %v4333_v4 = vpop.f32.mrf.mxu0 }
 0x3bd   : > { %v4731_v32 = vmul.f32 %v4624_v58, %v2033_v26  ;;  %v4628_v28 = vsub.f32 1.0, %v4627_v49  ;;  %vm4646_vm1 = vweird.f32 %v8325_v51  ;;  %v2041_v5 = vadd.f32 %v8960_v54, %v1976_v31 }
 0x3be   : > { %v4564_v11 = vpop.f32.mrf.mxu3  ;;  %vm4651_vm3 = vcmp.eq.f32.partialorder %v4650_v27, 8.507059e+37  ;;  %v4653_v6 = vor.u32 1.1754944e-38, %v4652_v60  ;;  %v4334_v22 = vadd.f32 %v4333_v4, %v4245_v36 }
 0x3bf   : > { %v4739_v2 = vsub.f32 0.0, %v4731_v32  ;;  %v4629_v13 = vmul.f32 %v4900_v17, %v4628_v28  ;;  %v4565_v9 = vadd.f32 %v4564_v11, %v4500_v57  ;;  %v4503_v29 = vpop.f32.mrf.mxu2  ;;  %v8961_v28 = vld [vmem:[#allocation40_spill] sm:$0xff]  ;;  %v4414_v11 = vpop.f32.mrf.mxu1 }
 0x3c0   : > { %v4504_v48 = vadd.f32 %v4503_v29, %v4403_v7  ;;  %v1980_v16 = vadd.f32 %v8962_v46, %v8961_v28  ;;  %v4415_v53 = vadd.f32 %v4414_v11, %v4334_v22  ;;  %v8970_v46 = vld [vmem:[#allocation31_spill] sm:$0xff] }
 0x3c1   : > { %v4902_v42 = vpop.eup %4901  ;;  %4747 = vst [vmem:[%s8333_s11] sm:$0xff] %v4739_v2  ;;  %v4630_v56 = vadd.f32 %v4900_v17, %v4629_v13  ;;  %v4823_v19 = vmul.f32 -1.442695, %v4565_v9 }
 0x3c2   : > { %v4904_v15 = vpop.eup %4903  ;;  %v8341_v25 = vadd.f32 1.0, %v4902_v42  ;;  %v2045_v29 = vadd.f32 %v8963_v1, %v1980_v16  ;;  %v8971_v16 = vld [vmem:[#allocation17_spill] sm:$0xff] }
 0x3c3   : > { %v4634_v61 = vsel %vm4633_vm14, %v4900_v17, %v4630_v56  ;;  %v4642_v52 = vmul.f32 %v4904_v15, %v8325_v51  ;;  %4905 = vpow2.f32 %v4823_v19  ;;  %vm4647_vm0 = vweird.f32 %v4904_v15 }
 0x3c4   : > { %v4639_v50 = vsel %vm4636_vm15, %v4638_v10, %v4634_v61  ;;  %4907 = vrcp.f32 %v8341_v25  ;;  %vm4648_vm2 = vmor %vm4646_vm1, %vm4647_vm0  ;;  %v4665_v49 = vand.u32 2147483647, %v8341_v25  ;;  %v4667_v57 = vand.u32 2147483648, %v8341_v25 }
 0x3c5   : > { %v4732_v35 = vmul.f32 %v4639_v50, %v2037_v14  ;;  %v4643_v12 = vsub.f32 1.0, %v4642_v52  ;;  %vm4661_vm5 = vweird.f32 %v8341_v25  ;;  %v8964_v50 = vld [vmem:[#allocation5_spill] sm:$0xff]  ;;  %v1992_v11 = vadd.f32 %v8971_v16, %v8970_v46 }
 0x3c6   : > { %v4568_v62 = vpop.f32.mrf.mxu3  ;;  %vm4666_vm7 = vcmp.eq.f32.partialorder %v4665_v49, 8.507059e+37  ;;  %v4668_v42 = vor.u32 1.1754944e-38, %v4667_v57 }
 0x3c7   : > { %v4740_v20 = vsub.f32 0.0, %v4732_v35  ;;  %v4644_v8 = vmul.f32 %v4904_v15, %v4643_v12  ;;  %v4569_v23 = vadd.f32 %v4568_v62, %v4504_v48  ;;  %v4507_v55 = vpop.f32.mrf.mxu2  ;;  %v8965_v35 = vld [vmem:[#allocation13_spill] sm:$0xff] }
 0x3c8   : > { %v4508_v26 = vadd.f32 %v4507_v55, %v4409_v21  ;;  %v1984_v12 = vadd.f32 %v8965_v35, %v8964_v50 }
 0x3c9   : > { %v4906_v59 = vpop.eup %4905  ;;  %4748 = vst [vmem:[%s8333_s11 + $0x8] sm:$0xff] %v4740_v20  ;;  %v4645_v33 = vadd.f32 %v4904_v15, %v4644_v8  ;;  %v4824_v47 = vmul.f32 -1.442695, %v4569_v23  ;;  %v8966_v20 = vld [vmem:[#allocation37_spill] sm:$0xff] }
 0x3ca   : > { %v4908_v43 = vpop.eup %4907  ;;  %v4607_v37 = vadd.f32 1.0, %v4906_v59  ;;  %v2049_v8 = vadd.f32 %v8966_v20, %v1984_v12 }
 0x3cb   : > { %v4649_v17 = vsel %vm4648_vm2, %v4904_v15, %v4645_v33  ;;  %v4657_v40 = vmul.f32 %v4908_v43, %v8341_v25  ;;  %4909 = vpow2.f32 %v4824_v47  ;;  %vm4662_vm4 = vweird.f32 %v4908_v43 }
 0x3cc   : > { %v4654_v44 = vsel %vm4651_vm3, %v4653_v6, %v4649_v17  ;;  %4911 = vrcp.f32 %v4607_v37  ;;  %vm4663_vm6 = vmor %vm4661_vm5, %vm4662_vm4  ;;  %v4680_v10 = vand.u32 2147483647, %v4607_v37  ;;  %v4682_v25 = vand.u32 2147483648, %v4607_v37  ;;  %v8968_v6 = vld [vmem:[#allocation6_spill] sm:$0xff] }
 0x3cd   : > { %v4733_v24 = vmul.f32 %v4654_v44, %v2041_v5  ;;  %v4658_v51 = vsub.f32 1.0, %v4657_v40  ;;  %vm4676_vm9 = vweird.f32 %v4607_v37  ;;  %v8967_v5 = vld [vmem:[#allocation33_spill] sm:$0xff]  ;;  %v8969_v44 = vld [vmem:[#allocation36_spill] sm:$0xff] }
 0x3ce   : > { %v4572_v41 = vpop.f32.mrf.mxu3  ;;  %v4683_v23 = vor.u32 1.1754944e-38, %v4682_v25  ;;  %vm4681_vm11 = vcmp.eq.f32.partialorder %v4680_v10, 8.507059e+37 }
 0x3cf   : > { %v4741_v58 = vsub.f32 0.0, %v4733_v24  ;;  %v4659_v30 = vmul.f32 %v4908_v43, %v4658_v51  ;;  %v4573_v32 = vadd.f32 %v4572_v41, %v4508_v26  ;;  %v4511_v2 = vpop.f32.mrf.mxu2 }
 0x3d0   : > { %v4512_v15 = vadd.f32 %v4511_v2, %v4415_v53 }
 0x3d1   : > { %v4910_v13 = vpop.eup %4909  ;;  %4749 = vst [vmem:[%s8333_s11 + $0x10] sm:$0xff] %v4741_v58  ;;  %v4660_v9 = vadd.f32 %v4908_v43, %v4659_v30  ;;  %v4825_v18 = vmul.f32 -1.442695, %v4573_v32 }
 0x3d2   : > { %v4912_v39 = vpop.eup %4911  ;;  %v4608_v56 = vadd.f32 1.0, %v4910_v13 }
 0x3d3   : > { %v4664_v19 = vsel %vm4663_vm6, %v4908_v43, %v4660_v9  ;;  %v4672_v7 = vmul.f32 %v4912_v39, %v4607_v37  ;;  %4913 = vpow2.f32 %v4825_v18  ;;  %vm4677_vm8 = vweird.f32 %v4912_v39  ;;  %v8972_v18 = vld [vmem:[#allocation11_spill] sm:$0xff] }
 0x3d4   : > { %v4669_v45 = vsel %vm4666_vm7, %v4668_v42, %v4664_v19  ;;  %4915 = vrcp.f32 %v4608_v56  ;;  %vm4678_vm10 = vmor %vm4676_vm9, %vm4677_vm8  ;;  %v4697_v36 = vand.u32 2147483648, %v4608_v56  ;;  %v4695_v43 = vand.u32 2147483647, %v4608_v56 }
 0x3d5   : > { %v4734_v14 = vmul.f32 %v4669_v45, %v2045_v29  ;;  %v4673_v63 = vsub.f32 1.0, %v4672_v7  ;;  %v1988_v37 = vadd.f32 %v8968_v6, %v8967_v5  ;;  %vm4691_vm13 = vweird.f32 %v4608_v56 }
 0x3d6   : > { %v4576_v61 = vpop.f32.mrf.mxu3  ;;  %v4698_v26 = vor.u32 1.1754944e-38, %v4697_v36  ;;  %vm4696_vm15 = vcmp.eq.f32.partialorder %v4695_v43, 8.507059e+37  ;;  %v2057_v53 = vadd.f32 %v8972_v18, %v1992_v11 }
 0x3d7   : > { %v4742_v52 = vsub.f32 0.0, %v4734_v14  ;;  %v4674_v48 = vmul.f32 %v4912_v39, %v4673_v63  ;;  %v4577_v0 = vadd.f32 %v4576_v61, %v4512_v15  ;;  %v2053_v22 = vadd.f32 %v8969_v44, %v1988_v37  ;;  %v8973_v14 = vld [vmem:[#allocation4_spill] sm:$0xff]  ;;  %v8974_v63 = vld [vmem:[#allocation47_spill] sm:$0xff] }
 0x3d8   : > { %v1996_v10 = vadd.f32 %v8974_v63, %v8973_v14 }
 0x3d9   : > { %v4914_v34 = vpop.eup %4913  ;;  %4750 = vst [vmem:[%s8333_s11 + $0x18] sm:$0xff] %v4742_v52  ;;  %v4675_v27 = vadd.f32 %v4912_v39, %v4674_v48  ;;  %v4826_v60 = vmul.f32 -1.442695, %v4577_v0  ;;  %v8975_v52 = vld [vmem:[#allocation7_spill] sm:$0xff] }
 0x3da   : > { %v4916_v62 = vpop.eup %4915  ;;  %v4609_v38 = vadd.f32 1.0, %v4914_v34  ;;  %v2061_v48 = vadd.f32 %v8975_v52, %v1996_v10 }
 0x3db   : > { %v4679_v3 = vsel %vm4678_vm10, %v4912_v39, %v4675_v27  ;;  %v4687_v31 = vmul.f32 %v4916_v62, %v4608_v56  ;;  %4917 = vpow2.f32 %v4826_v60  ;;  %vm4692_vm12 = vweird.f32 %v4916_v62 }
 0x3dc   : > { %v4684_v21 = vsel %vm4681_vm11, %v4683_v23, %v4679_v3  ;;  %4919 = vrcp.f32 %v4609_v38  ;;  %vm4693_vm14 = vmor %vm4691_vm13, %vm4692_vm12  ;;  %v4712_v58 = vand.u32 2147483648, %v4609_v38  ;;  %v4710_v28 = vand.u32 2147483647, %v4609_v38 }
 0x3dd   : > { %v4735_v55 = vmul.f32 %v4684_v21, %v2049_v8  ;;  %v4688_v59 = vsub.f32 1.0, %v4687_v31  ;;  %vm4706_vm1 = vweird.f32 %v4609_v38 }
 0x3de   : > { %v4713_v9 = vor.u32 1.1754944e-38, %v4712_v58  ;;  %vm4711_vm3 = vcmp.eq.f32.partialorder %v4710_v28, 8.507059e+37 }
 0x3df   : > { %v4743_v33 = vsub.f32 0.0, %v4735_v55  ;;  %v4689_v47 = vmul.f32 %v4916_v62, %v4688_v59 }
 0x3e1   : > { %v4918_v54 = vpop.eup %4917  ;;  %4751 = vst [vmem:[%s8333_s11 + $0x20] sm:$0xff] %v4743_v33  ;;  %v4690_v17 = vadd.f32 %v4916_v62, %v4689_v47 }
 0x3e2   : > { %v4920_v40 = vpop.eup %4919  ;;  %v4610_v4 = vadd.f32 1.0, %v4918_v54 }
 0x3e3   : > { %v4694_v24 = vsel %vm4693_vm14, %v4916_v62, %v4690_v17  ;;  %v4702_v51 = vmul.f32 %v4920_v40, %v4609_v38  ;;  %vm4707_vm0 = vweird.f32 %v4920_v40 }
 0x3e4   : > { %v4699_v49 = vsel %vm4696_vm15, %v4698_v26, %v4694_v24  ;;  %4921 = vrcp.f32 %v4610_v4  ;;  %vm4708_vm2 = vmor %vm4706_vm1, %vm4707_vm0  ;;  %v4727_v19 = vand.u32 2147483648, %v4610_v4  ;;  %v4725_v45 = vand.u32 2147483647, %v4610_v4 }
 0x3e5   : > { %v4736_v57 = vmul.f32 %v4699_v49, %v2053_v22  ;;  %v4703_v41 = vsub.f32 1.0, %v4702_v51  ;;  %vm4721_vm5 = vweird.f32 %v4610_v4 }
 0x3e6   : > { %v4728_v61 = vor.u32 1.1754944e-38, %v4727_v19  ;;  %vm4726_vm7 = vcmp.eq.f32.partialorder %v4725_v45, 8.507059e+37 }
 0x3e7   : > { %v4744_v30 = vsub.f32 0.0, %v4736_v57  ;;  %v4704_v32 = vmul.f32 %v4920_v40, %v4703_v41 }
 0x3e9   : > { %4752 = vst [vmem:[%s8333_s11 + $0x28] sm:$0xff] %v4744_v30  ;;  %v4705_v2 = vadd.f32 %v4920_v40, %v4704_v32 }
 0x3ea   : > { %v4922_v13 = vpop.eup %4921 }
 0x3eb   : > { %v4709_v39 = vsel %vm4708_vm2, %v4920_v40, %v4705_v2  ;;  %v4717_v1 = vmul.f32 %v4922_v13, %v4610_v4  ;;  %vm4722_vm4 = vweird.f32 %v4922_v13 }
 0x3ec   : > { %v4714_v29 = vsel %vm4711_vm3, %v4713_v9, %v4709_v39  ;;  %vm4723_vm6 = vmor %vm4721_vm5, %vm4722_vm4 }
 0x3ed   : > { %v4737_v42 = vmul.f32 %v4714_v29, %v2057_v53  ;;  %v4718_v56 = vsub.f32 1.0, %v4717_v1 }
 0x3ef   : > { %v4745_v7 = vsub.f32 0.0, %v4737_v42  ;;  %v4719_v15 = vmul.f32 %v4922_v13, %v4718_v56 }
 0x3f1   : > { %4753 = vst [vmem:[%s8333_s11 + $0x30] sm:$0xff] %v4745_v7  ;;  %v4720_v25 = vadd.f32 %v4922_v13, %v4719_v15 }
 0x3f3   : > { %v4724_v0 = vsel %vm4723_vm6, %v4922_v13, %v4720_v25 }
 0x3f4   : > { %v4729_v50 = vsel %vm4726_vm7, %v4728_v61, %v4724_v0 }
 0x3f5   : > { %v4738_v35 = vmul.f32 %v4729_v50, %v2061_v48 }
 0x3f7   : > { %v4746_v12 = vsub.f32 0.0, %v4738_v35 }
 0x3f9   : > { %4754 = vst [vmem:[%s8333_s11 + $0x38] sm:$0xff] %v4746_v12 }
 0x3fa PF: > { %s19_s30 = sadd.s32 1, %s4935_s30  }
 0x3fb   : > { %p16_p4 = scmp.ge.s32.totalorder %s19_s30, 4  }
 0x3fd   :  { %18 = sbr.rel (!%p16_p4) target bundleno = 1 (0x1), region = 88 }

</bundles_post_ra>
